<compile_context>
chip_gen: v5e
topology: v5e:2x2
jax: 0.10.0
libtpu: 0.0.40
codegen_flags: <defaults>
</compile_context>

<pallas_src>
import functools

import jax
import jax.numpy as jnp
from jax.experimental import pallas as pl
from jax.experimental.pallas import tpu as pltpu

K = 4          # kernel size of every ConvTranspose2d in the DCGAN generator
BN_EPS = 1e-5  # PyTorch BatchNorm2d default eps

_STRIDES = (1, 2, 2, 2, 2)
_PADS = (0, 1, 1, 1, 1)


def _round_up(x, m):
    return ((x + m - 1) // m) * m


# ----------------------------------------------------------------------------
# Pallas kernels
# ----------------------------------------------------------------------------
def _act_matmul_kernel(x_ref, s_ref, b_ref, w_ref, o_ref, *, apply_act):
    # Optionally apply the previous layer's folded BatchNorm + ReLU
    # (x*scale + shift, relu) in f32, then one bf16 MXU matmul with f32 acc.
    x = x_ref[...]                                               # (TM, Ci) f32
    if apply_act:
        x = jnp.maximum(x * s_ref[...] + b_ref[...], 0.0)
    o_ref[...] = jnp.dot(x.astype(jnp.bfloat16), w_ref[...],
                         preferred_element_type=jnp.float32)     # (TM, Cout)


def _colstats_kernel(z_ref, sum_ref, sq_ref):
    # Tiled single-pass column sum / sum-of-squares reduction (f32).
    # Output blocks have a constant index_map -> VMEM-resident accumulators.
    @pl.when(pl.program_id(0) == 0)
    def _():
        sum_ref[...] = jnp.zeros_like(sum_ref)
        sq_ref[...] = jnp.zeros_like(sq_ref)

    z = z_ref[...]                                               # (TR, C) f32
    sum_ref[...] += jnp.sum(z, axis=0, keepdims=True)
    sq_ref[...] += jnp.sum(z * z, axis=0, keepdims=True)


def _tanh_kernel(x_ref, o_ref):
    o_ref[...] = jnp.tanh(x_ref[...])


# ----------------------------------------------------------------------------
# Pallas wrappers
# ----------------------------------------------------------------------------
def _pallas_act_matmul(x, scale, shift, w_bf16, apply_act):
    # x: (M, Ci) f32, w_bf16: (Ci, Cout) bf16 -> (M, Cout) f32.
    m, ci = x.shape
    cout = w_bf16.shape[1]

    # Lane-dense output columns (only the final layer, 16*nc=48, needs padding).
    cp = _round_up(cout, 128)
    if cp != cout:
        w_bf16 = jnp.pad(w_bf16, ((0, 0), (0, cp - cout)))

    # Row tiling: round M up to a multiple of the tile (no whole-array fallback).
    tm = min(1024, _round_up(m, 8))
    mp = _round_up(m, tm)
    if mp != m:
        x = jnp.pad(x, ((0, mp - m), (0, 0)))

    kernel = functools.partial(_act_matmul_kernel, apply_act=apply_act)
    y = pl.pallas_call(
        kernel,
        out_shape=jax.ShapeDtypeStruct((mp, cp), jnp.float32),
        grid=(mp // tm,),
        in_specs=[
            pl.BlockSpec((tm, ci), lambda i: (i, 0)),
            pl.BlockSpec((1, ci), lambda i: (0, 0)),
            pl.BlockSpec((1, ci), lambda i: (0, 0)),
            pl.BlockSpec((ci, cp), lambda i: (0, 0)),
        ],
        out_specs=pl.BlockSpec((tm, cp), lambda i: (i, 0)),
        compiler_params=pltpu.CompilerParams(dimension_semantics=("parallel",)),
    )(x, scale, shift, w_bf16)
    return y[:m, :cout]


def _pallas_colstats(z2d):
    # z2d: (R, C) f32 -> (sum, sumsq), each (1, C) f32, reduced over rows.
    r, c = z2d.shape
    tr = min(512, _round_up(r, 8))
    rp = _round_up(r, tr)
    if rp != r:
        z2d = jnp.pad(z2d, ((0, rp - r), (0, 0)))   # zero rows don't affect sums
    return pl.pallas_call(
        _colstats_kernel,
        out_shape=(jax.ShapeDtypeStruct((1, c), jnp.float32),
                   jax.ShapeDtypeStruct((1, c), jnp.float32)),
        grid=(rp // tr,),
        in_specs=[pl.BlockSpec((tr, c), lambda i: (i, 0))],
        out_specs=(pl.BlockSpec((1, c), lambda i: (0, 0)),
                   pl.BlockSpec((1, c), lambda i: (0, 0))),
        compiler_params=pltpu.CompilerParams(dimension_semantics=("arbitrary",)),
    )(z2d)


def _pallas_tanh(z):
    # Elementwise tanh on a lane-dense (rows, 512) view of the tensor.
    shape, total = z.shape, z.size
    lanes = 512
    r = pl.cdiv(total, lanes)
    tr = min(r, 2048)
    rp = _round_up(r, tr)
    flat = jnp.pad(z.reshape(-1), (0, rp * lanes - total)).reshape(rp, lanes)
    out = pl.pallas_call(
        _tanh_kernel,
        out_shape=jax.ShapeDtypeStruct((rp, lanes), jnp.float32),
        grid=(rp // tr,),
        in_specs=[pl.BlockSpec((tr, lanes), lambda i: (i, 0))],
        out_specs=pl.BlockSpec((tr, lanes), lambda i: (i, 0)),
        compiler_params=pltpu.CompilerParams(dimension_semantics=("parallel",)),
    )(flat)
    return out.reshape(-1)[:total].reshape(shape)


# ----------------------------------------------------------------------------
# Wrapper-side glue: scatter-free col2im (sub-pixel overlap-add) and BN folding
# ----------------------------------------------------------------------------
# For stride=2, pad=1, K=4: output parity -> ((kernel tap, input row shift), ...)
_TAPS = {0: ((1, 0), (3, -1)), 1: ((2, 0), (0, 1))}


def _shift2d(a, dj, dl):
    # b[:, j, l, :] = a[:, j+dj, l+dl, :], zero outside (pure pad/slice).
    _, h, w, _ = a.shape
    a = jnp.pad(a, ((0, 0), (max(-dj, 0), max(dj, 0)),
                    (max(-dl, 0), max(dl, 0)), (0, 0)))
    return a[:, max(dj, 0):max(dj, 0) + h, max(dl, 0):max(dl, 0) + w, :]


def _col2im(y6, stride, pad):
    # y6: (N, H, W, K, K, Co) conv-transpose contributions -> (N, Ho, Wo, Co).
    n, h, w, _, _, co = y6.shape
    if stride == 1 and pad == 0 and h == 1 and w == 1:
        return y6.reshape(n, K, K, co)               # 1x1 input: pure reshape
    if stride == 2 and pad == 1:
        subs = []
        for p in (0, 1):
            row = []
            for q in (0, 1):
                acc = None
                for kh, dj in _TAPS[p]:
                    for kw, dl in _TAPS[q]:
                        t = _shift2d(y6[:, :, :, kh, kw, :], dj, dl)
                        acc = t if acc is None else acc + t
                row.append(acc)
            subs.append(jnp.stack(row, axis=3))      # (N, H, W, 2, Co) over q
        out = jnp.stack(subs, axis=2)                # (N, H, 2, W, 2, Co) over p
        return out.reshape(n, 2 * h, 2 * w, co)
    raise ValueError("unsupported ConvTranspose2d config for DCGAN generator")


def _bn_fold(z, gamma, beta):
    # Training-mode batch stats (biased var), folded to per-channel scale/shift
    # that the NEXT layer's matmul kernel applies as one FMA + ReLU.
    n, ho, wo, co = z.shape
    sums, sqs = _pallas_colstats(z.reshape(n * ho, wo * co))
    sums = sums.reshape(wo, co).sum(axis=0)
    sqs = sqs.reshape(wo, co).sum(axis=0)
    count = n * ho * wo
    mean = sums / count
    var = jnp.maximum(sqs / count - mean * mean, 0.0)
    scale = gamma * jax.lax.rsqrt(var + BN_EPS)
    shift = beta - mean * scale
    return scale.reshape(1, co), shift.reshape(1, co)


# ----------------------------------------------------------------------------
# Generator: parameter init / prep + forward
# ----------------------------------------------------------------------------
def init_generator_params(key, nz, ngf, nc):
    # Mirrors the PyTorch module's parameters: ConvTranspose2d weights in
    # (Ci, Co, K, K) layout (no bias) and BatchNorm gamma/beta for layers 0-3.
    chans = [nz, ngf * 8, ngf * 4, ngf * 2, ngf, nc]
    params = []
    for li in range(5):
        key, kw, kg, kb = jax.random.split(key, 4)
        w = 0.02 * jax.random.normal(kw, (chans[li], chans[li + 1], K, K),
                                     jnp.float32)
        if li < 4:
            gamma = 1.0 + 0.1 * jax.random.normal(kg, (chans[li + 1],), jnp.float32)
            beta = 0.1 * jax.random.normal(kb, (chans[li + 1],), jnp.float32)
        else:
            gamma, beta = None, None
        params.append((w, gamma, beta))
    return params


def prepare_generator_params(params):
    # One-time (load-time) weight prep: (Ci, Co, K, K) -> bf16 (Ci, K*K*Co)
    # matmul matrix with columns ordered (kh, kw, co).  Done once, not per
    # forward pass.
    prepped = []
    for w_t, gamma, beta in params:
        ci, co = w_t.shape[0], w_t.shape[1]
        w_mat = jnp.transpose(w_t, (0, 2, 3, 1)).reshape(ci, K * K * co)
        prepped.append((w_mat.astype(jnp.bfloat16), gamma, beta))
    return prepped


def generator_forward(params, x_nchw):
    x = jnp.transpose(x_nchw, (0, 2, 3, 1))                  # NCHW -> NHWC
    scale = shift = None
    for li, (w_mat, gamma, beta) in enumerate(params):
        n, h, wd, ci = x.shape
        co = w_mat.shape[1] // (K * K)
        x2 = x.reshape(n * h * wd, ci)
        if li == 0:                                          # raw latent: no act
            scale = jnp.ones((1, ci), jnp.float32)
            shift = jnp.zeros((1, ci), jnp.float32)
        y = _pallas_act_matmul(x2, scale, shift, w_mat, apply_act=(li > 0))
        y6 = y.reshape(n, h, wd, K, K, co)
        z = _col2im(y6, _STRIDES[li], _PADS[li])             # pre-BN / pre-tanh
        if gamma is not None:
            scale, shift = _bn_fold(z, gamma, beta)          # fused into next matmul
            x = z
        else:
            x = _pallas_tanh(z)                              # final Tanh
    return jnp.transpose(x, (0, 3, 1, 2))                    # NHWC -> NCHW


if __name__ == "__main__":
    nz, ngf, nc, batch = 16, 8, 3, 2
    key = jax.random.PRNGKey(0)
    key, kx = jax.random.split(key)
    x = jax.random.normal(kx, (batch, nz, 1, 1), jnp.float32)   # latent, NCHW

    params = prepare_generator_params(init_generator_params(key, nz, ngf, nc))

    out = jax.jit(generator_forward)(params, x)
    out = jax.block_until_ready(out)

    assert out.shape == (batch, nc, 64, 64), out.shape
    assert bool(jnp.all(jnp.isfinite(out)))
    assert bool(jnp.all(jnp.abs(out) <= 1.0))  # tanh output range
    print("KERNEL_OK")
</pallas_src>

<mosaic_0001>
module attributes {stable_mosaic.version = 11 : i64} {
  func.func @_act_matmul_kernel(%arg0: i32, %arg1: memref<8x16xf32, #tpu.memory_space<vmem>>, %arg2: memref<1x16xf32, #tpu.memory_space<vmem>>, %arg3: memref<1x16xf32, #tpu.memory_space<vmem>>, %arg4: memref<16x1024xbf16, #tpu.memory_space<vmem>>, %arg5: memref<8x1024xf32, #tpu.memory_space<vmem>>) attributes {dimension_semantics = [#tpu.dimension_semantics<parallel>], iteration_bounds = array<i64: 1>, scalar_prefetch = 0 : i64, scratch_operands = 0 : i64, tpu.core_type = #tpu.core_type<tc>, window_params = [{transform_indices = @transform_0, window_bounds = array<i64: 8, 16>}, {pipeline_mode = #tpu.pipeline_mode<synchronous>, transform_indices = @transform_1, window_bounds = array<i64: 1, 16>}, {pipeline_mode = #tpu.pipeline_mode<synchronous>, transform_indices = @transform_2, window_bounds = array<i64: 1, 16>}, {pipeline_mode = #tpu.pipeline_mode<synchronous>, transform_indices = @transform_3, window_bounds = array<i64: 16, 1024>}, {transform_indices = @transform_4, window_bounds = array<i64: 8, 1024>}]} {
    %c0 = arith.constant 0 : index
    %c0_0 = arith.constant 0 : index
    %0 = vector.load %arg1[%c0, %c0_0] : memref<8x16xf32, #tpu.memory_space<vmem>>, vector<8x16xf32>
    %1 = arith.truncf %0 : vector<8x16xf32> to vector<8x16xbf16>
    %c0_1 = arith.constant 0 : index
    %c0_2 = arith.constant 0 : index
    %2 = vector.load %arg4[%c0_1, %c0_2] : memref<16x1024xbf16, #tpu.memory_space<vmem>>, vector<16x1024xbf16>
    %cst = arith.constant dense<0.000000e+00> : vector<8x1024xf32>
    %3 = tpu.matmul %1, %2, %cst {dimension_numbers = #tpu.dot_dimension_numbers<[1], [0], [0], [1], [0, 0, 1, 1], [], []>} : vector<8x16xbf16>, vector<16x1024xbf16>, vector<8x1024xf32> -> vector<8x1024xf32>
    %c0_3 = arith.constant 0 : index
    %c0_4 = arith.constant 0 : index
    %4 = vector.load %arg5[%c0_3, %c0_4] : memref<8x1024xf32, #tpu.memory_space<vmem>>, vector<8x1024xf32>
    tpu.vector_store %arg5[%c0_3, %c0_4], %3 {strides = array<i32>} : memref<8x1024xf32, #tpu.memory_space<vmem>>, vector<8x1024xf32>,
    return
  }
  func.func @transform_0(%arg0: i32) -> (i32, i32) {
    %c0_i32 = arith.constant 0 : i32
    %c0_i32_0 = arith.constant 0 : i32
    return %arg0, %c0_i32 : i32, i32
  }
  func.func @transform_1(%arg0: i32) -> (i32, i32) {
    %c0_i32 = arith.constant 0 : i32
    %c0_i32_0 = arith.constant 0 : i32
    %c0_i32_1 = arith.constant 0 : i32
    return %c0_i32, %c0_i32_0 : i32, i32
  }
  func.func @transform_2(%arg0: i32) -> (i32, i32) {
    %c0_i32 = arith.constant 0 : i32
    %c0_i32_0 = arith.constant 0 : i32
    %c0_i32_1 = arith.constant 0 : i32
    return %c0_i32, %c0_i32_0 : i32, i32
  }
  func.func @transform_3(%arg0: i32) -> (i32, i32) {
    %c0_i32 = arith.constant 0 : i32
    %c0_i32_0 = arith.constant 0 : i32
    %c0_i32_1 = arith.constant 0 : i32
    return %c0_i32, %c0_i32_0 : i32, i32
  }
  func.func @transform_4(%arg0: i32) -> (i32, i32) {
    %c0_i32 = arith.constant 0 : i32
    %c0_i32_0 = arith.constant 0 : i32
    return %arg0, %c0_i32 : i32, i32
  }
}

module attributes {stable_mosaic.version = 11 : i64} {
  func.func @_colstats_kernel(%arg0: i32, %arg1: memref<8x256xf32, #tpu.memory_space<vmem>>, %arg2: memref<1x256xf32, #tpu.memory_space<vmem>>, %arg3: memref<1x256xf32, #tpu.memory_space<vmem>>) attributes {dimension_semantics = [#tpu.dimension_semantics<arbitrary>], iteration_bounds = array<i64: 1>, scalar_prefetch = 0 : i64, scratch_operands = 0 : i64, tpu.core_type = #tpu.core_type<tc>, window_params = [{transform_indices = @transform_0, window_bounds = array<i64: 8, 256>}, {pipeline_mode = #tpu.pipeline_mode<synchronous>, transform_indices = @transform_1, window_bounds = array<i64: 1, 256>}, {pipeline_mode = #tpu.pipeline_mode<synchronous>, transform_indices = @transform_2, window_bounds = array<i64: 1, 256>}]} {
    %c0_i32 = arith.constant 0 : i32
    %0 = arith.cmpi eq, %arg0, %c0_i32 : i32
    %1 = arith.extui %0 : i1 to i32
    %c0_i32_0 = arith.constant 0 : i32
    %2 = arith.cmpi ne, %1, %c0_i32_0 : i32
    scf.if %2 {
      %cst_11 = arith.constant 0.000000e+00 : f32
      %15 = vector.broadcast %cst_11 : f32 to vector<1x256xf32>
      %c0_12 = arith.constant 0 : index
      %c0_13 = arith.constant 0 : index
      %16 = vector.load %arg2[%c0_12, %c0_13] : memref<1x256xf32, #tpu.memory_space<vmem>>, vector<1x256xf32>
      tpu.vector_store %arg2[%c0_12, %c0_13], %15 {strides = array<i32>} : memref<1x256xf32, #tpu.memory_space<vmem>>, vector<1x256xf32>,
      %cst_14 = arith.constant 0.000000e+00 : f32
      %17 = vector.broadcast %cst_14 : f32 to vector<1x256xf32>
      %c0_15 = arith.constant 0 : index
      %c0_16 = arith.constant 0 : index
      %18 = vector.load %arg3[%c0_15, %c0_16] : memref<1x256xf32, #tpu.memory_space<vmem>>, vector<1x256xf32>
      tpu.vector_store %arg3[%c0_15, %c0_16], %17 {strides = array<i32>} : memref<1x256xf32, #tpu.memory_space<vmem>>, vector<1x256xf32>,
    } else {
    }
    %c0 = arith.constant 0 : index
    %c0_1 = arith.constant 0 : index
    %3 = vector.load %arg1[%c0, %c0_1] : memref<8x256xf32, #tpu.memory_space<vmem>>, vector<8x256xf32>
    %c0_2 = arith.constant 0 : index
    %c0_3 = arith.constant 0 : index
    %4 = vector.load %arg2[%c0_2, %c0_3] : memref<1x256xf32, #tpu.memory_space<vmem>>, vector<1x256xf32>
    %cst = arith.constant dense<0.000000e+00> : vector<256xf32>
    %5 = vector.multi_reduction <add>, %3, %cst [0] : vector<8x256xf32> to vector<256xf32>
    %6 = vector.shape_cast %5 : vector<256xf32> to vector<1x256xf32>
    %7 = arith.addf %4, %6 : vector<1x256xf32>
    %c0_4 = arith.constant 0 : index
    %c0_5 = arith.constant 0 : index
    %8 = vector.load %arg2[%c0_4, %c0_5] : memref<1x256xf32, #tpu.memory_space<vmem>>, vector<1x256xf32>
    tpu.vector_store %arg2[%c0_4, %c0_5], %7 {strides = array<i32>} : memref<1x256xf32, #tpu.memory_space<vmem>>, vector<1x256xf32>,
    %c0_6 = arith.constant 0 : index
    %c0_7 = arith.constant 0 : index
    %9 = vector.load %arg3[%c0_6, %c0_7] : memref<1x256xf32, #tpu.memory_space<vmem>>, vector<1x256xf32>
    %10 = arith.mulf %3, %3 : vector<8x256xf32>
    %cst_8 = arith.constant dense<0.000000e+00> : vector<256xf32>
    %11 = vector.multi_reduction <add>, %10, %cst_8 [0] : vector<8x256xf32> to vector<256xf32>
    %12 = vector.shape_cast %11 : vector<256xf32> to vector<1x256xf32>
    %13 = arith.addf %9, %12 : vector<1x256xf32>
    %c0_9 = arith.constant 0 : index
    %c0_10 = arith.constant 0 : index
    %14 = vector.load %arg3[%c0_9, %c0_10] : memref<1x256xf32, #tpu.memory_space<vmem>>, vector<1x256xf32>
    tpu.vector_store %arg3[%c0_9, %c0_10], %13 {strides = array<i32>} : memref<1x256xf32, #tpu.memory_space<vmem>>, vector<1x256xf32>,
    return
  }
  func.func @transform_0(%arg0: i32) -> (i32, i32) {
    %c0_i32 = arith.constant 0 : i32
    %c0_i32_0 = arith.constant 0 : i32
    return %arg0, %c0_i32 : i32, i32
  }
  func.func @transform_1(%arg0: i32) -> (i32, i32) {
    %c0_i32 = arith.constant 0 : i32
    %c0_i32_0 = arith.constant 0 : i32
    %c0_i32_1 = arith.constant 0 : i32
    return %c0_i32, %c0_i32_0 : i32, i32
  }
  func.func @transform_2(%arg0: i32) -> (i32, i32) {
    %c0_i32 = arith.constant 0 : i32
    %c0_i32_0 = arith.constant 0 : i32
    %c0_i32_1 = arith.constant 0 : i32
    return %c0_i32, %c0_i32_0 : i32, i32
  }
}

module attributes {stable_mosaic.version = 11 : i64} {
  func.func @_act_matmul_kernel(%arg0: i32, %arg1: memref<32x64xf32, #tpu.memory_space<vmem>>, %arg2: memref<1x64xf32, #tpu.memory_space<vmem>>, %arg3: memref<1x64xf32, #tpu.memory_space<vmem>>, %arg4: memref<64x512xbf16, #tpu.memory_space<vmem>>, %arg5: memref<32x512xf32, #tpu.memory_space<vmem>>) attributes {dimension_semantics = [#tpu.dimension_semantics<parallel>], iteration_bounds = array<i64: 1>, scalar_prefetch = 0 : i64, scratch_operands = 0 : i64, tpu.core_type = #tpu.core_type<tc>, window_params = [{transform_indices = @transform_0, window_bounds = array<i64: 32, 64>}, {pipeline_mode = #tpu.pipeline_mode<synchronous>, transform_indices = @transform_1, window_bounds = array<i64: 1, 64>}, {pipeline_mode = #tpu.pipeline_mode<synchronous>, transform_indices = @transform_2, window_bounds = array<i64: 1, 64>}, {pipeline_mode = #tpu.pipeline_mode<synchronous>, transform_indices = @transform_3, window_bounds = array<i64: 64, 512>}, {transform_indices = @transform_4, window_bounds = array<i64: 32, 512>}]} {
    %c0 = arith.constant 0 : index
    %c0_0 = arith.constant 0 : index
    %0 = vector.load %arg1[%c0, %c0_0] : memref<32x64xf32, #tpu.memory_space<vmem>>, vector<32x64xf32>
    %c0_1 = arith.constant 0 : index
    %c0_2 = arith.constant 0 : index
    %1 = vector.load %arg2[%c0_1, %c0_2] : memref<1x64xf32, #tpu.memory_space<vmem>>, vector<1x64xf32>
    %2 = vector.broadcast %1 : vector<1x64xf32> to vector<32x64xf32>
    %3 = arith.mulf %0, %2 : vector<32x64xf32>
    %c0_3 = arith.constant 0 : index
    %c0_4 = arith.constant 0 : index
    %4 = vector.load %arg3[%c0_3, %c0_4] : memref<1x64xf32, #tpu.memory_space<vmem>>, vector<1x64xf32>
    %5 = vector.broadcast %4 : vector<1x64xf32> to vector<32x64xf32>
    %6 = arith.addf %3, %5 : vector<32x64xf32>
    %cst = arith.constant 0.000000e+00 : f32
    %7 = vector.broadcast %cst : f32 to vector<32x64xf32>
    %8 = arith.maximumf %6, %7 : vector<32x64xf32>
    %9 = arith.truncf %8 : vector<32x64xf32> to vector<32x64xbf16>
    %c0_5 = arith.constant 0 : index
    %c0_6 = arith.constant 0 : index
    %10 = vector.load %arg4[%c0_5, %c0_6] : memref<64x512xbf16, #tpu.memory_space<vmem>>, vector<64x512xbf16>
    %cst_7 = arith.constant dense<0.000000e+00> : vector<32x512xf32>
    %11 = tpu.matmul %9, %10, %cst_7 {dimension_numbers = #tpu.dot_dimension_numbers<[1], [0], [0], [1], [0, 0, 1, 1], [], []>} : vector<32x64xbf16>, vector<64x512xbf16>, vector<32x512xf32> -> vector<32x512xf32>
    %c0_8 = arith.constant 0 : index
    %c0_9 = arith.constant 0 : index
    %12 = vector.load %arg5[%c0_8, %c0_9] : memref<32x512xf32, #tpu.memory_space<vmem>>, vector<32x512xf32>
    tpu.vector_store %arg5[%c0_8, %c0_9], %11 {strides = array<i32>} : memref<32x512xf32, #tpu.memory_space<vmem>>, vector<32x512xf32>,
    return
  }
  func.func @transform_0(%arg0: i32) -> (i32, i32) {
    %c0_i32 = arith.constant 0 : i32
    %c0_i32_0 = arith.constant 0 : i32
    return %arg0, %c0_i32 : i32, i32
  }
  func.func @transform_1(%arg0: i32) -> (i32, i32) {
    %c0_i32 = arith.constant 0 : i32
    %c0_i32_0 = arith.constant 0 : i32
    %c0_i32_1 = arith.constant 0 : i32
    return %c0_i32, %c0_i32_0 : i32, i32
  }
  func.func @transform_2(%arg0: i32) -> (i32, i32) {
    %c0_i32 = arith.constant 0 : i32
    %c0_i32_0 = arith.constant 0 : i32
    %c0_i32_1 = arith.constant 0 : i32
    return %c0_i32, %c0_i32_0 : i32, i32
  }
  func.func @transform_3(%arg0: i32) -> (i32, i32) {
    %c0_i32 = arith.constant 0 : i32
    %c0_i32_0 = arith.constant 0 : i32
    %c0_i32_1 = arith.constant 0 : i32
    return %c0_i32, %c0_i32_0 : i32, i32
  }
  func.func @transform_4(%arg0: i32) -> (i32, i32) {
    %c0_i32 = arith.constant 0 : i32
    %c0_i32_0 = arith.constant 0 : i32
    return %arg0, %c0_i32 : i32, i32
  }
}

module attributes {stable_mosaic.version = 11 : i64} {
  func.func @_colstats_kernel(%arg0: i32, %arg1: memref<16x256xf32, #tpu.memory_space<vmem>>, %arg2: memref<1x256xf32, #tpu.memory_space<vmem>>, %arg3: memref<1x256xf32, #tpu.memory_space<vmem>>) attributes {dimension_semantics = [#tpu.dimension_semantics<arbitrary>], iteration_bounds = array<i64: 1>, scalar_prefetch = 0 : i64, scratch_operands = 0 : i64, tpu.core_type = #tpu.core_type<tc>, window_params = [{transform_indices = @transform_0, window_bounds = array<i64: 16, 256>}, {pipeline_mode = #tpu.pipeline_mode<synchronous>, transform_indices = @transform_1, window_bounds = array<i64: 1, 256>}, {pipeline_mode = #tpu.pipeline_mode<synchronous>, transform_indices = @transform_2, window_bounds = array<i64: 1, 256>}]} {
    %c0_i32 = arith.constant 0 : i32
    %0 = arith.cmpi eq, %arg0, %c0_i32 : i32
    %1 = arith.extui %0 : i1 to i32
    %c0_i32_0 = arith.constant 0 : i32
    %2 = arith.cmpi ne, %1, %c0_i32_0 : i32
    scf.if %2 {
      %cst_11 = arith.constant 0.000000e+00 : f32
      %15 = vector.broadcast %cst_11 : f32 to vector<1x256xf32>
      %c0_12 = arith.constant 0 : index
      %c0_13 = arith.constant 0 : index
      %16 = vector.load %arg2[%c0_12, %c0_13] : memref<1x256xf32, #tpu.memory_space<vmem>>, vector<1x256xf32>
      tpu.vector_store %arg2[%c0_12, %c0_13], %15 {strides = array<i32>} : memref<1x256xf32, #tpu.memory_space<vmem>>, vector<1x256xf32>,
      %cst_14 = arith.constant 0.000000e+00 : f32
      %17 = vector.broadcast %cst_14 : f32 to vector<1x256xf32>
      %c0_15 = arith.constant 0 : index
      %c0_16 = arith.constant 0 : index
      %18 = vector.load %arg3[%c0_15, %c0_16] : memref<1x256xf32, #tpu.memory_space<vmem>>, vector<1x256xf32>
      tpu.vector_store %arg3[%c0_15, %c0_16], %17 {strides = array<i32>} : memref<1x256xf32, #tpu.memory_space<vmem>>, vector<1x256xf32>,
    } else {
    }
    %c0 = arith.constant 0 : index
    %c0_1 = arith.constant 0 : index
    %3 = vector.load %arg1[%c0, %c0_1] : memref<16x256xf32, #tpu.memory_space<vmem>>, vector<16x256xf32>
    %c0_2 = arith.constant 0 : index
    %c0_3 = arith.constant 0 : index
    %4 = vector.load %arg2[%c0_2, %c0_3] : memref<1x256xf32, #tpu.memory_space<vmem>>, vector<1x256xf32>
    %cst = arith.constant dense<0.000000e+00> : vector<256xf32>
    %5 = vector.multi_reduction <add>, %3, %cst [0] : vector<16x256xf32> to vector<256xf32>
    %6 = vector.shape_cast %5 : vector<256xf32> to vector<1x256xf32>
    %7 = arith.addf %4, %6 : vector<1x256xf32>
    %c0_4 = arith.constant 0 : index
    %c0_5 = arith.constant 0 : index
    %8 = vector.load %arg2[%c0_4, %c0_5] : memref<1x256xf32, #tpu.memory_space<vmem>>, vector<1x256xf32>
    tpu.vector_store %arg2[%c0_4, %c0_5], %7 {strides = array<i32>} : memref<1x256xf32, #tpu.memory_space<vmem>>, vector<1x256xf32>,
    %c0_6 = arith.constant 0 : index
    %c0_7 = arith.constant 0 : index
    %9 = vector.load %arg3[%c0_6, %c0_7] : memref<1x256xf32, #tpu.memory_space<vmem>>, vector<1x256xf32>
    %10 = arith.mulf %3, %3 : vector<16x256xf32>
    %cst_8 = arith.constant dense<0.000000e+00> : vector<256xf32>
    %11 = vector.multi_reduction <add>, %10, %cst_8 [0] : vector<16x256xf32> to vector<256xf32>
    %12 = vector.shape_cast %11 : vector<256xf32> to vector<1x256xf32>
    %13 = arith.addf %9, %12 : vector<1x256xf32>
    %c0_9 = arith.constant 0 : index
    %c0_10 = arith.constant 0 : index
    %14 = vector.load %arg3[%c0_9, %c0_10] : memref<1x256xf32, #tpu.memory_space<vmem>>, vector<1x256xf32>
    tpu.vector_store %arg3[%c0_9, %c0_10], %13 {strides = array<i32>} : memref<1x256xf32, #tpu.memory_space<vmem>>, vector<1x256xf32>,
    return
  }
  func.func @transform_0(%arg0: i32) -> (i32, i32) {
    %c0_i32 = arith.constant 0 : i32
    %c0_i32_0 = arith.constant 0 : i32
    return %arg0, %c0_i32 : i32, i32
  }
  func.func @transform_1(%arg0: i32) -> (i32, i32) {
    %c0_i32 = arith.constant 0 : i32
    %c0_i32_0 = arith.constant 0 : i32
    %c0_i32_1 = arith.constant 0 : i32
    return %c0_i32, %c0_i32_0 : i32, i32
  }
  func.func @transform_2(%arg0: i32) -> (i32, i32) {
    %c0_i32 = arith.constant 0 : i32
    %c0_i32_0 = arith.constant 0 : i32
    %c0_i32_1 = arith.constant 0 : i32
    return %c0_i32, %c0_i32_0 : i32, i32
  }
}

module attributes {stable_mosaic.version = 11 : i64} {
  func.func @_act_matmul_kernel(%arg0: i32, %arg1: memref<128x32xf32, #tpu.memory_space<vmem>>, %arg2: memref<1x32xf32, #tpu.memory_space<vmem>>, %arg3: memref<1x32xf32, #tpu.memory_space<vmem>>, %arg4: memref<32x256xbf16, #tpu.memory_space<vmem>>, %arg5: memref<128x256xf32, #tpu.memory_space<vmem>>) attributes {dimension_semantics = [#tpu.dimension_semantics<parallel>], iteration_bounds = array<i64: 1>, scalar_prefetch = 0 : i64, scratch_operands = 0 : i64, tpu.core_type = #tpu.core_type<tc>, window_params = [{transform_indices = @transform_0, window_bounds = array<i64: 128, 32>}, {pipeline_mode = #tpu.pipeline_mode<synchronous>, transform_indices = @transform_1, window_bounds = array<i64: 1, 32>}, {pipeline_mode = #tpu.pipeline_mode<synchronous>, transform_indices = @transform_2, window_bounds = array<i64: 1, 32>}, {pipeline_mode = #tpu.pipeline_mode<synchronous>, transform_indices = @transform_3, window_bounds = array<i64: 32, 256>}, {transform_indices = @transform_4, window_bounds = array<i64: 128, 256>}]} {
    %c0 = arith.constant 0 : index
    %c0_0 = arith.constant 0 : index
    %0 = vector.load %arg1[%c0, %c0_0] : memref<128x32xf32, #tpu.memory_space<vmem>>, vector<128x32xf32>
    %c0_1 = arith.constant 0 : index
    %c0_2 = arith.constant 0 : index
    %1 = vector.load %arg2[%c0_1, %c0_2] : memref<1x32xf32, #tpu.memory_space<vmem>>, vector<1x32xf32>
    %2 = vector.broadcast %1 : vector<1x32xf32> to vector<128x32xf32>
    %3 = arith.mulf %0, %2 : vector<128x32xf32>
    %c0_3 = arith.constant 0 : index
    %c0_4 = arith.constant 0 : index
    %4 = vector.load %arg3[%c0_3, %c0_4] : memref<1x32xf32, #tpu.memory_space<vmem>>, vector<1x32xf32>
    %5 = vector.broadcast %4 : vector<1x32xf32> to vector<128x32xf32>
    %6 = arith.addf %3, %5 : vector<128x32xf32>
    %cst = arith.constant 0.000000e+00 : f32
    %7 = vector.broadcast %cst : f32 to vector<128x32xf32>
    %8 = arith.maximumf %6, %7 : vector<128x32xf32>
    %9 = arith.truncf %8 : vector<128x32xf32> to vector<128x32xbf16>
    %c0_5 = arith.constant 0 : index
    %c0_6 = arith.constant 0 : index
    %10 = vector.load %arg4[%c0_5, %c0_6] : memref<32x256xbf16, #tpu.memory_space<vmem>>, vector<32x256xbf16>
    %cst_7 = arith.constant dense<0.000000e+00> : vector<128x256xf32>
    %11 = tpu.matmul %9, %10, %cst_7 {dimension_numbers = #tpu.dot_dimension_numbers<[1], [0], [0], [1], [0, 0, 1, 1], [], []>} : vector<128x32xbf16>, vector<32x256xbf16>, vector<128x256xf32> -> vector<128x256xf32>
    %c0_8 = arith.constant 0 : index
    %c0_9 = arith.constant 0 : index
    %12 = vector.load %arg5[%c0_8, %c0_9] : memref<128x256xf32, #tpu.memory_space<vmem>>, vector<128x256xf32>
    tpu.vector_store %arg5[%c0_8, %c0_9], %11 {strides = array<i32>} : memref<128x256xf32, #tpu.memory_space<vmem>>, vector<128x256xf32>,
    return
  }
  func.func @transform_0(%arg0: i32) -> (i32, i32) {
    %c0_i32 = arith.constant 0 : i32
    %c0_i32_0 = arith.constant 0 : i32
    return %arg0, %c0_i32 : i32, i32
  }
  func.func @transform_1(%arg0: i32) -> (i32, i32) {
    %c0_i32 = arith.constant 0 : i32
    %c0_i32_0 = arith.constant 0 : i32
    %c0_i32_1 = arith.constant 0 : i32
    return %c0_i32, %c0_i32_0 : i32, i32
  }
  func.func @transform_2(%arg0: i32) -> (i32, i32) {
    %c0_i32 = arith.constant 0 : i32
    %c0_i32_0 = arith.constant 0 : i32
    %c0_i32_1 = arith.constant 0 : i32
    return %c0_i32, %c0_i32_0 : i32, i32
  }
  func.func @transform_3(%arg0: i32) -> (i32, i32) {
    %c0_i32 = arith.constant 0 : i32
    %c0_i32_0 = arith.constant 0 : i32
    %c0_i32_1 = arith.constant 0 : i32
    return %c0_i32, %c0_i32_0 : i32, i32
  }
  func.func @transform_4(%arg0: i32) -> (i32, i32) {
    %c0_i32 = arith.constant 0 : i32
    %c0_i32_0 = arith.constant 0 : i32
    return %arg0, %c0_i32 : i32, i32
  }
}

module attributes {stable_mosaic.version = 11 : i64} {
  func.func @_colstats_kernel(%arg0: i32, %arg1: memref<32x256xf32, #tpu.memory_space<vmem>>, %arg2: memref<1x256xf32, #tpu.memory_space<vmem>>, %arg3: memref<1x256xf32, #tpu.memory_space<vmem>>) attributes {dimension_semantics = [#tpu.dimension_semantics<arbitrary>], iteration_bounds = array<i64: 1>, scalar_prefetch = 0 : i64, scratch_operands = 0 : i64, tpu.core_type = #tpu.core_type<tc>, window_params = [{transform_indices = @transform_0, window_bounds = array<i64: 32, 256>}, {pipeline_mode = #tpu.pipeline_mode<synchronous>, transform_indices = @transform_1, window_bounds = array<i64: 1, 256>}, {pipeline_mode = #tpu.pipeline_mode<synchronous>, transform_indices = @transform_2, window_bounds = array<i64: 1, 256>}]} {
    %c0_i32 = arith.constant 0 : i32
    %0 = arith.cmpi eq, %arg0, %c0_i32 : i32
    %1 = arith.extui %0 : i1 to i32
    %c0_i32_0 = arith.constant 0 : i32
    %2 = arith.cmpi ne, %1, %c0_i32_0 : i32
    scf.if %2 {
      %cst_11 = arith.constant 0.000000e+00 : f32
      %15 = vector.broadcast %cst_11 : f32 to vector<1x256xf32>
      %c0_12 = arith.constant 0 : index
      %c0_13 = arith.constant 0 : index
      %16 = vector.load %arg2[%c0_12, %c0_13] : memref<1x256xf32, #tpu.memory_space<vmem>>, vector<1x256xf32>
      tpu.vector_store %arg2[%c0_12, %c0_13], %15 {strides = array<i32>} : memref<1x256xf32, #tpu.memory_space<vmem>>, vector<1x256xf32>,
      %cst_14 = arith.constant 0.000000e+00 : f32
      %17 = vector.broadcast %cst_14 : f32 to vector<1x256xf32>
      %c0_15 = arith.constant 0 : index
      %c0_16 = arith.constant 0 : index
      %18 = vector.load %arg3[%c0_15, %c0_16] : memref<1x256xf32, #tpu.memory_space<vmem>>, vector<1x256xf32>
      tpu.vector_store %arg3[%c0_15, %c0_16], %17 {strides = array<i32>} : memref<1x256xf32, #tpu.memory_space<vmem>>, vector<1x256xf32>,
    } else {
    }
    %c0 = arith.constant 0 : index
    %c0_1 = arith.constant 0 : index
    %3 = vector.load %arg1[%c0, %c0_1] : memref<32x256xf32, #tpu.memory_space<vmem>>, vector<32x256xf32>
    %c0_2 = arith.constant 0 : index
    %c0_3 = arith.constant 0 : index
    %4 = vector.load %arg2[%c0_2, %c0_3] : memref<1x256xf32, #tpu.memory_space<vmem>>, vector<1x256xf32>
    %cst = arith.constant dense<0.000000e+00> : vector<256xf32>
    %5 = vector.multi_reduction <add>, %3, %cst [0] : vector<32x256xf32> to vector<256xf32>
    %6 = vector.shape_cast %5 : vector<256xf32> to vector<1x256xf32>
    %7 = arith.addf %4, %6 : vector<1x256xf32>
    %c0_4 = arith.constant 0 : index
    %c0_5 = arith.constant 0 : index
    %8 = vector.load %arg2[%c0_4, %c0_5] : memref<1x256xf32, #tpu.memory_space<vmem>>, vector<1x256xf32>
    tpu.vector_store %arg2[%c0_4, %c0_5], %7 {strides = array<i32>} : memref<1x256xf32, #tpu.memory_space<vmem>>, vector<1x256xf32>,
    %c0_6 = arith.constant 0 : index
    %c0_7 = arith.constant 0 : index
    %9 = vector.load %arg3[%c0_6, %c0_7] : memref<1x256xf32, #tpu.memory_space<vmem>>, vector<1x256xf32>
    %10 = arith.mulf %3, %3 : vector<32x256xf32>
    %cst_8 = arith.constant dense<0.000000e+00> : vector<256xf32>
    %11 = vector.multi_reduction <add>, %10, %cst_8 [0] : vector<32x256xf32> to vector<256xf32>
    %12 = vector.shape_cast %11 : vector<256xf32> to vector<1x256xf32>
    %13 = arith.addf %9, %12 : vector<1x256xf32>
    %c0_9 = arith.constant 0 : index
    %c0_10 = arith.constant 0 : index
    %14 = vector.load %arg3[%c0_9, %c0_10] : memref<1x256xf32, #tpu.memory_space<vmem>>, vector<1x256xf32>
    tpu.vector_store %arg3[%c0_9, %c0_10], %13 {strides = array<i32>} : memref<1x256xf32, #tpu.memory_space<vmem>>, vector<1x256xf32>,
    return
  }
  func.func @transform_0(%arg0: i32) -> (i32, i32) {
    %c0_i32 = arith.constant 0 : i32
    %c0_i32_0 = arith.constant 0 : i32
    return %arg0, %c0_i32 : i32, i32
  }
  func.func @transform_1(%arg0: i32) -> (i32, i32) {
    %c0_i32 = arith.constant 0 : i32
    %c0_i32_0 = arith.constant 0 : i32
    %c0_i32_1 = arith.constant 0 : i32
    return %c0_i32, %c0_i32_0 : i32, i32
  }
  func.func @transform_2(%arg0: i32) -> (i32, i32) {
    %c0_i32 = arith.constant 0 : i32
    %c0_i32_0 = arith.constant 0 : i32
    %c0_i32_1 = arith.constant 0 : i32
    return %c0_i32, %c0_i32_0 : i32, i32
  }
}

module attributes {stable_mosaic.version = 11 : i64} {
  func.func @_act_matmul_kernel(%arg0: i32, %arg1: memref<512x16xf32, #tpu.memory_space<vmem>>, %arg2: memref<1x16xf32, #tpu.memory_space<vmem>>, %arg3: memref<1x16xf32, #tpu.memory_space<vmem>>, %arg4: memref<16x128xbf16, #tpu.memory_space<vmem>>, %arg5: memref<512x128xf32, #tpu.memory_space<vmem>>) attributes {dimension_semantics = [#tpu.dimension_semantics<parallel>], iteration_bounds = array<i64: 1>, scalar_prefetch = 0 : i64, scratch_operands = 0 : i64, tpu.core_type = #tpu.core_type<tc>, window_params = [{transform_indices = @transform_0, window_bounds = array<i64: 512, 16>}, {pipeline_mode = #tpu.pipeline_mode<synchronous>, transform_indices = @transform_1, window_bounds = array<i64: 1, 16>}, {pipeline_mode = #tpu.pipeline_mode<synchronous>, transform_indices = @transform_2, window_bounds = array<i64: 1, 16>}, {pipeline_mode = #tpu.pipeline_mode<synchronous>, transform_indices = @transform_3, window_bounds = array<i64: 16, 128>}, {transform_indices = @transform_4, window_bounds = array<i64: 512, 128>}]} {
    %c0 = arith.constant 0 : index
    %c0_0 = arith.constant 0 : index
    %0 = vector.load %arg1[%c0, %c0_0] : memref<512x16xf32, #tpu.memory_space<vmem>>, vector<512x16xf32>
    %c0_1 = arith.constant 0 : index
    %c0_2 = arith.constant 0 : index
    %1 = vector.load %arg2[%c0_1, %c0_2] : memref<1x16xf32, #tpu.memory_space<vmem>>, vector<1x16xf32>
    %2 = vector.broadcast %1 : vector<1x16xf32> to vector<512x16xf32>
    %3 = arith.mulf %0, %2 : vector<512x16xf32>
    %c0_3 = arith.constant 0 : index
    %c0_4 = arith.constant 0 : index
    %4 = vector.load %arg3[%c0_3, %c0_4] : memref<1x16xf32, #tpu.memory_space<vmem>>, vector<1x16xf32>
    %5 = vector.broadcast %4 : vector<1x16xf32> to vector<512x16xf32>
    %6 = arith.addf %3, %5 : vector<512x16xf32>
    %cst = arith.constant 0.000000e+00 : f32
    %7 = vector.broadcast %cst : f32 to vector<512x16xf32>
    %8 = arith.maximumf %6, %7 : vector<512x16xf32>
    %9 = arith.truncf %8 : vector<512x16xf32> to vector<512x16xbf16>
    %c0_5 = arith.constant 0 : index
    %c0_6 = arith.constant 0 : index
    %10 = vector.load %arg4[%c0_5, %c0_6] : memref<16x128xbf16, #tpu.memory_space<vmem>>, vector<16x128xbf16>
    %cst_7 = arith.constant dense<0.000000e+00> : vector<512x128xf32>
    %11 = tpu.matmul %9, %10, %cst_7 {dimension_numbers = #tpu.dot_dimension_numbers<[1], [0], [0], [1], [0, 0, 1, 1], [], []>} : vector<512x16xbf16>, vector<16x128xbf16>, vector<512x128xf32> -> vector<512x128xf32>
    %c0_8 = arith.constant 0 : index
    %c0_9 = arith.constant 0 : index
    %12 = vector.load %arg5[%c0_8, %c0_9] : memref<512x128xf32, #tpu.memory_space<vmem>>, vector<512x128xf32>
    tpu.vector_store %arg5[%c0_8, %c0_9], %11 {strides = array<i32>} : memref<512x128xf32, #tpu.memory_space<vmem>>, vector<512x128xf32>,
    return
  }
  func.func @transform_0(%arg0: i32) -> (i32, i32) {
    %c0_i32 = arith.constant 0 : i32
    %c0_i32_0 = arith.constant 0 : i32
    return %arg0, %c0_i32 : i32, i32
  }
  func.func @transform_1(%arg0: i32) -> (i32, i32) {
    %c0_i32 = arith.constant 0 : i32
    %c0_i32_0 = arith.constant 0 : i32
    %c0_i32_1 = arith.constant 0 : i32
    return %c0_i32, %c0_i32_0 : i32, i32
  }
  func.func @transform_2(%arg0: i32) -> (i32, i32) {
    %c0_i32 = arith.constant 0 : i32
    %c0_i32_0 = arith.constant 0 : i32
    %c0_i32_1 = arith.constant 0 : i32
    return %c0_i32, %c0_i32_0 : i32, i32
  }
  func.func @transform_3(%arg0: i32) -> (i32, i32) {
    %c0_i32 = arith.constant 0 : i32
    %c0_i32_0 = arith.constant 0 : i32
    %c0_i32_1 = arith.constant 0 : i32
    return %c0_i32, %c0_i32_0 : i32, i32
  }
  func.func @transform_4(%arg0: i32) -> (i32, i32) {
    %c0_i32 = arith.constant 0 : i32
    %c0_i32_0 = arith.constant 0 : i32
    return %arg0, %c0_i32 : i32, i32
  }
}

module attributes {stable_mosaic.version = 11 : i64} {
  func.func @_colstats_kernel(%arg0: i32, %arg1: memref<64x256xf32, #tpu.memory_space<vmem>>, %arg2: memref<1x256xf32, #tpu.memory_space<vmem>>, %arg3: memref<1x256xf32, #tpu.memory_space<vmem>>) attributes {dimension_semantics = [#tpu.dimension_semantics<arbitrary>], iteration_bounds = array<i64: 1>, scalar_prefetch = 0 : i64, scratch_operands = 0 : i64, tpu.core_type = #tpu.core_type<tc>, window_params = [{transform_indices = @transform_0, window_bounds = array<i64: 64, 256>}, {pipeline_mode = #tpu.pipeline_mode<synchronous>, transform_indices = @transform_1, window_bounds = array<i64: 1, 256>}, {pipeline_mode = #tpu.pipeline_mode<synchronous>, transform_indices = @transform_2, window_bounds = array<i64: 1, 256>}]} {
    %c0_i32 = arith.constant 0 : i32
    %0 = arith.cmpi eq, %arg0, %c0_i32 : i32
    %1 = arith.extui %0 : i1 to i32
    %c0_i32_0 = arith.constant 0 : i32
    %2 = arith.cmpi ne, %1, %c0_i32_0 : i32
    scf.if %2 {
      %cst_11 = arith.constant 0.000000e+00 : f32
      %15 = vector.broadcast %cst_11 : f32 to vector<1x256xf32>
      %c0_12 = arith.constant 0 : index
      %c0_13 = arith.constant 0 : index
      %16 = vector.load %arg2[%c0_12, %c0_13] : memref<1x256xf32, #tpu.memory_space<vmem>>, vector<1x256xf32>
      tpu.vector_store %arg2[%c0_12, %c0_13], %15 {strides = array<i32>} : memref<1x256xf32, #tpu.memory_space<vmem>>, vector<1x256xf32>,
      %cst_14 = arith.constant 0.000000e+00 : f32
      %17 = vector.broadcast %cst_14 : f32 to vector<1x256xf32>
      %c0_15 = arith.constant 0 : index
      %c0_16 = arith.constant 0 : index
      %18 = vector.load %arg3[%c0_15, %c0_16] : memref<1x256xf32, #tpu.memory_space<vmem>>, vector<1x256xf32>
      tpu.vector_store %arg3[%c0_15, %c0_16], %17 {strides = array<i32>} : memref<1x256xf32, #tpu.memory_space<vmem>>, vector<1x256xf32>,
    } else {
    }
    %c0 = arith.constant 0 : index
    %c0_1 = arith.constant 0 : index
    %3 = vector.load %arg1[%c0, %c0_1] : memref<64x256xf32, #tpu.memory_space<vmem>>, vector<64x256xf32>
    %c0_2 = arith.constant 0 : index
    %c0_3 = arith.constant 0 : index
    %4 = vector.load %arg2[%c0_2, %c0_3] : memref<1x256xf32, #tpu.memory_space<vmem>>, vector<1x256xf32>
    %cst = arith.constant dense<0.000000e+00> : vector<256xf32>
    %5 = vector.multi_reduction <add>, %3, %cst [0] : vector<64x256xf32> to vector<256xf32>
    %6 = vector.shape_cast %5 : vector<256xf32> to vector<1x256xf32>
    %7 = arith.addf %4, %6 : vector<1x256xf32>
    %c0_4 = arith.constant 0 : index
    %c0_5 = arith.constant 0 : index
    %8 = vector.load %arg2[%c0_4, %c0_5] : memref<1x256xf32, #tpu.memory_space<vmem>>, vector<1x256xf32>
    tpu.vector_store %arg2[%c0_4, %c0_5], %7 {strides = array<i32>} : memref<1x256xf32, #tpu.memory_space<vmem>>, vector<1x256xf32>,
    %c0_6 = arith.constant 0 : index
    %c0_7 = arith.constant 0 : index
    %9 = vector.load %arg3[%c0_6, %c0_7] : memref<1x256xf32, #tpu.memory_space<vmem>>, vector<1x256xf32>
    %10 = arith.mulf %3, %3 : vector<64x256xf32>
    %cst_8 = arith.constant dense<0.000000e+00> : vector<256xf32>
    %11 = vector.multi_reduction <add>, %10, %cst_8 [0] : vector<64x256xf32> to vector<256xf32>
    %12 = vector.shape_cast %11 : vector<256xf32> to vector<1x256xf32>
    %13 = arith.addf %9, %12 : vector<1x256xf32>
    %c0_9 = arith.constant 0 : index
    %c0_10 = arith.constant 0 : index
    %14 = vector.load %arg3[%c0_9, %c0_10] : memref<1x256xf32, #tpu.memory_space<vmem>>, vector<1x256xf32>
    tpu.vector_store %arg3[%c0_9, %c0_10], %13 {strides = array<i32>} : memref<1x256xf32, #tpu.memory_space<vmem>>, vector<1x256xf32>,
    return
  }
  func.func @transform_0(%arg0: i32) -> (i32, i32) {
    %c0_i32 = arith.constant 0 : i32
    %c0_i32_0 = arith.constant 0 : i32
    return %arg0, %c0_i32 : i32, i32
  }
  func.func @transform_1(%arg0: i32) -> (i32, i32) {
    %c0_i32 = arith.constant 0 : i32
    %c0_i32_0 = arith.constant 0 : i32
    %c0_i32_1 = arith.constant 0 : i32
    return %c0_i32, %c0_i32_0 : i32, i32
  }
  func.func @transform_2(%arg0: i32) -> (i32, i32) {
    %c0_i32 = arith.constant 0 : i32
    %c0_i32_0 = arith.constant 0 : i32
    %c0_i32_1 = arith.constant 0 : i32
    return %c0_i32, %c0_i32_0 : i32, i32
  }
}

module attributes {stable_mosaic.version = 11 : i64} {
  func.func @_act_matmul_kernel(%arg0: i32, %arg1: memref<1024x8xf32, #tpu.memory_space<vmem>>, %arg2: memref<1x8xf32, #tpu.memory_space<vmem>>, %arg3: memref<1x8xf32, #tpu.memory_space<vmem>>, %arg4: memref<8x128xbf16, #tpu.memory_space<vmem>>, %arg5: memref<1024x128xf32, #tpu.memory_space<vmem>>) attributes {dimension_semantics = [#tpu.dimension_semantics<parallel>], iteration_bounds = array<i64: 2>, scalar_prefetch = 0 : i64, scratch_operands = 0 : i64, tpu.core_type = #tpu.core_type<tc>, window_params = [{transform_indices = @transform_0, window_bounds = array<i64: 1024, 8>}, {pipeline_mode = #tpu.pipeline_mode<synchronous>, transform_indices = @transform_1, window_bounds = array<i64: 1, 8>}, {pipeline_mode = #tpu.pipeline_mode<synchronous>, transform_indices = @transform_2, window_bounds = array<i64: 1, 8>}, {pipeline_mode = #tpu.pipeline_mode<synchronous>, transform_indices = @transform_3, window_bounds = array<i64: 8, 128>}, {transform_indices = @transform_4, window_bounds = array<i64: 1024, 128>}]} {
    %c0 = arith.constant 0 : index
    %c0_0 = arith.constant 0 : index
    %0 = vector.load %arg1[%c0, %c0_0] : memref<1024x8xf32, #tpu.memory_space<vmem>>, vector<1024x8xf32>
    %c0_1 = arith.constant 0 : index
    %c0_2 = arith.constant 0 : index
    %1 = vector.load %arg2[%c0_1, %c0_2] : memref<1x8xf32, #tpu.memory_space<vmem>>, vector<1x8xf32>
    %2 = vector.broadcast %1 : vector<1x8xf32> to vector<1024x8xf32>
    %3 = arith.mulf %0, %2 : vector<1024x8xf32>
    %c0_3 = arith.constant 0 : index
    %c0_4 = arith.constant 0 : index
    %4 = vector.load %arg3[%c0_3, %c0_4] : memref<1x8xf32, #tpu.memory_space<vmem>>, vector<1x8xf32>
    %5 = vector.broadcast %4 : vector<1x8xf32> to vector<1024x8xf32>
    %6 = arith.addf %3, %5 : vector<1024x8xf32>
    %cst = arith.constant 0.000000e+00 : f32
    %7 = vector.broadcast %cst : f32 to vector<1024x8xf32>
    %8 = arith.maximumf %6, %7 : vector<1024x8xf32>
    %9 = arith.truncf %8 : vector<1024x8xf32> to vector<1024x8xbf16>
    %c0_5 = arith.constant 0 : index
    %c0_6 = arith.constant 0 : index
    %10 = vector.load %arg4[%c0_5, %c0_6] : memref<8x128xbf16, #tpu.memory_space<vmem>>, vector<8x128xbf16>
    %cst_7 = arith.constant dense<0.000000e+00> : vector<1024x128xf32>
    %11 = tpu.matmul %9, %10, %cst_7 {dimension_numbers = #tpu.dot_dimension_numbers<[1], [0], [0], [1], [0, 0, 1, 1], [], []>} : vector<1024x8xbf16>, vector<8x128xbf16>, vector<1024x128xf32> -> vector<1024x128xf32>
    %c0_8 = arith.constant 0 : index
    %c0_9 = arith.constant 0 : index
    %12 = vector.load %arg5[%c0_8, %c0_9] : memref<1024x128xf32, #tpu.memory_space<vmem>>, vector<1024x128xf32>
    tpu.vector_store %arg5[%c0_8, %c0_9], %11 {strides = array<i32>} : memref<1024x128xf32, #tpu.memory_space<vmem>>, vector<1024x128xf32>,
    return
  }
  func.func @transform_0(%arg0: i32) -> (i32, i32) {
    %c0_i32 = arith.constant 0 : i32
    %c0_i32_0 = arith.constant 0 : i32
    return %arg0, %c0_i32 : i32, i32
  }
  func.func @transform_1(%arg0: i32) -> (i32, i32) {
    %c0_i32 = arith.constant 0 : i32
    %c0_i32_0 = arith.constant 0 : i32
    %c0_i32_1 = arith.constant 0 : i32
    return %c0_i32, %c0_i32_0 : i32, i32
  }
  func.func @transform_2(%arg0: i32) -> (i32, i32) {
    %c0_i32 = arith.constant 0 : i32
    %c0_i32_0 = arith.constant 0 : i32
    %c0_i32_1 = arith.constant 0 : i32
    return %c0_i32, %c0_i32_0 : i32, i32
  }
  func.func @transform_3(%arg0: i32) -> (i32, i32) {
    %c0_i32 = arith.constant 0 : i32
    %c0_i32_0 = arith.constant 0 : i32
    %c0_i32_1 = arith.constant 0 : i32
    return %c0_i32, %c0_i32_0 : i32, i32
  }
  func.func @transform_4(%arg0: i32) -> (i32, i32) {
    %c0_i32 = arith.constant 0 : i32
    %c0_i32_0 = arith.constant 0 : i32
    return %arg0, %c0_i32 : i32, i32
  }
}

module attributes {stable_mosaic.version = 11 : i64} {
  func.func @_tanh_kernel(%arg0: i32, %arg1: memref<48x512xf32, #tpu.memory_space<vmem>>, %arg2: memref<48x512xf32, #tpu.memory_space<vmem>>) attributes {dimension_semantics = [#tpu.dimension_semantics<parallel>], iteration_bounds = array<i64: 1>, scalar_prefetch = 0 : i64, scratch_operands = 0 : i64, tpu.core_type = #tpu.core_type<tc>, window_params = [{transform_indices = @transform_0, window_bounds = array<i64: 48, 512>}, {transform_indices = @transform_1, window_bounds = array<i64: 48, 512>}]} {
    %c0 = arith.constant 0 : index
    %c0_0 = arith.constant 0 : index
    %0 = vector.load %arg1[%c0, %c0_0] : memref<48x512xf32, #tpu.memory_space<vmem>>, vector<48x512xf32>
    %1 = math.tanh %0 : vector<48x512xf32>
    %c0_1 = arith.constant 0 : index
    %c0_2 = arith.constant 0 : index
    %2 = vector.load %arg2[%c0_1, %c0_2] : memref<48x512xf32, #tpu.memory_space<vmem>>, vector<48x512xf32>
    tpu.vector_store %arg2[%c0_1, %c0_2], %1 {strides = array<i32>} : memref<48x512xf32, #tpu.memory_space<vmem>>, vector<48x512xf32>,
    return
  }
  func.func @transform_0(%arg0: i32) -> (i32, i32) {
    %c0_i32 = arith.constant 0 : i32
    %c0_i32_0 = arith.constant 0 : i32
    return %arg0, %c0_i32 : i32, i32
  }
  func.func @transform_1(%arg0: i32) -> (i32, i32) {
    %c0_i32 = arith.constant 0 : i32
    %c0_i32_0 = arith.constant 0 : i32
    return %arg0, %c0_i32 : i32, i32
  }
}

</mosaic_0001>

<bundles_post_ra>
// kernel: generator_forward.10
= control target key start
LH: loop header
LB: loop body
LE: loop exit
PB: predicated region body
PF: predicated region fallthrough
CT: control target
= control target key end

     0   :  { %9 = vsyncpa [#allocation3], 0  ;;  %s282_s18 = smov [#allocation2]   ;;  %s283_s20 = smov 512   ;;  %s348_s0 = inlined_call_operand.vmem [shape: f32[8,16], index: 0, kind: input, shape index: {}]   ;;  %s349_s1 = inlined_call_operand.vmem [shape: f32[1,16], index: 1, kind: input, shape index: {}]   ;;  %s350_s2 = inlined_call_operand.vmem [shape: f32[1,16], index: 2, kind: input, shape index: {}]   ;;  %s351_s3 = inlined_call_operand.hbm [shape: bf16[16,1024], index: 3, kind: input, shape index: {}]   ;;  %s352_s4 = inlined_call_operand.vmem [shape: f32[8,1024], index: 4, kind: output, shape index: {}]  }
   0x1   :  { %s20_s17 = sshll.u32 %s351_s3, 4  ;;  %s22_s19 = sshll.u32 %s282_s18, 4  ;;  %s21_s17 = int_to_ptr.hbm [resolvable:$true] %s20_s17  ;;  %s23_s19 = int_to_ptr.vmem [resolvable:$true] %s22_s19 }
   0x2   :  { %s284_s1 = smov 32  }
   0x3   :  { %28 = dma.hbm_to_vmem [thread:$0]  %s21_s17, 1024, %s23_s19, [#allocation3], %s283_s20, %s283_s20, %s284_s1  }
   0x4   :  { %280 = dma.done.wait [#allocation3], 1024  }
   0x5   :  { %281 = vsyncadd [#allocation3], 4294966272  ;;  %v207_v0 = vld [vmem:[#allocation2] sm:$0xf]  ;;  %v245_v2 = vld [vmem:[#allocation2 + $0x4] sm:$0xf] }
   0x6   :  { %v249_v1 = vld [vmem:[#allocation2 + $0x1c] sm:$0xf0]  ;;  %v209_v4 = vld [vmem:[#allocation2 + $0x20] sm:$0xf0]  ;;  %v215_v5 = vld [vmem:[#allocation2 + $0x8] sm:$0xf] }
   0x7   :  { %v208_v3 = vor.u32 %v249_v1, %v207_v0  ;;  %v250_v6 = vld [vmem:[#allocation2 + $0x24] sm:$0xf0]  ;;  %v212_v7 = vor.u32 %v245_v2, %v209_v4  ;;  %v246_v9 = vld [vmem:[#allocation2 + $0xc] sm:$0xf]  ;;  %v34_v11 = vld [vmem:[%s348_s0] sm:$0xff]  ;;  %vm84_vm0 = vcmask 130048  }
   0x8   :  { %v216_v8 = vor.u32 %v250_v6, %v215_v5  ;;  %v217_v10 = vld [vmem:[#allocation2 + $0x28] sm:$0xf0]  ;;  %v35_v13 = vpack.c.bf16 %v34_v11, %v34_v11  ;;  %v231_v14 = vld [vmem:[#allocation2 + $0x18] sm:$0xf]  ;;  %v248_v16 = vld [vmem:[#allocation2 + $0x1c] sm:$0xf] }
   0x9   :  { %95 = vmatpush.bf16.msra.mxu0 %v208_v3  ;;  %v220_v12 = vor.u32 %v246_v9, %v217_v10  ;;  %v252_v15 = vld [vmem:[#allocation2 + $0x34] sm:$0xf0]  ;;  %108 = vmatpush.bf16.msra.mxu1 %v212_v7  ;;  %v233_v18 = vld [vmem:[#allocation2 + $0x38] sm:$0xf0]  ;;  %v223_v19 = vld [vmem:[#allocation2 + $0x10] sm:$0xf] }
   0xa   :  { %121 = vmatpush.bf16.msra.mxu2 %v216_v8  ;;  %v232_v17 = vor.u32 %v252_v15, %v231_v14  ;;  %v251_v20 = vld [vmem:[#allocation2 + $0x2c] sm:$0xf0]  ;;  %v236_v21 = vor.u32 %v248_v16, %v233_v18  ;;  %v247_v23 = vld [vmem:[#allocation2 + $0x14] sm:$0xf] }
   0xb   :  { %134 = vmatpush.bf16.msra.mxu3 %v220_v12  ;;  %v224_v22 = vor.u32 %v251_v20, %v223_v19  ;;  %v225_v24 = vld [vmem:[#allocation2 + $0x30] sm:$0xf0] }
   0xc   :  { %237 = vmatmul.msk.bf16.vlgmr.msra.gmra.mxu0 %vm84_vm0, %v35_v13  ;;  %v228_v25 = vor.u32 %v247_v23, %v225_v24  ;;  %238 = vmatmul.msk.bf16.vlgmr.msra.gmra.mxu1 %vm84_vm0, %v35_v13 }
   0xd   :  { %239 = vmatmul.msk.bf16.vlgmr.msra.gmra.mxu2 %vm84_vm0, %v35_v13  ;;  %147 = vmatpush.bf16.msrb.mxu0 %v224_v22 }
   0xe   :  { %173 = vmatpush.bf16.msrb.mxu2 %v232_v17  ;;  %240 = vmatmul.msk.bf16.vlgmr.msra.gmra.mxu3 %vm84_vm0, %v35_v13 }
   0xf   :  { %186 = vmatpush.bf16.msrb.mxu3 %v236_v21  ;;  %160 = vmatpush.bf16.msrb.mxu1 %v228_v25 }
  0x1c   :  { %241 = vmatmul.msk.bf16.vlgmr.msrb.gmra.mxu0 %vm84_vm0, %v35_v13  ;;  %242 = vmatmul.msk.bf16.vlgmr.msrb.gmra.mxu1 %vm84_vm0, %v35_v13 }
  0x1d   :  { %243 = vmatmul.msk.bf16.vlgmr.msrb.gmra.mxu2 %vm84_vm0, %v35_v13 }
  0x1e   :  { %244 = vmatmul.msk.bf16.vlgmr.msrb.gmra.mxu3 %vm84_vm0, %v35_v13 }
  0x89   :  { %v97_v26 = vpop.f32.mrf.mxu0  ;;  %v110_v27 = vpop.f32.mrf.mxu1 }
  0x8a   :  { %192 = vst [vmem:[%s352_s4] sm:$0xff] %v97_v26 }
  0x8b   :  { %193 = vst [vmem:[%s352_s4 + $0x8] sm:$0xff] %v110_v27 }
  0x90   :  { %v123_v28 = vpop.f32.mrf.mxu2 }
  0x91   :  { %194 = vst [vmem:[%s352_s4 + $0x10] sm:$0xff] %v123_v28  ;;  %v136_v29 = vpop.f32.mrf.mxu3  ;;  %v99_v30 = vpop.f32.mrf.mxu0 }
  0x92   :  { %195 = vst [vmem:[%s352_s4 + $0x18] sm:$0xff] %v136_v29  ;;  %v112_v31 = vpop.f32.mrf.mxu1 }
  0x98   :  { %v125_v32 = vpop.f32.mrf.mxu2 }
  0x99   :  { %v138_v33 = vpop.f32.mrf.mxu3  ;;  %v149_v34 = vpop.f32.mrf.mxu0 }
  0x9a   :  { %196 = vst [vmem:[%s352_s4 + $0x20] sm:$0xff] %v149_v34  ;;  %v162_v35 = vpop.f32.mrf.mxu1 }
  0x9b   :  { %197 = vst [vmem:[%s352_s4 + $0x28] sm:$0xff] %v162_v35 }
  0xa0   :  { %v175_v36 = vpop.f32.mrf.mxu2 }
  0xa1   :  { %198 = vst [vmem:[%s352_s4 + $0x30] sm:$0xff] %v175_v36  ;;  %v188_v37 = vpop.f32.mrf.mxu3  ;;  %v151_v38 = vpop.f32.mrf.mxu0 }
  0xa2   :  { %199 = vst [vmem:[%s352_s4 + $0x38] sm:$0xff] %v188_v37  ;;  %v164_v39 = vpop.f32.mrf.mxu1 }
  0xa8   :  { %v177_v40 = vpop.f32.mrf.mxu2 }
  0xa9   :  { %v190_v41 = vpop.f32.mrf.mxu3 }
  0xaa   :  { %204 = vsyncpa [#allocation3], 1 }

// kernel: generator_forward.11
= control target key start
LH: loop header
LB: loop body
LE: loop exit
PB: predicated region body
PF: predicated region fallthrough
CT: control target
= control target key end

     0   :  { %v14_v0 = vlaneseq  ;;  %v78_v7 = vmov 0.0   ;;  %vm38_vm1 = vcmask 1040384   ;;  %s130_s0 = inlined_call_operand.vmem [shape: f32[8,256], index: 0, kind: input, shape index: {}]   ;;  %s131_s1 = inlined_call_operand.vmem [shape: f32[1,256], index: 1, kind: output, shape index: {0}]   ;;  %s132_s2 = inlined_call_operand.vmem [shape: f32[1,256], index: 2, kind: output, shape index: {1}]  }
   0x1   :  { %v20_v1 = vld [vmem:[%s130_s0] sm:$0xff]  ;;  %v21_v2 = vld [vmem:[%s130_s0 + $0x8] sm:$0xff] }
   0x2   :  { %vm100_vm0 = vcmp.lt.s32.totalorder %v14_v0, 256  ;;  %v23_v4 = vrot.slane %v20_v1, 4  ;;  %v29_v5 = vrot.slane %v21_v2, 4  ;;  %v48_v6 = vmul.f32 %v20_v1, %v20_v1 }
   0x3   :  { %18 = vst.msk [vmem:[%s131_s1] sm:$0x3] %vm100_vm0, %v78_v7  ;;  %v49_v8 = vmul.f32 %v21_v2, %v21_v2 }
   0x4   :  { %v24_v9 = vadd.f32 %v23_v4, %v20_v1  ;;  %v30_v10 = vadd.f32 %v29_v5, %v21_v2  ;;  %19 = vst.msk [vmem:[%s132_s2] sm:$0x3] %vm100_vm0, %v78_v7  ;;  %v50_v11 = vrot.slane %v48_v6, 4 }
   0x5   :  { %v56_v12 = vrot.slane %v49_v8, 4 }
   0x6   :  { %v25_v13 = vrot.slane %v24_v9, 2  ;;  %v31_v14 = vrot.slane %v30_v10, 2  ;;  %v51_v15 = vadd.f32 %v50_v11, %v48_v6 }
   0x7   :  { %v57_v16 = vadd.f32 %v56_v12, %v49_v8 }
   0x8   :  { %v26_v17 = vadd.f32 %v25_v13, %v24_v9  ;;  %v32_v18 = vadd.f32 %v31_v14, %v30_v10  ;;  %v52_v19 = vrot.slane %v51_v15, 2 }
   0x9   :  { %v58_v20 = vrot.slane %v57_v16, 2 }
   0xa   :  { %v27_v21 = vrot.slane %v26_v17, 1  ;;  %v33_v22 = vrot.slane %v32_v18, 1  ;;  %v53_v23 = vadd.f32 %v52_v19, %v51_v15  ;;  %v22_v29 = vld [vmem:[%s131_s1] sm:$0x3] }
   0xb   :  { %v59_v24 = vadd.f32 %v58_v20, %v57_v16  ;;  %v47_v35 = vld [vmem:[%s132_s2] sm:$0x3] }
   0xc   :  { %v28_v25 = vadd.f32 %v27_v21, %v26_v17  ;;  %v34_v26 = vadd.f32 %v33_v22, %v32_v18  ;;  %v54_v27 = vrot.slane %v53_v23, 1 }
   0xd   :  { %v60_v28 = vrot.slane %v59_v24, 1 }
   0xe   :  { %v37_v30 = vrot.slane %v34_v26, 7  ;;  %v55_v31 = vadd.f32 %v54_v27, %v53_v23 }
   0xf   :  { %v61_v32 = vadd.f32 %v60_v28, %v59_v24 }
  0x10   :  { %v39_v33 = vsel %vm38_vm1, %v28_v25, %v37_v30 }
  0x11   :  { %v41_v34 = vadd.f32 %v39_v33, %v22_v29  ;;  %v64_v36 = vrot.slane %v61_v32, 7 }
  0x13   :  { %46 = vst.msk [vmem:[%s131_s1] sm:$0x3] %vm100_vm0, %v41_v34  ;;  %v65_v37 = vsel %vm38_vm1, %v55_v31, %v64_v36 }
  0x14   :  { %v67_v38 = vadd.f32 %v65_v37, %v47_v35 }
  0x16   :  { %68 = vst.msk [vmem:[%s132_s2] sm:$0x3] %vm100_vm0, %v67_v38 }

// kernel: generator_forward.12
= control target key start
LH: loop header
LB: loop body
LE: loop exit
PB: predicated region body
PF: predicated region fallthrough
CT: control target
= control target key end

     0   :  { %9 = vsyncpa [#allocation3], 0  ;;  %s379_s18 = smov [#allocation2]   ;;  %s380_s20 = smov 256   ;;  %s484_s0 = inlined_call_operand.vmem [shape: f32[32,64], index: 0, kind: input, shape index: {}]   ;;  %s485_s1 = inlined_call_operand.vmem [shape: f32[1,64], index: 1, kind: input, shape index: {}]   ;;  %s486_s2 = inlined_call_operand.vmem [shape: f32[1,64], index: 2, kind: input, shape index: {}]   ;;  %s487_s3 = inlined_call_operand.hbm [shape: bf16[64,512], index: 3, kind: input, shape index: {}]   ;;  %s488_s4 = inlined_call_operand.vmem [shape: f32[32,512], index: 4, kind: output, shape index: {}]  }
   0x1   :  { %s20_s17 = sshll.u32 %s487_s3, 4  ;;  %s22_s19 = sshll.u32 %s379_s18, 4  ;;  %s21_s17 = int_to_ptr.hbm [resolvable:$true] %s20_s17  ;;  %s23_s19 = int_to_ptr.vmem [resolvable:$true] %s22_s19 }
   0x2   :  { %s381_s21 = smov 16  }
   0x3   :  { %28 = dma.hbm_to_vmem [thread:$0]  %s21_s17, 2048, %s23_s19, [#allocation3], %s380_s20, %s380_s20, %s381_s21  }
   0x4   :  { %377 = dma.done.wait [#allocation3], 2048  }
   0x5   :  { %378 = vsyncadd [#allocation3], 4294965248  ;;  %v310_v0 = vld [vmem:[#allocation2 + $0x60] sm:$0xf]  ;;  %v346_v1 = vld [vmem:[#allocation2 + $0x6c] sm:$0xf0] }
   0x6   :  { %v344_v2 = vld [vmem:[#allocation2 + $0x64] sm:$0xf]  ;;  %v311_v3 = vor.u32 %v346_v1, %v310_v0  ;;  %v312_v4 = vld [vmem:[#allocation2 + $0x70] sm:$0xf0]  ;;  %v318_v5 = vld [vmem:[#allocation2 + $0x68] sm:$0xf] }
   0x7   :  { %v347_v6 = vld [vmem:[#allocation2 + $0x74] sm:$0xf0]  ;;  %v315_v7 = vor.u32 %v344_v2, %v312_v4  ;;  %v345_v9 = vld [vmem:[#allocation2 + $0x6c] sm:$0xf]  ;;  %v320_v10 = vld [vmem:[#allocation2 + $0x78] sm:$0xf0] }
   0x8   :  { %v319_v8 = vor.u32 %v347_v6, %v318_v5  ;;  %v294_v11 = vld [vmem:[#allocation2 + $0x40] sm:$0xf]  ;;  %167 = vmatpush.bf16.msra.mxu0 %v311_v3  ;;  %v323_v12 = vor.u32 %v345_v9, %v320_v10  ;;  %v342_v13 = vld [vmem:[#allocation2 + $0x4c] sm:$0xf0]  ;;  %v340_v14 = vld [vmem:[#allocation2 + $0x44] sm:$0xf] }
   0x9   :  { %v296_v15 = vld [vmem:[#allocation2 + $0x50] sm:$0xf0]  ;;  %186 = vmatpush.bf16.msra.mxu1 %v315_v7  ;;  %v295_v16 = vor.u32 %v342_v13, %v294_v11  ;;  %v302_v18 = vld [vmem:[#allocation2 + $0x48] sm:$0xf]  ;;  %v343_v19 = vld [vmem:[#allocation2 + $0x54] sm:$0xf0] }
   0xa   :  { %205 = vmatpush.bf16.msra.mxu2 %v319_v8  ;;  %v299_v17 = vor.u32 %v340_v14, %v296_v15  ;;  %v341_v20 = vld [vmem:[#allocation2 + $0x4c] sm:$0xf]  ;;  %224 = vmatpush.bf16.msra.mxu3 %v323_v12  ;;  %v303_v21 = vor.u32 %v343_v19, %v302_v18  ;;  %v304_v22 = vld [vmem:[#allocation2 + $0x58] sm:$0xf0]  ;;  %v278_v23 = vld [vmem:[#allocation2 + $0x20] sm:$0xf] }
   0xb   :  { %v338_v24 = vld [vmem:[#allocation2 + $0x2c] sm:$0xf0]  ;;  %v307_v25 = vor.u32 %v341_v20, %v304_v22  ;;  %v336_v26 = vld [vmem:[#allocation2 + $0x24] sm:$0xf]  ;;  %v280_v27 = vld [vmem:[#allocation2 + $0x30] sm:$0xf0] }
   0xc   :  { %v286_v28 = vld [vmem:[#allocation2 + $0x28] sm:$0xf]  ;;  %168 = vmatpush.bf16.msra.mxu0 %v295_v16  ;;  %v279_v29 = vor.u32 %v338_v24, %v278_v23  ;;  %v339_v30 = vld [vmem:[#allocation2 + $0x34] sm:$0xf0]  ;;  %v337_v31 = vld [vmem:[#allocation2 + $0x2c] sm:$0xf]  ;;  %v283_v33 = vor.u32 %v336_v26, %v280_v27 }
   0xd   :  { %v288_v32 = vld [vmem:[#allocation2 + $0x38] sm:$0xf0]  ;;  %187 = vmatpush.bf16.msra.mxu1 %v299_v17  ;;  %v287_v34 = vor.u32 %v339_v30, %v286_v28  ;;  %v262_v35 = vld [vmem:[#allocation2] sm:$0xf]  ;;  %v334_v36 = vld [vmem:[#allocation2 + $0xc] sm:$0xf0] }
   0xe   :  { %206 = vmatpush.bf16.msra.mxu2 %v303_v21  ;;  %v332_v37 = vld [vmem:[#allocation2 + $0x4] sm:$0xf]  ;;  %225 = vmatpush.bf16.msra.mxu3 %v307_v25  ;;  %v291_v38 = vor.u32 %v337_v31, %v288_v32  ;;  %v264_v39 = vld [vmem:[#allocation2 + $0x10] sm:$0xf0]  ;;  %v270_v40 = vld [vmem:[#allocation2 + $0x8] sm:$0xf]  ;;  %v263_v45 = vor.u32 %v334_v36, %v262_v35 }
   0xf   :  { %v335_v41 = vld [vmem:[#allocation2 + $0x14] sm:$0xf0]  ;;  %v333_v42 = vld [vmem:[#allocation2 + $0xc] sm:$0xf]  ;;  %v272_v43 = vld [vmem:[#allocation2 + $0x18] sm:$0xf0]  ;;  %v267_v48 = vor.u32 %v332_v37, %v264_v39 }
  0x10   :  { %v34_v44 = vld [vmem:[%s484_s0] sm:$0xff]  ;;  %169 = vmatpush.bf16.msra.mxu0 %v279_v29  ;;  %v35_v46 = vld [vmem:[%s484_s0 + $0x8] sm:$0xff]  ;;  %v271_v49 = vor.u32 %v335_v41, %v270_v40  ;;  %v275_v51 = vor.u32 %v333_v42, %v272_v43  ;;  %vm156_vm0 = vcmask 523264   ;;  %v36_v58 = vld [vmem:[%s484_s0 + $0x10] sm:$0xff] }
  0x11   :  { %v351_v47 = vld [vmem:[%s485_s1] ss:$0 sm:$0xff]  ;;  %188 = vmatpush.bf16.msra.mxu1 %v283_v33  ;;  %v37_v59 = vld [vmem:[%s484_s0 + $0x18] sm:$0xff] }
  0x12   :  { %207 = vmatpush.bf16.msra.mxu2 %v287_v34  ;;  %v352_v50 = vld [vmem:[%s486_s2] ss:$0 sm:$0xff]  ;;  %226 = vmatpush.bf16.msra.mxu3 %v291_v38  ;;  %v42_v52 = vmul.f32 %v351_v47, %v34_v44  ;;  %v43_v53 = vmul.f32 %v351_v47, %v35_v46  ;;  %v44_v61 = vmul.f32 %v351_v47, %v36_v58 }
  0x13   :  { %v45_v62 = vmul.f32 %v351_v47, %v37_v59 }
  0x14   :  { %170 = vmatpush.bf16.msra.mxu0 %v263_v45  ;;  %v50_v54 = vadd.f32 %v352_v50, %v42_v52  ;;  %v51_v55 = vadd.f32 %v352_v50, %v43_v53  ;;  %v52_v63 = vadd.f32 %v352_v50, %v44_v61 }
  0x15   :  { %189 = vmatpush.bf16.msra.mxu1 %v267_v48  ;;  %v53_v0 = vadd.f32 %v352_v50, %v45_v62 }
  0x16   :  { %208 = vmatpush.bf16.msra.mxu2 %v271_v49  ;;  %227 = vmatpush.bf16.msra.mxu3 %v275_v51  ;;  %v54_v56 = vmax.f32 %v50_v54, 0.0  ;;  %v55_v57 = vmax.f32 %v51_v55, 0.0  ;;  %v56_v1 = vmax.f32 %v52_v63, 0.0 }
  0x17   :  { %v57_v2 = vmax.f32 %v53_v0, 0.0 }
  0x18   :  { %v58_v60 = vpack.c.bf16 %v55_v57, %v54_v56 }
  0x19   :  { %v59_v3 = vpack.c.bf16 %v57_v2, %v56_v1 }
  0x1a   :  { %324 = vmatmul.msk.bf16.vlgmr.msra.gmra.mxu0 %vm156_vm0, %v58_v60  ;;  %326 = vmatmul.msk.bf16.vlgmr.msra.gmra.mxu1 %vm156_vm0, %v58_v60 }
  0x1b   :  { %328 = vmatmul.msk.bf16.vlgmr.msra.gmra.mxu2 %vm156_vm0, %v58_v60  ;;  %330 = vmatmul.msk.bf16.vlgmr.msra.gmra.mxu3 %vm156_vm0, %v58_v60 }
  0x2a   :  { %325 = vmatmul.msk.bf16.gmra.mxu0 %vm156_vm0, %v59_v3  ;;  %327 = vmatmul.msk.bf16.gmra.mxu1 %vm156_vm0, %v59_v3 }
  0x2b   :  { %329 = vmatmul.msk.bf16.gmra.mxu2 %vm156_vm0, %v59_v3  ;;  %331 = vmatmul.msk.bf16.gmra.mxu3 %vm156_vm0, %v59_v3 }
  0x97   :  { %v172_v4 = vpop.f32.mrf.mxu0  ;;  %v191_v5 = vpop.f32.mrf.mxu1 }
  0x98   :  { %239 = vst [vmem:[%s488_s4] sm:$0xff] %v172_v4 }
  0x99   :  { %240 = vst [vmem:[%s488_s4 + $0x8] sm:$0xff] %v191_v5 }
  0x9e   :  { %v210_v6 = vpop.f32.mrf.mxu2  ;;  %v229_v7 = vpop.f32.mrf.mxu3 }
  0x9f   :  { %241 = vst [vmem:[%s488_s4 + $0x10] sm:$0xff] %v210_v6  ;;  %v174_v8 = vpop.f32.mrf.mxu0  ;;  %v193_v9 = vpop.f32.mrf.mxu1 }
  0xa0   :  { %242 = vst [vmem:[%s488_s4 + $0x18] sm:$0xff] %v229_v7 }
  0xa1   :  { %243 = vst [vmem:[%s488_s4 + $0x20] sm:$0xff] %v174_v8 }
  0xa2   :  { %244 = vst [vmem:[%s488_s4 + $0x28] sm:$0xff] %v193_v9 }
  0xa6   :  { %v212_v10 = vpop.f32.mrf.mxu2  ;;  %v231_v11 = vpop.f32.mrf.mxu3 }
  0xa7   :  { %245 = vst [vmem:[%s488_s4 + $0x30] sm:$0xff] %v212_v10  ;;  %v177_v12 = vpop.f32.mrf.mxu0  ;;  %v196_v13 = vpop.f32.mrf.mxu1 }
  0xa8   :  { %246 = vst [vmem:[%s488_s4 + $0x38] sm:$0xff] %v231_v11 }
  0xa9   :  { %247 = vst [vmem:[%s488_s4 + $0x40] sm:$0xff] %v177_v12 }
  0xaa   :  { %248 = vst [vmem:[%s488_s4 + $0x48] sm:$0xff] %v196_v13 }
  0xae   :  { %v215_v14 = vpop.f32.mrf.mxu2  ;;  %v234_v15 = vpop.f32.mrf.mxu3 }
  0xaf   :  { %249 = vst [vmem:[%s488_s4 + $0x50] sm:$0xff] %v215_v14  ;;  %v179_v16 = vpop.f32.mrf.mxu0  ;;  %v198_v17 = vpop.f32.mrf.mxu1 }
  0xb0   :  { %250 = vst [vmem:[%s488_s4 + $0x58] sm:$0xff] %v234_v15 }
  0xb1   :  { %251 = vst [vmem:[%s488_s4 + $0x60] sm:$0xff] %v179_v16 }
  0xb2   :  { %252 = vst [vmem:[%s488_s4 + $0x68] sm:$0xff] %v198_v17 }
  0xb6   :  { %v217_v18 = vpop.f32.mrf.mxu2  ;;  %v236_v19 = vpop.f32.mrf.mxu3 }
  0xb7   :  { %253 = vst [vmem:[%s488_s4 + $0x70] sm:$0xff] %v217_v18 }
  0xb8   :  { %254 = vst [vmem:[%s488_s4 + $0x78] sm:$0xff] %v236_v19 }
  0xb9   :  { %259 = vsyncpa [#allocation3], 1 }

// kernel: generator_forward.13
= control target key start
LH: loop header
LB: loop body
LE: loop exit
PB: predicated region body
PF: predicated region fallthrough
CT: control target
= control target key end

     0   :  { %v14_v0 = vlaneseq  ;;  %v86_v9 = vmov 0.0   ;;  %vm42_vm1 = vcmask 1040384   ;;  %s144_s0 = inlined_call_operand.vmem [shape: f32[16,256], index: 0, kind: input, shape index: {}]   ;;  %s145_s1 = inlined_call_operand.vmem [shape: f32[1,256], index: 1, kind: output, shape index: {0}]   ;;  %s146_s2 = inlined_call_operand.vmem [shape: f32[1,256], index: 2, kind: output, shape index: {1}]  }
   0x1   :  { %v20_v1 = vld [vmem:[%s144_s0] sm:$0xff]  ;;  %v21_v2 = vld [vmem:[%s144_s0 + $0x8] sm:$0xff]  ;;  %v22_v3 = vld [vmem:[%s144_s0 + $0x10] sm:$0xff] }
   0x2   :  { %vm111_vm0 = vcmp.lt.s32.totalorder %v14_v0, 256  ;;  %v23_v5 = vld [vmem:[%s144_s0 + $0x18] sm:$0xff]  ;;  %v25_v6 = vadd.f32 %v22_v3, %v20_v1  ;;  %v52_v7 = vmul.f32 %v20_v1, %v20_v1  ;;  %v53_v8 = vmul.f32 %v21_v2, %v21_v2 }
   0x3   :  { %18 = vst.msk [vmem:[%s145_s1] sm:$0x3] %vm111_vm0, %v86_v9  ;;  %v32_v10 = vadd.f32 %v23_v5, %v21_v2  ;;  %v54_v11 = vmul.f32 %v22_v3, %v22_v3  ;;  %v55_v12 = vmul.f32 %v23_v5, %v23_v5 }
   0x4   :  { %v26_v13 = vrot.slane %v25_v6, 4  ;;  %19 = vst.msk [vmem:[%s146_s2] sm:$0x3] %vm111_vm0, %v86_v9 }
   0x5   :  { %v33_v14 = vrot.slane %v32_v10, 4  ;;  %v56_v15 = vadd.f32 %v54_v11, %v52_v7  ;;  %v63_v16 = vadd.f32 %v55_v12, %v53_v8 }
   0x6   :  { %v27_v17 = vadd.f32 %v26_v13, %v25_v6 }
   0x7   :  { %v34_v18 = vadd.f32 %v33_v14, %v32_v10  ;;  %v57_v19 = vrot.slane %v56_v15, 4  ;;  %v64_v20 = vrot.slane %v63_v16, 4 }
   0x8   :  { %v28_v21 = vrot.slane %v27_v17, 2 }
   0x9   :  { %v35_v22 = vrot.slane %v34_v18, 2  ;;  %v58_v23 = vadd.f32 %v57_v19, %v56_v15  ;;  %v65_v24 = vadd.f32 %v64_v20, %v63_v16 }
   0xa   :  { %v29_v25 = vadd.f32 %v28_v21, %v27_v17  ;;  %v24_v37 = vld [vmem:[%s145_s1] sm:$0x3] }
   0xb   :  { %v36_v26 = vadd.f32 %v35_v22, %v34_v18  ;;  %v59_v27 = vrot.slane %v58_v23, 2  ;;  %v66_v28 = vrot.slane %v65_v24, 2  ;;  %v51_v42 = vld [vmem:[%s146_s2] sm:$0x3] }
   0xc   :  { %v30_v29 = vrot.slane %v29_v25, 1 }
   0xd   :  { %v37_v30 = vrot.slane %v36_v26, 1  ;;  %v60_v31 = vadd.f32 %v59_v27, %v58_v23  ;;  %v67_v32 = vadd.f32 %v66_v28, %v65_v24 }
   0xe   :  { %v31_v33 = vadd.f32 %v30_v29, %v29_v25 }
   0xf   :  { %v38_v34 = vadd.f32 %v37_v30, %v36_v26  ;;  %v61_v35 = vrot.slane %v60_v31, 1  ;;  %v68_v36 = vrot.slane %v67_v32, 1 }
  0x11   :  { %v41_v38 = vrot.slane %v38_v34, 7  ;;  %v62_v39 = vadd.f32 %v61_v35, %v60_v31  ;;  %v69_v40 = vadd.f32 %v68_v36, %v67_v32 }
  0x13   :  { %v43_v41 = vsel %vm42_vm1, %v31_v33, %v41_v38  ;;  %v72_v43 = vrot.slane %v69_v40, 7 }
  0x14   :  { %v45_v44 = vadd.f32 %v43_v41, %v24_v37 }
  0x15   :  { %v73_v45 = vsel %vm42_vm1, %v62_v39, %v72_v43 }
  0x16   :  { %50 = vst.msk [vmem:[%s145_s1] sm:$0x3] %vm111_vm0, %v45_v44  ;;  %v75_v46 = vadd.f32 %v73_v45, %v51_v42 }
  0x18   :  { %76 = vst.msk [vmem:[%s146_s2] sm:$0x3] %vm111_vm0, %v75_v46 }

// kernel: generator_forward.14
= control target key start
LH: loop header
LB: loop body
LE: loop exit
PB: predicated region body
PF: predicated region fallthrough
CT: control target
= control target key end

     0   :  { %9 = vsyncpa [#allocation3], 0  ;;  %s369_s18 = smov [#allocation2]   ;;  %s370_s20 = smov 128   ;;  %s602_s0 = inlined_call_operand.vmem [shape: f32[128,32], index: 0, kind: input, shape index: {}]   ;;  %s603_s1 = inlined_call_operand.vmem [shape: f32[1,32], index: 1, kind: input, shape index: {}]   ;;  %s604_s2 = inlined_call_operand.vmem [shape: f32[1,32], index: 2, kind: input, shape index: {}]   ;;  %s605_s3 = inlined_call_operand.hbm [shape: bf16[32,256], index: 3, kind: input, shape index: {}]   ;;  %s606_s4 = inlined_call_operand.vmem [shape: f32[128,256], index: 4, kind: output, shape index: {}]  }
   0x1   :  { %s20_s17 = sshll.u32 %s605_s3, 4  ;;  %s22_s19 = sshll.u32 %s369_s18, 4  ;;  %s21_s17 = int_to_ptr.hbm [resolvable:$true] %s20_s17  ;;  %s23_s19 = int_to_ptr.vmem [resolvable:$true] %s22_s19 }
   0x2   :  { %s371_s21 = smov 8  }
   0x3   :  { %28 = dma.hbm_to_vmem [thread:$0]  %s21_s17, 512, %s23_s19, [#allocation3], %s370_s20, %s370_s20, %s371_s21  }
   0x4   :  { %367 = dma.done.wait [#allocation3], 512  }
   0x5   :  { %368 = vsyncadd [#allocation3], 4294966784  ;;  %v308_v0 = vld [vmem:[#allocation2 + $0x10] sm:$0xf]  ;;  %v333_v1 = vld [vmem:[#allocation2 + $0x14] sm:$0xf0] }
   0x6   :  { %v332_v2 = vld [vmem:[#allocation2 + $0x14] sm:$0xf]  ;;  %v309_v3 = vor.u32 %v333_v1, %v308_v0  ;;  %v310_v4 = vld [vmem:[#allocation2 + $0x18] sm:$0xf0]  ;;  %v300_v5 = vld [vmem:[#allocation2] sm:$0xf] }
   0x7   :  { %v331_v6 = vld [vmem:[#allocation2 + $0x4] sm:$0xf0]  ;;  %v313_v7 = vor.u32 %v332_v2, %v310_v4  ;;  %v330_v8 = vld [vmem:[#allocation2 + $0x4] sm:$0xf]  ;;  %v302_v9 = vld [vmem:[#allocation2 + $0x8] sm:$0xf0] }
   0x8   :  { %v34_v10 = vld [vmem:[%s602_s0] sm:$0xff]  ;;  %169 = vmatpush.bf16.msra.mxu0 %v309_v3  ;;  %334 = vmatpush.bf16.msra.mxu2 %v309_v3  ;;  %v301_v11 = vor.u32 %v331_v6, %v300_v5  ;;  %v35_v12 = vld [vmem:[%s602_s0 + $0x8] sm:$0xff]  ;;  %v305_v14 = vor.u32 %v330_v8, %v302_v9  ;;  %vm138_vm0 = vcmask 261120   ;;  %v36_v30 = vld [vmem:[%s602_s0 + $0x10] sm:$0xff] }
   0x9   :  { %v409_v13 = vld [vmem:[%s603_s1] ss:$0 sm:$0xff]  ;;  %218 = vmatpush.bf16.msra.mxu1 %v313_v7  ;;  %336 = vmatpush.bf16.msra.mxu3 %v313_v7  ;;  %v43_v19 = vld [vmem:[%s602_s0 + $0x48] sm:$0xff]  ;;  %v37_v31 = vld [vmem:[%s602_s0 + $0x18] sm:$0xff] }
   0xa   :  { %v414_v15 = vld [vmem:[%s604_s2] ss:$0 sm:$0xff]  ;;  %v54_v17 = vmul.f32 %v409_v13, %v34_v10  ;;  %v55_v18 = vmul.f32 %v409_v13, %v35_v12  ;;  %v63_v21 = vmul.f32 %v409_v13, %v43_v19  ;;  %v44_v33 = vld [vmem:[%s602_s0 + $0x50] sm:$0xff]  ;;  %v45_v34 = vld [vmem:[%s602_s0 + $0x58] sm:$0xff]  ;;  %v56_v36 = vmul.f32 %v409_v13, %v36_v30 }
   0xb   :  { %v42_v16 = vld [vmem:[%s602_s0 + $0x40] sm:$0xff]  ;;  %v57_v37 = vmul.f32 %v409_v13, %v37_v31  ;;  %v64_v38 = vmul.f32 %v409_v13, %v44_v33  ;;  %v65_v39 = vmul.f32 %v409_v13, %v45_v34  ;;  %v39_v51 = vld [vmem:[%s602_s0 + $0x28] sm:$0xff]  ;;  %v40_v4 = vld [vmem:[%s602_s0 + $0x30] sm:$0xff] }
   0xc   :  { %v62_v20 = vmul.f32 %v409_v13, %v42_v16  ;;  %170 = vmatpush.bf16.msra.mxu0 %v301_v11  ;;  %335 = vmatpush.bf16.msra.mxu2 %v301_v11  ;;  %v74_v22 = vadd.f32 %v414_v15, %v54_v17  ;;  %v75_v23 = vadd.f32 %v414_v15, %v55_v18  ;;  %v38_v50 = vld [vmem:[%s602_s0 + $0x20] sm:$0xff]  ;;  %v47_v53 = vld [vmem:[%s602_s0 + $0x68] sm:$0xff]  ;;  %v41_v5 = vld [vmem:[%s602_s0 + $0x38] sm:$0xff] }
   0xd   :  { %219 = vmatpush.bf16.msra.mxu1 %v305_v14  ;;  %337 = vmatpush.bf16.msra.mxu3 %v305_v14  ;;  %v83_v25 = vadd.f32 %v414_v15, %v63_v21  ;;  %v76_v40 = vadd.f32 %v414_v15, %v56_v36  ;;  %v77_v41 = vadd.f32 %v414_v15, %v57_v37  ;;  %v46_v52 = vld [vmem:[%s602_s0 + $0x60] sm:$0xff]  ;;  %v48_v6 = vld [vmem:[%s602_s0 + $0x70] sm:$0xff]  ;;  %v49_v7 = vld [vmem:[%s602_s0 + $0x78] sm:$0xff] }
   0xe   :  { %v82_v24 = vadd.f32 %v414_v15, %v62_v20  ;;  %v90_v26 = vmax.f32 %v74_v22, 0.0  ;;  %v91_v27 = vmax.f32 %v75_v23, 0.0  ;;  %v84_v42 = vadd.f32 %v414_v15, %v64_v38 }
   0xf   :  { %v99_v29 = vmax.f32 %v83_v25, 0.0  ;;  %v85_v43 = vadd.f32 %v414_v15, %v65_v39  ;;  %v92_v44 = vmax.f32 %v76_v40, 0.0  ;;  %v93_v45 = vmax.f32 %v77_v41, 0.0 }
  0x10   :  { %v98_v28 = vmax.f32 %v82_v24, 0.0  ;;  %v106_v32 = vpack.c.bf16 %v91_v27, %v90_v26  ;;  %v100_v46 = vmax.f32 %v84_v42, 0.0  ;;  %v58_v54 = vmul.f32 %v409_v13, %v38_v50 }
  0x11   :  { %v101_v47 = vmax.f32 %v85_v43, 0.0  ;;  %v107_v48 = vpack.c.bf16 %v93_v45, %v92_v44  ;;  %v59_v55 = vmul.f32 %v409_v13, %v39_v51  ;;  %v66_v56 = vmul.f32 %v409_v13, %v46_v52 }
  0x12   :  { %v110_v35 = vpack.c.bf16 %v99_v29, %v98_v28  ;;  %314 = vmatmul.msk.bf16.vlgmr.msra.gmra.mxu0 %vm138_vm0, %v106_v32  ;;  %322 = vmatmul.msk.bf16.vlgmr.msra.gmra.mxu1 %vm138_vm0, %v106_v32  ;;  %v67_v57 = vmul.f32 %v409_v13, %v47_v53  ;;  %v78_v58 = vadd.f32 %v414_v15, %v58_v54 }
  0x13   :  { %v111_v49 = vpack.c.bf16 %v101_v47, %v100_v46  ;;  %v79_v59 = vadd.f32 %v414_v15, %v59_v55  ;;  %v86_v60 = vadd.f32 %v414_v15, %v66_v56  ;;  %v60_v8 = vmul.f32 %v409_v13, %v40_v4 }
  0x14   :  { %318 = vmatmul.msk.bf16.vlgmr.msra.gmra.mxu2 %vm138_vm0, %v110_v35  ;;  %326 = vmatmul.msk.bf16.vlgmr.msra.gmra.mxu3 %vm138_vm0, %v110_v35  ;;  %v87_v61 = vadd.f32 %v414_v15, %v67_v57  ;;  %v94_v62 = vmax.f32 %v78_v58, 0.0  ;;  %v61_v9 = vmul.f32 %v409_v13, %v41_v5  ;;  %v68_v10 = vmul.f32 %v409_v13, %v48_v6 }
  0x15   :  { %v95_v63 = vmax.f32 %v79_v59, 0.0  ;;  %v102_v0 = vmax.f32 %v86_v60, 0.0  ;;  %v69_v11 = vmul.f32 %v409_v13, %v49_v7  ;;  %v80_v12 = vadd.f32 %v414_v15, %v60_v8 }
  0x16   :  { %v103_v1 = vmax.f32 %v87_v61, 0.0  ;;  %v81_v14 = vadd.f32 %v414_v15, %v61_v9  ;;  %v88_v16 = vadd.f32 %v414_v15, %v68_v10 }
  0x17   :  { %v108_v2 = vpack.c.bf16 %v95_v63, %v94_v62  ;;  %v89_v17 = vadd.f32 %v414_v15, %v69_v11  ;;  %v96_v18 = vmax.f32 %v80_v12, 0.0 }
  0x18   :  { %v112_v3 = vpack.c.bf16 %v103_v1, %v102_v0  ;;  %v97_v19 = vmax.f32 %v81_v14, 0.0  ;;  %v104_v20 = vmax.f32 %v88_v16, 0.0 }
  0x19   :  { %v105_v21 = vmax.f32 %v89_v17, 0.0 }
  0x1a   :  { %v109_v22 = vpack.c.bf16 %v97_v19, %v96_v18 }
  0x1b   :  { %v113_v23 = vpack.c.bf16 %v105_v21, %v104_v20 }
  0x22   :  { %315 = vmatmul.msk.bf16.gmra.mxu0 %vm138_vm0, %v107_v48  ;;  %323 = vmatmul.msk.bf16.gmra.mxu1 %vm138_vm0, %v107_v48 }
  0x24   :  { %319 = vmatmul.msk.bf16.gmra.mxu2 %vm138_vm0, %v111_v49  ;;  %327 = vmatmul.msk.bf16.gmra.mxu3 %vm138_vm0, %v111_v49 }
  0x32   :  { %316 = vmatmul.msk.bf16.gmra.mxu0 %vm138_vm0, %v108_v2  ;;  %324 = vmatmul.msk.bf16.gmra.mxu1 %vm138_vm0, %v108_v2 }
  0x34   :  { %320 = vmatmul.msk.bf16.gmra.mxu2 %vm138_vm0, %v112_v3  ;;  %328 = vmatmul.msk.bf16.gmra.mxu3 %vm138_vm0, %v112_v3 }
  0x42   :  { %317 = vmatmul.msk.bf16.gmra.mxu0 %vm138_vm0, %v109_v22  ;;  %325 = vmatmul.msk.bf16.gmra.mxu1 %vm138_vm0, %v109_v22 }
  0x44   :  { %321 = vmatmul.msk.bf16.gmra.mxu2 %vm138_vm0, %v113_v23  ;;  %329 = vmatmul.msk.bf16.gmra.mxu3 %vm138_vm0, %v113_v23 }
  0x8f   :  { %v172_v13 = vpop.f32.mrf.mxu0  ;;  %v221_v24 = vpop.f32.mrf.mxu1 }
  0x90   :  { %261 = vst [vmem:[%s606_s4] sm:$0xff] %v172_v13 }
  0x91   :  { %262 = vst [vmem:[%s606_s4 + $0x8] sm:$0xff] %v221_v24 }
  0x97   :  { %v192_v15 = vpop.f32.mrf.mxu2  ;;  %v241_v25 = vpop.f32.mrf.mxu3 }
  0x98   :  { %277 = vst [vmem:[%s606_s4 + $0x80] sm:$0xff] %v192_v15  ;;  %v174_v26 = vpop.f32.mrf.mxu0  ;;  %v223_v27 = vpop.f32.mrf.mxu1 }
  0x99   :  { %278 = vst [vmem:[%s606_s4 + $0x88] sm:$0xff] %v241_v25 }
  0x9a   :  { %263 = vst [vmem:[%s606_s4 + $0x10] sm:$0xff] %v174_v26 }
  0x9b   :  { %264 = vst [vmem:[%s606_s4 + $0x18] sm:$0xff] %v223_v27 }
  0x9f   :  { %v194_v28 = vpop.f32.mrf.mxu2  ;;  %v243_v29 = vpop.f32.mrf.mxu3 }
  0xa0   :  { %279 = vst [vmem:[%s606_s4 + $0x90] sm:$0xff] %v194_v28  ;;  %v177_v30 = vpop.f32.mrf.mxu0  ;;  %v226_v31 = vpop.f32.mrf.mxu1 }
  0xa1   :  { %280 = vst [vmem:[%s606_s4 + $0x98] sm:$0xff] %v243_v29 }
  0xa2   :  { %265 = vst [vmem:[%s606_s4 + $0x20] sm:$0xff] %v177_v30 }
  0xa3   :  { %266 = vst [vmem:[%s606_s4 + $0x28] sm:$0xff] %v226_v31 }
  0xa7   :  { %v197_v32 = vpop.f32.mrf.mxu2  ;;  %v246_v33 = vpop.f32.mrf.mxu3 }
  0xa8   :  { %281 = vst [vmem:[%s606_s4 + $0xa0] sm:$0xff] %v197_v32  ;;  %v179_v34 = vpop.f32.mrf.mxu0  ;;  %v228_v35 = vpop.f32.mrf.mxu1 }
  0xa9   :  { %282 = vst [vmem:[%s606_s4 + $0xa8] sm:$0xff] %v246_v33 }
  0xaa   :  { %267 = vst [vmem:[%s606_s4 + $0x30] sm:$0xff] %v179_v34 }
  0xab   :  { %268 = vst [vmem:[%s606_s4 + $0x38] sm:$0xff] %v228_v35 }
  0xaf   :  { %v199_v36 = vpop.f32.mrf.mxu2  ;;  %v248_v37 = vpop.f32.mrf.mxu3 }
  0xb0   :  { %283 = vst [vmem:[%s606_s4 + $0xb0] sm:$0xff] %v199_v36  ;;  %v182_v38 = vpop.f32.mrf.mxu0  ;;  %v231_v39 = vpop.f32.mrf.mxu1 }
  0xb1   :  { %284 = vst [vmem:[%s606_s4 + $0xb8] sm:$0xff] %v248_v37 }
  0xb2   :  { %269 = vst [vmem:[%s606_s4 + $0x40] sm:$0xff] %v182_v38 }
  0xb3   :  { %270 = vst [vmem:[%s606_s4 + $0x48] sm:$0xff] %v231_v39 }
  0xb7   :  { %v202_v40 = vpop.f32.mrf.mxu2  ;;  %v251_v41 = vpop.f32.mrf.mxu3 }
  0xb8   :  { %285 = vst [vmem:[%s606_s4 + $0xc0] sm:$0xff] %v202_v40  ;;  %v184_v42 = vpop.f32.mrf.mxu0  ;;  %v233_v43 = vpop.f32.mrf.mxu1 }
  0xb9   :  { %286 = vst [vmem:[%s606_s4 + $0xc8] sm:$0xff] %v251_v41 }
  0xba   :  { %271 = vst [vmem:[%s606_s4 + $0x50] sm:$0xff] %v184_v42 }
  0xbb   :  { %272 = vst [vmem:[%s606_s4 + $0x58] sm:$0xff] %v233_v43 }
  0xbf   :  { %v204_v44 = vpop.f32.mrf.mxu2  ;;  %v253_v45 = vpop.f32.mrf.mxu3 }
  0xc0   :  { %287 = vst [vmem:[%s606_s4 + $0xd0] sm:$0xff] %v204_v44  ;;  %v187_v46 = vpop.f32.mrf.mxu0  ;;  %v236_v47 = vpop.f32.mrf.mxu1 }
  0xc1   :  { %288 = vst [vmem:[%s606_s4 + $0xd8] sm:$0xff] %v253_v45 }
  0xc2   :  { %273 = vst [vmem:[%s606_s4 + $0x60] sm:$0xff] %v187_v46 }
  0xc3   :  { %274 = vst [vmem:[%s606_s4 + $0x68] sm:$0xff] %v236_v47 }
  0xc7   :  { %v207_v48 = vpop.f32.mrf.mxu2  ;;  %v256_v49 = vpop.f32.mrf.mxu3 }
  0xc8   :  { %289 = vst [vmem:[%s606_s4 + $0xe0] sm:$0xff] %v207_v48  ;;  %v189_v50 = vpop.f32.mrf.mxu0  ;;  %v238_v51 = vpop.f32.mrf.mxu1 }
  0xc9   :  { %290 = vst [vmem:[%s606_s4 + $0xe8] sm:$0xff] %v256_v49 }
  0xca   :  { %275 = vst [vmem:[%s606_s4 + $0x70] sm:$0xff] %v189_v50 }
  0xcb   :  { %276 = vst [vmem:[%s606_s4 + $0x78] sm:$0xff] %v238_v51 }
  0xcf   :  { %v209_v52 = vpop.f32.mrf.mxu2  ;;  %v258_v53 = vpop.f32.mrf.mxu3 }
  0xd0   :  { %291 = vst [vmem:[%s606_s4 + $0xf0] sm:$0xff] %v209_v52 }
  0xd1   :  { %292 = vst [vmem:[%s606_s4 + $0xf8] sm:$0xff] %v258_v53 }
  0xd2   :  { %297 = vsyncpa [#allocation3], 1 }

// kernel: generator_forward.15
= control target key start
LH: loop header
LB: loop body
LE: loop exit
PB: predicated region body
PF: predicated region fallthrough
CT: control target
= control target key end

     0   :  { %v14_v0 = vlaneseq  ;;  %v102_v11 = vmov 0.0   ;;  %vm50_vm1 = vcmask 1040384   ;;  %s172_s0 = inlined_call_operand.vmem [shape: f32[32,256], index: 0, kind: input, shape index: {}]   ;;  %s173_s1 = inlined_call_operand.vmem [shape: f32[1,256], index: 1, kind: output, shape index: {0}]   ;;  %s174_s2 = inlined_call_operand.vmem [shape: f32[1,256], index: 2, kind: output, shape index: {1}]  }
   0x1   :  { %v20_v1 = vld [vmem:[%s172_s0] sm:$0xff]  ;;  %v21_v2 = vld [vmem:[%s172_s0 + $0x8] sm:$0xff]  ;;  %v22_v3 = vld [vmem:[%s172_s0 + $0x10] sm:$0xff] }
   0x2   :  { %vm127_vm0 = vcmp.lt.s32.totalorder %v14_v0, 256  ;;  %v23_v5 = vld [vmem:[%s172_s0 + $0x18] sm:$0xff]  ;;  %v24_v6 = vld [vmem:[%s172_s0 + $0x20] sm:$0xff]  ;;  %v25_v7 = vld [vmem:[%s172_s0 + $0x28] sm:$0xff]  ;;  %v29_v8 = vadd.f32 %v22_v3, %v20_v1  ;;  %v60_v9 = vmul.f32 %v20_v1, %v20_v1  ;;  %v61_v10 = vmul.f32 %v21_v2, %v21_v2 }
   0x3   :  { %18 = vst.msk [vmem:[%s173_s1] sm:$0x3] %vm127_vm0, %v102_v11  ;;  %v26_v12 = vld [vmem:[%s172_s0 + $0x30] sm:$0xff]  ;;  %v27_v13 = vld [vmem:[%s172_s0 + $0x38] sm:$0xff]  ;;  %v38_v14 = vadd.f32 %v23_v5, %v21_v2  ;;  %v62_v15 = vmul.f32 %v22_v3, %v22_v3  ;;  %v63_v16 = vmul.f32 %v23_v5, %v23_v5  ;;  %v64_v17 = vmul.f32 %v24_v6, %v24_v6 }
   0x4   :  { %v30_v18 = vadd.f32 %v29_v8, %v24_v6  ;;  %19 = vst.msk [vmem:[%s174_s2] sm:$0x3] %vm127_vm0, %v102_v11  ;;  %v65_v19 = vmul.f32 %v25_v7, %v25_v7  ;;  %v66_v20 = vmul.f32 %v26_v12, %v26_v12  ;;  %v67_v22 = vmul.f32 %v27_v13, %v27_v13 }
   0x5   :  { %v39_v21 = vadd.f32 %v38_v14, %v25_v7  ;;  %v68_v23 = vadd.f32 %v62_v15, %v60_v9  ;;  %v77_v24 = vadd.f32 %v63_v16, %v61_v10 }
   0x6   :  { %v31_v25 = vadd.f32 %v30_v18, %v26_v12 }
   0x7   :  { %v40_v26 = vadd.f32 %v39_v21, %v27_v13  ;;  %v69_v27 = vadd.f32 %v68_v23, %v64_v17  ;;  %v78_v28 = vadd.f32 %v77_v24, %v65_v19 }
   0x8   :  { %v32_v29 = vrot.slane %v31_v25, 4 }
   0x9   :  { %v41_v30 = vrot.slane %v40_v26, 4  ;;  %v70_v31 = vadd.f32 %v69_v27, %v66_v20  ;;  %v79_v32 = vadd.f32 %v78_v28, %v67_v22 }
   0xa   :  { %v33_v33 = vadd.f32 %v32_v29, %v31_v25  ;;  %v28_v53 = vld [vmem:[%s173_s1] sm:$0x3] }
   0xb   :  { %v42_v34 = vadd.f32 %v41_v30, %v40_v26  ;;  %v71_v35 = vrot.slane %v70_v31, 4  ;;  %v80_v36 = vrot.slane %v79_v32, 4  ;;  %v59_v58 = vld [vmem:[%s174_s2] sm:$0x3] }
   0xc   :  { %v34_v37 = vrot.slane %v33_v33, 2 }
   0xd   :  { %v43_v38 = vrot.slane %v42_v34, 2  ;;  %v72_v39 = vadd.f32 %v71_v35, %v70_v31  ;;  %v81_v40 = vadd.f32 %v80_v36, %v79_v32 }
   0xe   :  { %v35_v41 = vadd.f32 %v34_v37, %v33_v33 }
   0xf   :  { %v44_v42 = vadd.f32 %v43_v38, %v42_v34  ;;  %v73_v43 = vrot.slane %v72_v39, 2  ;;  %v82_v44 = vrot.slane %v81_v40, 2 }
  0x10   :  { %v36_v45 = vrot.slane %v35_v41, 1 }
  0x11   :  { %v45_v46 = vrot.slane %v44_v42, 1  ;;  %v74_v47 = vadd.f32 %v73_v43, %v72_v39  ;;  %v83_v48 = vadd.f32 %v82_v44, %v81_v40 }
  0x12   :  { %v37_v49 = vadd.f32 %v36_v45, %v35_v41 }
  0x13   :  { %v46_v50 = vadd.f32 %v45_v46, %v44_v42  ;;  %v75_v51 = vrot.slane %v74_v47, 1  ;;  %v84_v52 = vrot.slane %v83_v48, 1 }
  0x15   :  { %v49_v54 = vrot.slane %v46_v50, 7  ;;  %v76_v55 = vadd.f32 %v75_v51, %v74_v47  ;;  %v85_v56 = vadd.f32 %v84_v52, %v83_v48 }
  0x17   :  { %v51_v57 = vsel %vm50_vm1, %v37_v49, %v49_v54  ;;  %v88_v59 = vrot.slane %v85_v56, 7 }
  0x18   :  { %v53_v60 = vadd.f32 %v51_v57, %v28_v53 }
  0x19   :  { %v89_v61 = vsel %vm50_vm1, %v76_v55, %v88_v59 }
  0x1a   :  { %58 = vst.msk [vmem:[%s173_s1] sm:$0x3] %vm127_vm0, %v53_v60  ;;  %v91_v62 = vadd.f32 %v89_v61, %v59_v58 }
  0x1c   :  { %92 = vst.msk [vmem:[%s174_s2] sm:$0x3] %vm127_vm0, %v91_v62 }

// kernel: generator_forward.16
= control target key start
LH: loop header
LB: loop body
LE: loop exit
PB: predicated region body
PF: predicated region fallthrough
CT: control target
= control target key end

     0   :  { %vm322_vm0 = vcmask 130048   ;;  %s1280_s3 = inlined_call_operand.vmem [shape: bf16[16,128], index: 3, kind: input, shape index: {}]   ;;  %s1281_s0 = inlined_call_operand.vmem [shape: f32[512,16], index: 0, kind: input, shape index: {}]   ;;  %s1282_s1 = inlined_call_operand.vmem [shape: f32[1,16], index: 1, kind: input, shape index: {}]   ;;  %s1283_s2 = inlined_call_operand.vmem [shape: f32[1,16], index: 2, kind: input, shape index: {}]   ;;  %s1284_s4 = inlined_call_operand.vmem [shape: f32[512,128], index: 4, kind: output, shape index: {}]  }
   0x1   :  { %v692_v0 = vld [vmem:[%s1280_s3] sm:$0xff]  ;;  %v19_v2 = vld [vmem:[%s1281_s0 + $0x8] sm:$0xff]  ;;  %v20_v30 = vld [vmem:[%s1281_s0 + $0x10] sm:$0xff] }
   0x2   :  { %v18_v1 = vld [vmem:[%s1281_s0] sm:$0xff]  ;;  %426 = vmatpush.bf16.msra.mxu0 %v692_v0  ;;  %693 = vmatpush.bf16.msra.mxu1 %v692_v0  ;;  %v35_v6 = vld [vmem:[%s1281_s0 + $0x88] sm:$0xff]  ;;  %v21_v35 = vld [vmem:[%s1281_s0 + $0x18] sm:$0xff] }
   0x3   :  { %v735_v3 = vld [vmem:[%s1282_s1] ss:$0 sm:$0xff]  ;;  %694 = vmatpush.bf16.msra.mxu2 %v692_v0  ;;  %695 = vmatpush.bf16.msra.mxu3 %v692_v0  ;;  %v51_v11 = vld [vmem:[%s1281_s0 + $0x108] sm:$0xff]  ;;  %v36_v36 = vld [vmem:[%s1281_s0 + $0x90] sm:$0xff] }
   0x4   :  { %v740_v4 = vld [vmem:[%s1283_s2] ss:$0 sm:$0xff]  ;;  %v86_v7 = vmul.f32 %v735_v3, %v18_v1  ;;  %v87_v8 = vmul.f32 %v735_v3, %v19_v2  ;;  %v103_v13 = vmul.f32 %v735_v3, %v35_v6  ;;  %v119_v15 = vmul.f32 %v735_v3, %v51_v11  ;;  %v67_v16 = vld [vmem:[%s1281_s0 + $0x188] sm:$0xff]  ;;  %v37_v39 = vld [vmem:[%s1281_s0 + $0x98] sm:$0xff] }
   0x5   :  { %v34_v5 = vld [vmem:[%s1281_s0 + $0x80] sm:$0xff]  ;;  %v135_v21 = vmul.f32 %v735_v3, %v67_v16  ;;  %v52_v40 = vld [vmem:[%s1281_s0 + $0x110] sm:$0xff]  ;;  %v53_v41 = vld [vmem:[%s1281_s0 + $0x118] sm:$0xff]  ;;  %v88_v46 = vmul.f32 %v735_v3, %v20_v30  ;;  %v89_v47 = vmul.f32 %v735_v3, %v21_v35  ;;  %v104_v48 = vmul.f32 %v735_v3, %v36_v36 }
   0x6   :  { %v102_v9 = vmul.f32 %v735_v3, %v34_v5  ;;  %v50_v10 = vld [vmem:[%s1281_s0 + $0x100] sm:$0xff]  ;;  %v154_v18 = vadd.f32 %v740_v4, %v86_v7  ;;  %v155_v19 = vadd.f32 %v740_v4, %v87_v8  ;;  %v171_v22 = vadd.f32 %v740_v4, %v103_v13  ;;  %v68_v44 = vld [vmem:[%s1281_s0 + $0x190] sm:$0xff]  ;;  %v69_v49 = vld [vmem:[%s1281_s0 + $0x198] sm:$0xff] }
   0x7   :  { %v66_v12 = vld [vmem:[%s1281_s0 + $0x180] sm:$0xff]  ;;  %v118_v14 = vmul.f32 %v735_v3, %v50_v10  ;;  %v187_v24 = vadd.f32 %v740_v4, %v119_v15  ;;  %v203_v29 = vadd.f32 %v740_v4, %v135_v21  ;;  %v105_v50 = vmul.f32 %v735_v3, %v37_v39  ;;  %v23_v13 = vld [vmem:[%s1281_s0 + $0x28] sm:$0xff] }
   0x8   :  { %v134_v17 = vmul.f32 %v735_v3, %v66_v12  ;;  %v170_v20 = vadd.f32 %v740_v4, %v102_v9  ;;  %v218_v26 = vmax.f32 %v154_v18, 0.0  ;;  %v219_v27 = vmax.f32 %v155_v19, 0.0  ;;  %v22_v12 = vld [vmem:[%s1281_s0 + $0x20] sm:$0xff]  ;;  %v39_v16 = vld [vmem:[%s1281_s0 + $0xa8] sm:$0xff] }
   0x9   :  { %v186_v23 = vadd.f32 %v740_v4, %v118_v14  ;;  %v235_v31 = vmax.f32 %v171_v22, 0.0  ;;  %v251_v33 = vmax.f32 %v187_v24, 0.0  ;;  %v267_v38 = vmax.f32 %v203_v29, 0.0  ;;  %v38_v14 = vld [vmem:[%s1281_s0 + $0xa0] sm:$0xff]  ;;  %v55_v18 = vld [vmem:[%s1281_s0 + $0x128] sm:$0xff] }
   0xa   :  { %v202_v25 = vadd.f32 %v740_v4, %v134_v17  ;;  %v234_v28 = vmax.f32 %v170_v20, 0.0  ;;  %v282_v37 = vpack.c.bf16 %v219_v27, %v218_v26  ;;  %v120_v51 = vmul.f32 %v735_v3, %v52_v40  ;;  %v54_v17 = vld [vmem:[%s1281_s0 + $0x120] sm:$0xff]  ;;  %v71_v20 = vld [vmem:[%s1281_s0 + $0x1a8] sm:$0xff] }
   0xb   :  { %v250_v32 = vmax.f32 %v186_v23, 0.0  ;;  %v121_v52 = vmul.f32 %v735_v3, %v53_v41  ;;  %v136_v53 = vmul.f32 %v735_v3, %v68_v44  ;;  %v137_v54 = vmul.f32 %v735_v3, %v69_v49  ;;  %v70_v19 = vld [vmem:[%s1281_s0 + $0x1a0] sm:$0xff]  ;;  %v25_v49 = vld [vmem:[%s1281_s0 + $0x38] sm:$0xff] }
   0xc   :  { %v266_v34 = vmax.f32 %v202_v25, 0.0  ;;  %v290_v42 = vpack.c.bf16 %v235_v31, %v234_v28  ;;  %660 = vmatmul.msk.bf16.vlgmr.msra.gmra.mxu0 %vm322_vm0, %v282_v37  ;;  %v156_v55 = vadd.f32 %v740_v4, %v88_v46  ;;  %v157_v56 = vadd.f32 %v740_v4, %v89_v47 }
   0xd   :  { %v298_v43 = vpack.c.bf16 %v251_v33, %v250_v32  ;;  %v172_v57 = vadd.f32 %v740_v4, %v104_v48  ;;  %v173_v58 = vadd.f32 %v740_v4, %v105_v50  ;;  %v188_v59 = vadd.f32 %v740_v4, %v120_v51  ;;  %v24_v48 = vld [vmem:[%s1281_s0 + $0x30] sm:$0xff] }
   0xe   :  { %v306_v45 = vpack.c.bf16 %v267_v38, %v266_v34  ;;  %668 = vmatmul.msk.bf16.vlgmr.msra.gmra.mxu1 %vm322_vm0, %v290_v42  ;;  %v189_v60 = vadd.f32 %v740_v4, %v121_v52  ;;  %v204_v61 = vadd.f32 %v740_v4, %v136_v53  ;;  %v205_v62 = vadd.f32 %v740_v4, %v137_v54  ;;  %v40_v50 = vld [vmem:[%s1281_s0 + $0xb0] sm:$0xff]  ;;  %v41_v52 = vld [vmem:[%s1281_s0 + $0xb8] sm:$0xff] }
   0xf   :  { %676 = vmatmul.msk.bf16.vlgmr.msra.gmra.mxu2 %vm322_vm0, %v298_v43  ;;  %v220_v63 = vmax.f32 %v156_v55, 0.0  ;;  %v221_v0 = vmax.f32 %v157_v56, 0.0  ;;  %v236_v1 = vmax.f32 %v172_v57, 0.0  ;;  %v237_v2 = vmax.f32 %v173_v58, 0.0  ;;  %v56_v53 = vld [vmem:[%s1281_s0 + $0x130] sm:$0xff]  ;;  %v57_v54 = vld [vmem:[%s1281_s0 + $0x138] sm:$0xff] }
  0x10   :  { %684 = vmatmul.msk.bf16.vlgmr.msra.gmra.mxu3 %vm322_vm0, %v306_v45  ;;  %v252_v5 = vmax.f32 %v188_v59, 0.0  ;;  %v253_v6 = vmax.f32 %v189_v60, 0.0  ;;  %v268_v7 = vmax.f32 %v204_v61, 0.0  ;;  %v269_v8 = vmax.f32 %v205_v62, 0.0  ;;  %v72_v55 = vld [vmem:[%s1281_s0 + $0x1b0] sm:$0xff]  ;;  %v73_v56 = vld [vmem:[%s1281_s0 + $0x1b8] sm:$0xff] }
  0x11   :  { %v283_v9 = vpack.c.bf16 %v221_v0, %v220_v63  ;;  %v291_v10 = vpack.c.bf16 %v237_v2, %v236_v1  ;;  %v90_v21 = vmul.f32 %v735_v3, %v22_v12  ;;  %v91_v22 = vmul.f32 %v735_v3, %v23_v13 }
  0x12   :  { %v299_v11 = vpack.c.bf16 %v253_v6, %v252_v5  ;;  %v307_v15 = vpack.c.bf16 %v269_v8, %v268_v7  ;;  %v106_v23 = vmul.f32 %v735_v3, %v38_v14  ;;  %v107_v24 = vmul.f32 %v735_v3, %v39_v16 }
  0x13   :  { %v122_v25 = vmul.f32 %v735_v3, %v54_v17  ;;  %v123_v26 = vmul.f32 %v735_v3, %v55_v18  ;;  %v138_v27 = vmul.f32 %v735_v3, %v70_v19  ;;  %v139_v28 = vmul.f32 %v735_v3, %v71_v20 }
  0x14   :  { %v158_v29 = vadd.f32 %v740_v4, %v90_v21  ;;  %v159_v30 = vadd.f32 %v740_v4, %v91_v22  ;;  %v174_v31 = vadd.f32 %v740_v4, %v106_v23  ;;  %v175_v32 = vadd.f32 %v740_v4, %v107_v24  ;;  %v26_v22 = vld [vmem:[%s1281_s0 + $0x40] sm:$0xff]  ;;  %v27_v23 = vld [vmem:[%s1281_s0 + $0x48] sm:$0xff] }
  0x15   :  { %v190_v33 = vadd.f32 %v740_v4, %v122_v25  ;;  %v191_v34 = vadd.f32 %v740_v4, %v123_v26  ;;  %v206_v35 = vadd.f32 %v740_v4, %v138_v27  ;;  %v207_v36 = vadd.f32 %v740_v4, %v139_v28  ;;  %v42_v24 = vld [vmem:[%s1281_s0 + $0xc0] sm:$0xff]  ;;  %v43_v26 = vld [vmem:[%s1281_s0 + $0xc8] sm:$0xff] }
  0x16   :  { %v222_v37 = vmax.f32 %v158_v29, 0.0  ;;  %v223_v38 = vmax.f32 %v159_v30, 0.0  ;;  %v238_v39 = vmax.f32 %v174_v31, 0.0  ;;  %v239_v40 = vmax.f32 %v175_v32, 0.0  ;;  %v58_v27 = vld [vmem:[%s1281_s0 + $0x140] sm:$0xff]  ;;  %v59_v28 = vld [vmem:[%s1281_s0 + $0x148] sm:$0xff] }
  0x17   :  { %v254_v41 = vmax.f32 %v190_v33, 0.0  ;;  %v255_v42 = vmax.f32 %v191_v34, 0.0  ;;  %v270_v43 = vmax.f32 %v206_v35, 0.0  ;;  %v271_v44 = vmax.f32 %v207_v36, 0.0  ;;  %v74_v29 = vld [vmem:[%s1281_s0 + $0x1c0] sm:$0xff]  ;;  %v75_v30 = vld [vmem:[%s1281_s0 + $0x1c8] sm:$0xff] }
  0x18   :  { %v284_v45 = vpack.c.bf16 %v223_v38, %v222_v37  ;;  %v292_v46 = vpack.c.bf16 %v239_v40, %v238_v39  ;;  %v92_v57 = vmul.f32 %v735_v3, %v24_v48  ;;  %v93_v58 = vmul.f32 %v735_v3, %v25_v49 }
  0x19   :  { %v300_v47 = vpack.c.bf16 %v255_v42, %v254_v41  ;;  %v308_v51 = vpack.c.bf16 %v271_v44, %v270_v43  ;;  %v108_v59 = vmul.f32 %v735_v3, %v40_v50  ;;  %v109_v60 = vmul.f32 %v735_v3, %v41_v52 }
  0x1a   :  { %v124_v61 = vmul.f32 %v735_v3, %v56_v53  ;;  %v125_v62 = vmul.f32 %v735_v3, %v57_v54  ;;  %v140_v63 = vmul.f32 %v735_v3, %v72_v55  ;;  %v141_v0 = vmul.f32 %v735_v3, %v73_v56 }
  0x1b   :  { %v160_v1 = vadd.f32 %v740_v4, %v92_v57  ;;  %v161_v2 = vadd.f32 %v740_v4, %v93_v58  ;;  %v176_v5 = vadd.f32 %v740_v4, %v108_v59  ;;  %v177_v6 = vadd.f32 %v740_v4, %v109_v60  ;;  %v28_v58 = vld [vmem:[%s1281_s0 + $0x50] sm:$0xff]  ;;  %v29_v59 = vld [vmem:[%s1281_s0 + $0x58] sm:$0xff] }
  0x1c   :  { %661 = vmatmul.msk.bf16.gmra.mxu0 %vm322_vm0, %v283_v9  ;;  %v192_v7 = vadd.f32 %v740_v4, %v124_v61  ;;  %v193_v8 = vadd.f32 %v740_v4, %v125_v62  ;;  %v208_v9 = vadd.f32 %v740_v4, %v140_v63  ;;  %v94_v31 = vmul.f32 %v735_v3, %v26_v22  ;;  %v44_v60 = vld [vmem:[%s1281_s0 + $0xd0] sm:$0xff]  ;;  %v45_v62 = vld [vmem:[%s1281_s0 + $0xd8] sm:$0xff] }
  0x1d   :  { %v225_v12 = vmax.f32 %v161_v2, 0.0  ;;  %v240_v13 = vmax.f32 %v176_v5, 0.0  ;;  %v241_v14 = vmax.f32 %v177_v6, 0.0  ;;  %v95_v32 = vmul.f32 %v735_v3, %v27_v23  ;;  %v60_v63 = vld [vmem:[%s1281_s0 + $0x150] sm:$0xff]  ;;  %v77_v2 = vld [vmem:[%s1281_s0 + $0x1d8] sm:$0xff] }
  0x1e   :  { %669 = vmatmul.msk.bf16.gmra.mxu1 %vm322_vm0, %v291_v10  ;;  %v209_v10 = vadd.f32 %v740_v4, %v141_v0  ;;  %v257_v16 = vmax.f32 %v193_v8, 0.0  ;;  %v272_v17 = vmax.f32 %v208_v9, 0.0  ;;  %v110_v33 = vmul.f32 %v735_v3, %v42_v24  ;;  %v61_v0 = vld [vmem:[%s1281_s0 + $0x158] sm:$0xff] }
  0x1f   :  { %677 = vmatmul.msk.bf16.gmra.mxu2 %vm322_vm0, %v299_v11  ;;  %v224_v11 = vmax.f32 %v160_v1, 0.0  ;;  %v293_v20 = vpack.c.bf16 %v241_v14, %v240_v13  ;;  %v111_v34 = vmul.f32 %v735_v3, %v43_v26  ;;  %v126_v35 = vmul.f32 %v735_v3, %v58_v27  ;;  %v76_v1 = vld [vmem:[%s1281_s0 + $0x1d0] sm:$0xff] }
  0x20   :  { %685 = vmatmul.msk.bf16.gmra.mxu3 %vm322_vm0, %v307_v15  ;;  %v256_v15 = vmax.f32 %v192_v7, 0.0  ;;  %v273_v18 = vmax.f32 %v209_v10, 0.0  ;;  %v127_v36 = vmul.f32 %v735_v3, %v59_v28  ;;  %v142_v37 = vmul.f32 %v735_v3, %v74_v29 }
  0x21   :  { %v285_v19 = vpack.c.bf16 %v225_v12, %v224_v11  ;;  %v143_v38 = vmul.f32 %v735_v3, %v75_v30  ;;  %v162_v39 = vadd.f32 %v740_v4, %v94_v31  ;;  %v163_v40 = vadd.f32 %v740_v4, %v95_v32  ;;  %v30_v32 = vld [vmem:[%s1281_s0 + $0x60] sm:$0xff] }
  0x22   :  { %v301_v21 = vpack.c.bf16 %v257_v16, %v256_v15  ;;  %v309_v25 = vpack.c.bf16 %v273_v18, %v272_v17  ;;  %v178_v41 = vadd.f32 %v740_v4, %v110_v33  ;;  %v179_v42 = vadd.f32 %v740_v4, %v111_v34  ;;  %v31_v33 = vld [vmem:[%s1281_s0 + $0x68] sm:$0xff]  ;;  %v46_v34 = vld [vmem:[%s1281_s0 + $0xe0] sm:$0xff] }
  0x23   :  { %v194_v43 = vadd.f32 %v740_v4, %v126_v35  ;;  %v195_v44 = vadd.f32 %v740_v4, %v127_v36  ;;  %v227_v48 = vmax.f32 %v163_v40, 0.0  ;;  %v96_v5 = vmul.f32 %v735_v3, %v28_v58  ;;  %v47_v36 = vld [vmem:[%s1281_s0 + $0xe8] sm:$0xff] }
  0x24   :  { %v242_v49 = vmax.f32 %v178_v41, 0.0  ;;  %v243_v50 = vmax.f32 %v179_v42, 0.0  ;;  %v97_v6 = vmul.f32 %v735_v3, %v29_v59  ;;  %v112_v7 = vmul.f32 %v735_v3, %v44_v60  ;;  %v79_v40 = vld [vmem:[%s1281_s0 + $0x1e8] sm:$0xff] }
  0x25   :  { %v259_v52 = vmax.f32 %v195_v44, 0.0  ;;  %v113_v8 = vmul.f32 %v735_v3, %v45_v62  ;;  %v128_v9 = vmul.f32 %v735_v3, %v60_v63  ;;  %v129_v10 = vmul.f32 %v735_v3, %v61_v0 }
  0x26   :  { %v294_v56 = vpack.c.bf16 %v243_v50, %v242_v49  ;;  %v144_v11 = vmul.f32 %v735_v3, %v76_v1  ;;  %v145_v12 = vmul.f32 %v735_v3, %v77_v2  ;;  %v164_v13 = vadd.f32 %v740_v4, %v96_v5 }
  0x27   :  { %v165_v14 = vadd.f32 %v740_v4, %v97_v6  ;;  %v180_v15 = vadd.f32 %v740_v4, %v112_v7  ;;  %v181_v16 = vadd.f32 %v740_v4, %v113_v8  ;;  %v196_v17 = vadd.f32 %v740_v4, %v128_v9  ;;  %v32_v6 = vld [vmem:[%s1281_s0 + $0x70] sm:$0xff]  ;;  %v33_v7 = vld [vmem:[%s1281_s0 + $0x78] sm:$0xff] }
  0x28   :  { %v197_v18 = vadd.f32 %v740_v4, %v129_v10  ;;  %v98_v41 = vmul.f32 %v735_v3, %v30_v32  ;;  %v99_v42 = vmul.f32 %v735_v3, %v31_v33  ;;  %v115_v44 = vmul.f32 %v735_v3, %v47_v36  ;;  %v48_v8 = vld [vmem:[%s1281_s0 + $0xf0] sm:$0xff]  ;;  %v49_v10 = vld [vmem:[%s1281_s0 + $0xf8] sm:$0xff] }
  0x29   :  { %v229_v22 = vmax.f32 %v165_v14, 0.0  ;;  %v244_v23 = vmax.f32 %v180_v15, 0.0  ;;  %v245_v24 = vmax.f32 %v181_v16, 0.0  ;;  %v81_v14 = vld [vmem:[%s1281_s0 + $0x1f8] sm:$0xff]  ;;  %v100_v15 = vmul.f32 %v735_v3, %v32_v6 }
  0x2a   :  { %v261_v26 = vmax.f32 %v197_v18, 0.0  ;;  %v166_v49 = vadd.f32 %v740_v4, %v98_v41  ;;  %v167_v50 = vadd.f32 %v740_v4, %v99_v42  ;;  %v101_v16 = vmul.f32 %v735_v3, %v33_v7 }
  0x2b   :  { %v295_v30 = vpack.c.bf16 %v245_v24, %v244_v23  ;;  %v117_v18 = vmul.f32 %v735_v3, %v49_v10  ;;  %v168_v23 = vadd.f32 %v740_v4, %v100_v15 }
  0x2c   :  { %662 = vmatmul.msk.bf16.gmra.mxu0 %vm322_vm0, %v284_v45  ;;  %v210_v45 = vadd.f32 %v740_v4, %v142_v37  ;;  %v62_v37 = vld [vmem:[%s1281_s0 + $0x160] sm:$0xff]  ;;  %v231_v58 = vmax.f32 %v167_v50, 0.0  ;;  %v169_v24 = vadd.f32 %v740_v4, %v101_v16 }
  0x2e   :  { %670 = vmatmul.msk.bf16.gmra.mxu1 %vm322_vm0, %v292_v46  ;;  %v211_v46 = vadd.f32 %v740_v4, %v143_v38  ;;  %v274_v53 = vmax.f32 %v210_v45, 0.0  ;;  %v63_v38 = vld [vmem:[%s1281_s0 + $0x168] sm:$0xff]  ;;  %v130_v45 = vmul.f32 %v735_v3, %v62_v37  ;;  %v233_v32 = vmax.f32 %v169_v24, 0.0 }
  0x2f   :  { %678 = vmatmul.msk.bf16.gmra.mxu2 %vm322_vm0, %v300_v47  ;;  %v226_v47 = vmax.f32 %v162_v39, 0.0  ;;  %v78_v39 = vld [vmem:[%s1281_s0 + $0x1e0] sm:$0xff] }
  0x30   :  { %686 = vmatmul.msk.bf16.gmra.mxu3 %vm322_vm0, %v308_v51  ;;  %v258_v51 = vmax.f32 %v194_v43, 0.0  ;;  %v275_v54 = vmax.f32 %v211_v46, 0.0  ;;  %v114_v43 = vmul.f32 %v735_v3, %v46_v34  ;;  %v131_v46 = vmul.f32 %v735_v3, %v63_v38 }
  0x31   :  { %v286_v55 = vpack.c.bf16 %v227_v48, %v226_v47  ;;  %v146_v47 = vmul.f32 %v735_v3, %v78_v39  ;;  %v147_v48 = vmul.f32 %v735_v3, %v79_v40 }
  0x32   :  { %v302_v57 = vpack.c.bf16 %v259_v52, %v258_v51  ;;  %v310_v61 = vpack.c.bf16 %v275_v54, %v274_v53  ;;  %v182_v51 = vadd.f32 %v740_v4, %v114_v43  ;;  %v183_v52 = vadd.f32 %v740_v4, %v115_v44 }
  0x33   :  { %v198_v53 = vadd.f32 %v740_v4, %v130_v45  ;;  %v199_v54 = vadd.f32 %v740_v4, %v131_v46 }
  0x34   :  { %v246_v59 = vmax.f32 %v182_v51, 0.0  ;;  %v247_v60 = vmax.f32 %v183_v52, 0.0 }
  0x35   :  { %v263_v62 = vmax.f32 %v199_v54, 0.0 }
  0x36   :  { %v296_v2 = vpack.c.bf16 %v247_v60, %v246_v59 }
  0x3c   :  { %663 = vmatmul.msk.bf16.gmra.mxu0 %vm322_vm0, %v285_v19  ;;  %v212_v19 = vadd.f32 %v740_v4, %v144_v11  ;;  %v64_v11 = vld [vmem:[%s1281_s0 + $0x170] sm:$0xff] }
  0x3e   :  { %671 = vmatmul.msk.bf16.gmra.mxu1 %vm322_vm0, %v293_v20  ;;  %v213_v20 = vadd.f32 %v740_v4, %v145_v12  ;;  %v276_v27 = vmax.f32 %v212_v19, 0.0  ;;  %v65_v12 = vld [vmem:[%s1281_s0 + $0x178] sm:$0xff]  ;;  %v132_v19 = vmul.f32 %v735_v3, %v64_v11 }
  0x3f   :  { %679 = vmatmul.msk.bf16.gmra.mxu2 %vm322_vm0, %v301_v21  ;;  %v228_v21 = vmax.f32 %v164_v13, 0.0  ;;  %v80_v13 = vld [vmem:[%s1281_s0 + $0x1f0] sm:$0xff] }
  0x40   :  { %687 = vmatmul.msk.bf16.gmra.mxu3 %vm322_vm0, %v309_v25  ;;  %v260_v25 = vmax.f32 %v196_v17, 0.0  ;;  %v277_v28 = vmax.f32 %v213_v20, 0.0  ;;  %v116_v17 = vmul.f32 %v735_v3, %v48_v8  ;;  %v133_v20 = vmul.f32 %v735_v3, %v65_v12 }
  0x41   :  { %v287_v29 = vpack.c.bf16 %v229_v22, %v228_v21  ;;  %v148_v21 = vmul.f32 %v735_v3, %v80_v13  ;;  %v149_v22 = vmul.f32 %v735_v3, %v81_v14 }
  0x42   :  { %v303_v31 = vpack.c.bf16 %v261_v26, %v260_v25  ;;  %v311_v35 = vpack.c.bf16 %v277_v28, %v276_v27  ;;  %v184_v25 = vadd.f32 %v740_v4, %v116_v17  ;;  %v185_v26 = vadd.f32 %v740_v4, %v117_v18 }
  0x43   :  { %v200_v27 = vadd.f32 %v740_v4, %v132_v19  ;;  %v201_v28 = vadd.f32 %v740_v4, %v133_v20 }
  0x44   :  { %v248_v33 = vmax.f32 %v184_v25, 0.0  ;;  %v249_v3 = vmax.f32 %v185_v26, 0.0 }
  0x45   :  { %v264_v34 = vmax.f32 %v200_v27, 0.0 }
  0x46   :  { %v297_v39 = vpack.c.bf16 %v249_v3, %v248_v33 }
  0x4c   :  { %664 = vmatmul.msk.bf16.gmra.mxu0 %vm322_vm0, %v286_v55  ;;  %v214_v55 = vadd.f32 %v740_v4, %v146_v47 }
  0x4e   :  { %672 = vmatmul.msk.bf16.gmra.mxu1 %vm322_vm0, %v294_v56  ;;  %v215_v56 = vadd.f32 %v740_v4, %v147_v48  ;;  %v278_v63 = vmax.f32 %v214_v55, 0.0 }
  0x4f   :  { %680 = vmatmul.msk.bf16.gmra.mxu2 %vm322_vm0, %v302_v57  ;;  %v230_v57 = vmax.f32 %v166_v49, 0.0 }
  0x50   :  { %688 = vmatmul.msk.bf16.gmra.mxu3 %vm322_vm0, %v310_v61  ;;  %v262_v61 = vmax.f32 %v198_v53, 0.0  ;;  %v279_v0 = vmax.f32 %v215_v56, 0.0 }
  0x51   :  { %v288_v1 = vpack.c.bf16 %v231_v58, %v230_v57 }
  0x52   :  { %v304_v5 = vpack.c.bf16 %v263_v62, %v262_v61  ;;  %v312_v9 = vpack.c.bf16 %v279_v0, %v278_v63 }
  0x5c   :  { %665 = vmatmul.msk.bf16.gmra.mxu0 %vm322_vm0, %v287_v29  ;;  %v216_v29 = vadd.f32 %v740_v4, %v148_v21 }
  0x5e   :  { %673 = vmatmul.msk.bf16.gmra.mxu1 %vm322_vm0, %v295_v30  ;;  %v217_v30 = vadd.f32 %v740_v4, %v149_v22  ;;  %v280_v36 = vmax.f32 %v216_v29, 0.0 }
  0x5f   :  { %681 = vmatmul.msk.bf16.gmra.mxu2 %vm322_vm0, %v303_v31  ;;  %v232_v31 = vmax.f32 %v168_v23, 0.0 }
  0x60   :  { %689 = vmatmul.msk.bf16.gmra.mxu3 %vm322_vm0, %v311_v35  ;;  %v265_v35 = vmax.f32 %v201_v28, 0.0  ;;  %v281_v37 = vmax.f32 %v217_v30, 0.0 }
  0x61   :  { %v289_v38 = vpack.c.bf16 %v233_v32, %v232_v31 }
  0x62   :  { %v305_v40 = vpack.c.bf16 %v265_v35, %v264_v34  ;;  %v313_v41 = vpack.c.bf16 %v281_v37, %v280_v36 }
  0x6c   :  { %666 = vmatmul.msk.bf16.gmra.mxu0 %vm322_vm0, %v288_v1 }
  0x6e   :  { %674 = vmatmul.msk.bf16.gmra.mxu1 %vm322_vm0, %v296_v2 }
  0x6f   :  { %682 = vmatmul.msk.bf16.gmra.mxu2 %vm322_vm0, %v304_v5 }
  0x70   :  { %690 = vmatmul.msk.bf16.gmra.mxu3 %vm322_vm0, %v312_v9 }
  0x7c   :  { %667 = vmatmul.msk.bf16.gmra.mxu0 %vm322_vm0, %v289_v38 }
  0x7e   :  { %675 = vmatmul.msk.bf16.gmra.mxu1 %vm322_vm0, %v297_v39 }
  0x7f   :  { %683 = vmatmul.msk.bf16.gmra.mxu2 %vm322_vm0, %v305_v40 }
  0x80   :  { %691 = vmatmul.msk.bf16.gmra.mxu3 %vm322_vm0, %v313_v41 }
  0x89   :  { %v428_v4 = vpop.f32.mrf.mxu0 }
  0x8a   :  { %588 = vst [vmem:[%s1284_s4] sm:$0xff] %v428_v4 }
  0x8b   :  { %v468_v42 = vpop.f32.mrf.mxu1 }
  0x8c   :  { %604 = vst [vmem:[%s1284_s4 + $0x80] sm:$0xff] %v468_v42 }
  0x91   :  { %v430_v45 = vpop.f32.mrf.mxu0 }
  0x92   :  { %v508_v43 = vpop.f32.mrf.mxu2  ;;  %589 = vst [vmem:[%s1284_s4 + $0x8] sm:$0xff] %v430_v45 }
  0x93   :  { %620 = vst [vmem:[%s1284_s4 + $0x100] sm:$0xff] %v508_v43  ;;  %v548_v44 = vpop.f32.mrf.mxu3  ;;  %v470_v46 = vpop.f32.mrf.mxu1 }
  0x94   :  { %636 = vst [vmem:[%s1284_s4 + $0x180] sm:$0xff] %v548_v44 }
  0x95   :  { %605 = vst [vmem:[%s1284_s4 + $0x88] sm:$0xff] %v470_v46 }
  0x99   :  { %v433_v49 = vpop.f32.mrf.mxu0 }
  0x9a   :  { %v510_v47 = vpop.f32.mrf.mxu2  ;;  %590 = vst [vmem:[%s1284_s4 + $0x10] sm:$0xff] %v433_v49 }
  0x9b   :  { %621 = vst [vmem:[%s1284_s4 + $0x108] sm:$0xff] %v510_v47  ;;  %v550_v48 = vpop.f32.mrf.mxu3  ;;  %v473_v50 = vpop.f32.mrf.mxu1 }
  0x9c   :  { %637 = vst [vmem:[%s1284_s4 + $0x188] sm:$0xff] %v550_v48 }
  0x9d   :  { %606 = vst [vmem:[%s1284_s4 + $0x90] sm:$0xff] %v473_v50 }
  0xa1   :  { %v435_v53 = vpop.f32.mrf.mxu0 }
  0xa2   :  { %v513_v51 = vpop.f32.mrf.mxu2  ;;  %591 = vst [vmem:[%s1284_s4 + $0x18] sm:$0xff] %v435_v53 }
  0xa3   :  { %622 = vst [vmem:[%s1284_s4 + $0x110] sm:$0xff] %v513_v51  ;;  %v553_v52 = vpop.f32.mrf.mxu3  ;;  %v475_v54 = vpop.f32.mrf.mxu1 }
  0xa4   :  { %638 = vst [vmem:[%s1284_s4 + $0x190] sm:$0xff] %v553_v52 }
  0xa5   :  { %607 = vst [vmem:[%s1284_s4 + $0x98] sm:$0xff] %v475_v54 }
  0xa9   :  { %v438_v57 = vpop.f32.mrf.mxu0 }
  0xaa   :  { %v515_v55 = vpop.f32.mrf.mxu2  ;;  %592 = vst [vmem:[%s1284_s4 + $0x20] sm:$0xff] %v438_v57 }
  0xab   :  { %623 = vst [vmem:[%s1284_s4 + $0x118] sm:$0xff] %v515_v55  ;;  %v555_v56 = vpop.f32.mrf.mxu3  ;;  %v478_v58 = vpop.f32.mrf.mxu1 }
  0xac   :  { %639 = vst [vmem:[%s1284_s4 + $0x198] sm:$0xff] %v555_v56 }
  0xad   :  { %608 = vst [vmem:[%s1284_s4 + $0xa0] sm:$0xff] %v478_v58 }
  0xb1   :  { %v440_v61 = vpop.f32.mrf.mxu0 }
  0xb2   :  { %v518_v59 = vpop.f32.mrf.mxu2  ;;  %593 = vst [vmem:[%s1284_s4 + $0x28] sm:$0xff] %v440_v61 }
  0xb3   :  { %624 = vst [vmem:[%s1284_s4 + $0x120] sm:$0xff] %v518_v59  ;;  %v558_v60 = vpop.f32.mrf.mxu3  ;;  %v480_v62 = vpop.f32.mrf.mxu1 }
  0xb4   :  { %640 = vst [vmem:[%s1284_s4 + $0x1a0] sm:$0xff] %v558_v60 }
  0xb5   :  { %609 = vst [vmem:[%s1284_s4 + $0xa8] sm:$0xff] %v480_v62 }
  0xb9   :  { %v443_v1 = vpop.f32.mrf.mxu0 }
  0xba   :  { %v520_v63 = vpop.f32.mrf.mxu2  ;;  %594 = vst [vmem:[%s1284_s4 + $0x30] sm:$0xff] %v443_v1 }
  0xbb   :  { %625 = vst [vmem:[%s1284_s4 + $0x128] sm:$0xff] %v520_v63  ;;  %v560_v0 = vpop.f32.mrf.mxu3  ;;  %v483_v2 = vpop.f32.mrf.mxu1 }
  0xbc   :  { %641 = vst [vmem:[%s1284_s4 + $0x1a8] sm:$0xff] %v560_v0 }
  0xbd   :  { %610 = vst [vmem:[%s1284_s4 + $0xb0] sm:$0xff] %v483_v2 }
  0xc1   :  { %v445_v7 = vpop.f32.mrf.mxu0 }
  0xc2   :  { %v523_v5 = vpop.f32.mrf.mxu2  ;;  %595 = vst [vmem:[%s1284_s4 + $0x38] sm:$0xff] %v445_v7 }
  0xc3   :  { %626 = vst [vmem:[%s1284_s4 + $0x130] sm:$0xff] %v523_v5  ;;  %v563_v6 = vpop.f32.mrf.mxu3  ;;  %v485_v8 = vpop.f32.mrf.mxu1 }
  0xc4   :  { %642 = vst [vmem:[%s1284_s4 + $0x1b0] sm:$0xff] %v563_v6 }
  0xc5   :  { %611 = vst [vmem:[%s1284_s4 + $0xb8] sm:$0xff] %v485_v8 }
  0xc9   :  { %v448_v11 = vpop.f32.mrf.mxu0 }
  0xca   :  { %v525_v9 = vpop.f32.mrf.mxu2  ;;  %596 = vst [vmem:[%s1284_s4 + $0x40] sm:$0xff] %v448_v11 }
  0xcb   :  { %627 = vst [vmem:[%s1284_s4 + $0x138] sm:$0xff] %v525_v9  ;;  %v565_v10 = vpop.f32.mrf.mxu3  ;;  %v488_v12 = vpop.f32.mrf.mxu1 }
  0xcc   :  { %643 = vst [vmem:[%s1284_s4 + $0x1b8] sm:$0xff] %v565_v10 }
  0xcd   :  { %612 = vst [vmem:[%s1284_s4 + $0xc0] sm:$0xff] %v488_v12 }
  0xd1   :  { %v450_v15 = vpop.f32.mrf.mxu0 }
  0xd2   :  { %v528_v13 = vpop.f32.mrf.mxu2  ;;  %597 = vst [vmem:[%s1284_s4 + $0x48] sm:$0xff] %v450_v15 }
  0xd3   :  { %628 = vst [vmem:[%s1284_s4 + $0x140] sm:$0xff] %v528_v13  ;;  %v568_v14 = vpop.f32.mrf.mxu3  ;;  %v490_v16 = vpop.f32.mrf.mxu1 }
  0xd4   :  { %644 = vst [vmem:[%s1284_s4 + $0x1c0] sm:$0xff] %v568_v14 }
  0xd5   :  { %613 = vst [vmem:[%s1284_s4 + $0xc8] sm:$0xff] %v490_v16 }
  0xd9   :  { %v453_v19 = vpop.f32.mrf.mxu0 }
  0xda   :  { %v530_v17 = vpop.f32.mrf.mxu2  ;;  %598 = vst [vmem:[%s1284_s4 + $0x50] sm:$0xff] %v453_v19 }
  0xdb   :  { %629 = vst [vmem:[%s1284_s4 + $0x148] sm:$0xff] %v530_v17  ;;  %v570_v18 = vpop.f32.mrf.mxu3  ;;  %v493_v20 = vpop.f32.mrf.mxu1 }
  0xdc   :  { %645 = vst [vmem:[%s1284_s4 + $0x1c8] sm:$0xff] %v570_v18 }
  0xdd   :  { %614 = vst [vmem:[%s1284_s4 + $0xd0] sm:$0xff] %v493_v20 }
  0xe1   :  { %v455_v23 = vpop.f32.mrf.mxu0 }
  0xe2   :  { %v533_v21 = vpop.f32.mrf.mxu2  ;;  %599 = vst [vmem:[%s1284_s4 + $0x58] sm:$0xff] %v455_v23 }
  0xe3   :  { %630 = vst [vmem:[%s1284_s4 + $0x150] sm:$0xff] %v533_v21  ;;  %v573_v22 = vpop.f32.mrf.mxu3  ;;  %v495_v24 = vpop.f32.mrf.mxu1 }
  0xe4   :  { %646 = vst [vmem:[%s1284_s4 + $0x1d0] sm:$0xff] %v573_v22 }
  0xe5   :  { %615 = vst [vmem:[%s1284_s4 + $0xd8] sm:$0xff] %v495_v24 }
  0xe9   :  { %v458_v27 = vpop.f32.mrf.mxu0 }
  0xea   :  { %v535_v25 = vpop.f32.mrf.mxu2  ;;  %600 = vst [vmem:[%s1284_s4 + $0x60] sm:$0xff] %v458_v27 }
  0xeb   :  { %631 = vst [vmem:[%s1284_s4 + $0x158] sm:$0xff] %v535_v25  ;;  %v575_v26 = vpop.f32.mrf.mxu3  ;;  %v498_v28 = vpop.f32.mrf.mxu1 }
  0xec   :  { %647 = vst [vmem:[%s1284_s4 + $0x1d8] sm:$0xff] %v575_v26 }
  0xed   :  { %616 = vst [vmem:[%s1284_s4 + $0xe0] sm:$0xff] %v498_v28 }
  0xf1   :  { %v460_v31 = vpop.f32.mrf.mxu0 }
  0xf2   :  { %v538_v29 = vpop.f32.mrf.mxu2  ;;  %601 = vst [vmem:[%s1284_s4 + $0x68] sm:$0xff] %v460_v31 }
  0xf3   :  { %632 = vst [vmem:[%s1284_s4 + $0x160] sm:$0xff] %v538_v29  ;;  %v578_v30 = vpop.f32.mrf.mxu3  ;;  %v500_v32 = vpop.f32.mrf.mxu1 }
  0xf4   :  { %648 = vst [vmem:[%s1284_s4 + $0x1e0] sm:$0xff] %v578_v30 }
  0xf5   :  { %617 = vst [vmem:[%s1284_s4 + $0xe8] sm:$0xff] %v500_v32 }
  0xf9   :  { %v463_v34 = vpop.f32.mrf.mxu0 }
  0xfa   :  { %v540_v33 = vpop.f32.mrf.mxu2  ;;  %602 = vst [vmem:[%s1284_s4 + $0x70] sm:$0xff] %v463_v34 }
  0xfb   :  { %633 = vst [vmem:[%s1284_s4 + $0x168] sm:$0xff] %v540_v33  ;;  %v580_v3 = vpop.f32.mrf.mxu3  ;;  %v503_v35 = vpop.f32.mrf.mxu1 }
  0xfc   :  { %649 = vst [vmem:[%s1284_s4 + $0x1e8] sm:$0xff] %v580_v3 }
  0xfd   :  { %618 = vst [vmem:[%s1284_s4 + $0xf0] sm:$0xff] %v503_v35 }
 0x101   :  { %v465_v38 = vpop.f32.mrf.mxu0 }
 0x102   :  { %v543_v36 = vpop.f32.mrf.mxu2  ;;  %603 = vst [vmem:[%s1284_s4 + $0x78] sm:$0xff] %v465_v38 }
 0x103   :  { %634 = vst [vmem:[%s1284_s4 + $0x170] sm:$0xff] %v543_v36  ;;  %v583_v37 = vpop.f32.mrf.mxu3  ;;  %v505_v39 = vpop.f32.mrf.mxu1 }
 0x104   :  { %650 = vst [vmem:[%s1284_s4 + $0x1f0] sm:$0xff] %v583_v37 }
 0x105   :  { %619 = vst [vmem:[%s1284_s4 + $0xf8] sm:$0xff] %v505_v39 }
 0x10a   :  { %v545_v40 = vpop.f32.mrf.mxu2 }
 0x10b   :  { %635 = vst [vmem:[%s1284_s4 + $0x178] sm:$0xff] %v545_v40  ;;  %v585_v41 = vpop.f32.mrf.mxu3 }
 0x10c   :  { %651 = vst [vmem:[%s1284_s4 + $0x1f8] sm:$0xff] %v585_v41 }

// kernel: generator_forward.17
= control target key start
LH: loop header
LB: loop body
LE: loop exit
PB: predicated region body
PF: predicated region fallthrough
CT: control target
= control target key end

     0   :  { %v14_v0 = vlaneseq  ;;  %v134_v8 = vmov 0.0   ;;  %vm66_vm1 = vcmask 1040384   ;;  %s228_s0 = inlined_call_operand.vmem [shape: f32[64,256], index: 0, kind: input, shape index: {}]   ;;  %s229_s1 = inlined_call_operand.vmem [shape: f32[1,256], index: 1, kind: output, shape index: {0}]   ;;  %s230_s2 = inlined_call_operand.vmem [shape: f32[1,256], index: 2, kind: output, shape index: {1}]  }
   0x1   :  { %v20_v1 = vld [vmem:[%s228_s0] sm:$0xff]  ;;  %v21_v2 = vld [vmem:[%s228_s0 + $0x8] sm:$0xff]  ;;  %v22_v3 = vld [vmem:[%s228_s0 + $0x10] sm:$0xff] }
   0x2   :  { %vm159_vm0 = vcmp.lt.s32.totalorder %v14_v0, 256  ;;  %v23_v5 = vld [vmem:[%s228_s0 + $0x18] sm:$0xff]  ;;  %v24_v6 = vld [vmem:[%s228_s0 + $0x20] sm:$0xff]  ;;  %v37_v7 = vadd.f32 %v22_v3, %v20_v1  ;;  %v25_v9 = vld [vmem:[%s228_s0 + $0x28] sm:$0xff]  ;;  %v76_v11 = vmul.f32 %v20_v1, %v20_v1  ;;  %v78_v12 = vmul.f32 %v22_v3, %v22_v3 }
   0x3   :  { %18 = vst.msk [vmem:[%s229_s1] sm:$0x3] %vm159_vm0, %v134_v8  ;;  %v50_v10 = vadd.f32 %v23_v5, %v21_v2  ;;  %v26_v13 = vld [vmem:[%s228_s0 + $0x30] sm:$0xff]  ;;  %v77_v15 = vmul.f32 %v21_v2, %v21_v2  ;;  %v79_v16 = vmul.f32 %v23_v5, %v23_v5  ;;  %v27_v17 = vld [vmem:[%s228_s0 + $0x38] sm:$0xff]  ;;  %v80_v19 = vmul.f32 %v24_v6, %v24_v6  ;;  %v28_v20 = vld [vmem:[%s228_s0 + $0x40] sm:$0xff] }
   0x4   :  { %v38_v14 = vadd.f32 %v37_v7, %v24_v6  ;;  %19 = vst.msk [vmem:[%s230_s2] sm:$0x3] %vm159_vm0, %v134_v8  ;;  %v81_v22 = vmul.f32 %v25_v9, %v25_v9  ;;  %v29_v23 = vld [vmem:[%s228_s0 + $0x48] sm:$0xff]  ;;  %v82_v25 = vmul.f32 %v26_v13, %v26_v13  ;;  %v92_v26 = vadd.f32 %v78_v12, %v76_v11  ;;  %v30_v27 = vld [vmem:[%s228_s0 + $0x50] sm:$0xff]  ;;  %v31_v31 = vld [vmem:[%s228_s0 + $0x58] sm:$0xff] }
   0x5   :  { %v51_v18 = vadd.f32 %v50_v10, %v25_v9  ;;  %v83_v29 = vmul.f32 %v27_v17, %v27_v17  ;;  %v105_v30 = vadd.f32 %v79_v16, %v77_v15  ;;  %v84_v33 = vmul.f32 %v28_v20, %v28_v20  ;;  %v32_v35 = vld [vmem:[%s228_s0 + $0x60] sm:$0xff]  ;;  %v33_v39 = vld [vmem:[%s228_s0 + $0x68] sm:$0xff]  ;;  %v34_v43 = vld [vmem:[%s228_s0 + $0x70] sm:$0xff] }
   0x6   :  { %v39_v21 = vadd.f32 %v38_v14, %v26_v13  ;;  %v93_v34 = vadd.f32 %v92_v26, %v80_v19  ;;  %v85_v37 = vmul.f32 %v29_v23, %v29_v23  ;;  %v86_v41 = vmul.f32 %v30_v27, %v30_v27  ;;  %v35_v47 = vld [vmem:[%s228_s0 + $0x78] sm:$0xff] }
   0x7   :  { %v52_v24 = vadd.f32 %v51_v18, %v27_v17  ;;  %v106_v38 = vadd.f32 %v105_v30, %v81_v22  ;;  %v87_v45 = vmul.f32 %v31_v31, %v31_v31  ;;  %v88_v49 = vmul.f32 %v32_v35, %v32_v35 }
   0x8   :  { %v40_v28 = vadd.f32 %v39_v21, %v28_v20  ;;  %v94_v42 = vadd.f32 %v93_v34, %v82_v25  ;;  %v89_v52 = vmul.f32 %v33_v39, %v33_v39  ;;  %v90_v55 = vmul.f32 %v34_v43, %v34_v43 }
   0x9   :  { %v53_v32 = vadd.f32 %v52_v24, %v29_v23  ;;  %v107_v46 = vadd.f32 %v106_v38, %v83_v29  ;;  %v91_v58 = vmul.f32 %v35_v47, %v35_v47 }
   0xa   :  { %v41_v36 = vadd.f32 %v40_v28, %v30_v27  ;;  %v95_v50 = vadd.f32 %v94_v42, %v84_v33  ;;  %v36_v20 = vld [vmem:[%s229_s1] sm:$0x3] }
   0xb   :  { %v54_v40 = vadd.f32 %v53_v32, %v31_v31  ;;  %v108_v53 = vadd.f32 %v107_v46, %v85_v37  ;;  %v75_v28 = vld [vmem:[%s230_s2] sm:$0x3] }
   0xc   :  { %v42_v44 = vadd.f32 %v41_v36, %v32_v35  ;;  %v96_v56 = vadd.f32 %v95_v50, %v86_v41 }
   0xd   :  { %v55_v48 = vadd.f32 %v54_v40, %v33_v39  ;;  %v109_v59 = vadd.f32 %v108_v53, %v87_v45 }
   0xe   :  { %v43_v51 = vadd.f32 %v42_v44, %v34_v43  ;;  %v97_v61 = vadd.f32 %v96_v56, %v88_v49 }
   0xf   :  { %v56_v54 = vadd.f32 %v55_v48, %v35_v47  ;;  %v110_v63 = vadd.f32 %v109_v59, %v89_v52 }
  0x10   :  { %v44_v57 = vrot.slane %v43_v51, 4  ;;  %v98_v1 = vadd.f32 %v97_v61, %v90_v55 }
  0x11   :  { %v57_v60 = vrot.slane %v56_v54, 4  ;;  %v111_v3 = vadd.f32 %v110_v63, %v91_v58 }
  0x12   :  { %v45_v62 = vadd.f32 %v44_v57, %v43_v51  ;;  %v99_v6 = vrot.slane %v98_v1, 4 }
  0x13   :  { %v58_v0 = vadd.f32 %v57_v60, %v56_v54  ;;  %v112_v8 = vrot.slane %v111_v3, 4 }
  0x14   :  { %v46_v2 = vrot.slane %v45_v62, 2  ;;  %v100_v10 = vadd.f32 %v99_v6, %v98_v1 }
  0x15   :  { %v59_v5 = vrot.slane %v58_v0, 2  ;;  %v113_v12 = vadd.f32 %v112_v8, %v111_v3 }
  0x16   :  { %v47_v7 = vadd.f32 %v46_v2, %v45_v62  ;;  %v101_v14 = vrot.slane %v100_v10, 2 }
  0x17   :  { %v60_v9 = vadd.f32 %v59_v5, %v58_v0  ;;  %v114_v15 = vrot.slane %v113_v12, 2 }
  0x18   :  { %v48_v11 = vrot.slane %v47_v7, 1  ;;  %v102_v18 = vadd.f32 %v101_v14, %v100_v10 }
  0x19   :  { %v61_v13 = vrot.slane %v60_v9, 1  ;;  %v115_v19 = vadd.f32 %v114_v15, %v113_v12 }
  0x1a   :  { %v49_v16 = vadd.f32 %v48_v11, %v47_v7  ;;  %v103_v22 = vrot.slane %v102_v18, 1 }
  0x1b   :  { %v62_v17 = vadd.f32 %v61_v13, %v60_v9  ;;  %v116_v23 = vrot.slane %v115_v19, 1 }
  0x1c   :  { %v104_v26 = vadd.f32 %v103_v22, %v102_v18 }
  0x1d   :  { %v65_v21 = vrot.slane %v62_v17, 7  ;;  %v117_v27 = vadd.f32 %v116_v23, %v115_v19 }
  0x1f   :  { %v67_v24 = vsel %vm66_vm1, %v49_v16, %v65_v21  ;;  %v120_v29 = vrot.slane %v117_v27, 7 }
  0x20   :  { %v69_v25 = vadd.f32 %v67_v24, %v36_v20 }
  0x21   :  { %v121_v30 = vsel %vm66_vm1, %v104_v26, %v120_v29 }
  0x22   :  { %74 = vst.msk [vmem:[%s229_s1] sm:$0x3] %vm159_vm0, %v69_v25  ;;  %v123_v31 = vadd.f32 %v121_v30, %v75_v28 }
  0x24   :  { %124 = vst.msk [vmem:[%s230_s2] sm:$0x3] %vm159_vm0, %v123_v31 }

// kernel: generator_forward.18
= control target key start
LH: loop header
LB: loop body
LE: loop exit
PB: predicated region body
PF: predicated region fallthrough
CT: control target
= control target key end

     0   :  { %s1620_s15 = smov 0   ;;  %s2247_s0 = inlined_call_operand.vmem [shape: f32[2048,8], index: 0, kind: input, shape index: {}]   ;;  %s2248_s1 = inlined_call_operand.vmem [shape: f32[1,8], index: 1, kind: input, shape index: {}]   ;;  %s2249_s2 = inlined_call_operand.vmem [shape: f32[1,8], index: 2, kind: input, shape index: {}]   ;;  %s2250_s3 = inlined_call_operand.vmem [shape: bf16[8,128], index: 3, kind: input, shape index: {}]   ;;  %s2251_s4 = inlined_call_operand.vmem [shape: f32[2048,128], index: 4, kind: output, shape index: {}]  }
   0x1 LB: > { %s1497_s16 = sadd.s32 4294967295, %s1593_s15   ;;  %p1501_p0 = scmp.ge.s32.totalorder %s1593_s15, 1  ;;  %s1593_s15 = sphi %s1620_s15, %s14_s15  }
   0x2   : > { %p163_p1 = scmp.lt.s32.totalorder %s1593_s15, 3 }
   0x4   : > { %p164_p2 = pnand %p1501_p0, %p163_p1 }
   0x5   : > { %s1502_s19 = sshll.u32 (!%p164_p2), %s1497_s16, 7 }
   0x6   : > { %167 = sbr.rel (%p164_p2) target bundleno = 407 (0x197), region = 36  ;;  %p190_p3 = scmp.lt.s32.totalorder (!%p164_p2), %s1502_s19, 255 }
   0xb   : > { %v786_v0 = vld [vmem:[%s2250_s3] sm:$0xf]  ;;  %vm980_vm0 = vcmask 1043456   ;;  %s2253_s19 = smov (!%p190_p3, %s1502_s19), 255  ;;  %vm787_vm1 = vcmask 64512  }
   0xc   : > { %v982_v1 = vsel %vm980_vm0, %v786_v0, 0  ;;  %v1636_v2 = vld [vmem:[%s2248_s1] ss:$0 sm:$0xff]  ;;  %s1503_s22 = sshll.u32 %s2253_s19, 3 }
   0xd   : > { %991 = vmatpush.bf16.msra.mxu0 %v982_v1  ;;  %1572 = vmatpush.bf16.msra.mxu1 %v982_v1  ;;  %s1644_s25 = scalar_lea.vmem %s2247_s0, %s1503_s22  ;;  %v1649_v3 = vld [vmem:[%s2249_s2] ss:$0 sm:$0xff]  ;;  %s1904_s30 = scalar_lea.vmem %s2251_s4, %s1503_s22 }
   0xe   : > { %1573 = vmatpush.bf16.msra.mxu2 %v982_v1  ;;  %1574 = vmatpush.bf16.msra.mxu3 %v982_v1  ;;  %v202_v4 = vld [vmem:[%s1644_s25] sm:$0xff]  ;;  %v203_v5 = vld [vmem:[%s1644_s25 + $0x8] sm:$0xff]  ;;  %v204_v30 = vld [vmem:[%s1644_s25 + $0x10] sm:$0xff] }
   0xf   : > { %v234_v6 = vld [vmem:[%s1644_s25 + $0x100] sm:$0xff]  ;;  %v334_v7 = vmul.f32 %v1636_v2, %v202_v4  ;;  %v335_v8 = vmul.f32 %v1636_v2, %v203_v5  ;;  %v235_v9 = vld [vmem:[%s1644_s25 + $0x108] sm:$0xff]  ;;  %v205_v35 = vld [vmem:[%s1644_s25 + $0x18] sm:$0xff]  ;;  %v336_v45 = vmul.f32 %v1636_v2, %v204_v30 }
  0x10   : > { %v366_v10 = vmul.f32 %v1636_v2, %v234_v6  ;;  %v266_v11 = vld [vmem:[%s1644_s25 + $0x200] sm:$0xff]  ;;  %v267_v12 = vld [vmem:[%s1644_s25 + $0x208] sm:$0xff]  ;;  %v367_v13 = vmul.f32 %v1636_v2, %v235_v9  ;;  %v236_v36 = vld [vmem:[%s1644_s25 + $0x110] sm:$0xff]  ;;  %v337_v46 = vmul.f32 %v1636_v2, %v205_v35 }
  0x11   : > { %v398_v14 = vmul.f32 %v1636_v2, %v266_v11  ;;  %v399_v15 = vmul.f32 %v1636_v2, %v267_v12  ;;  %v298_v16 = vld [vmem:[%s1644_s25 + $0x300] sm:$0xff]  ;;  %v299_v17 = vld [vmem:[%s1644_s25 + $0x308] sm:$0xff]  ;;  %v466_v18 = vadd.f32 %v1649_v3, %v334_v7  ;;  %v467_v19 = vadd.f32 %v1649_v3, %v335_v8  ;;  %v237_v37 = vld [vmem:[%s1644_s25 + $0x118] sm:$0xff] }
  0x12   : > { %v498_v20 = vadd.f32 %v1649_v3, %v366_v10  ;;  %v430_v21 = vmul.f32 %v1636_v2, %v298_v16  ;;  %v499_v22 = vadd.f32 %v1649_v3, %v367_v13  ;;  %v431_v25 = vmul.f32 %v1636_v2, %v299_v17  ;;  %v268_v40 = vld [vmem:[%s1644_s25 + $0x210] sm:$0xff]  ;;  %v269_v41 = vld [vmem:[%s1644_s25 + $0x218] sm:$0xff]  ;;  %v206_v13 = vld [vmem:[%s1644_s25 + $0x20] sm:$0xff] }
  0x13   : > { %v530_v23 = vadd.f32 %v1649_v3, %v398_v14  ;;  %v531_v24 = vadd.f32 %v1649_v3, %v399_v15  ;;  %v594_v26 = vmax.f32 %v466_v18, 0.0  ;;  %v595_v27 = vmax.f32 %v467_v19, 0.0  ;;  %v300_v49 = vld [vmem:[%s1644_s25 + $0x310] sm:$0xff]  ;;  %v301_v50 = vld [vmem:[%s1644_s25 + $0x318] sm:$0xff]  ;;  %v207_v14 = vld [vmem:[%s1644_s25 + $0x28] sm:$0xff] }
  0x14   : > { %v626_v28 = vmax.f32 %v498_v20, 0.0  ;;  %v562_v29 = vadd.f32 %v1649_v3, %v430_v21  ;;  %v627_v31 = vmax.f32 %v499_v22, 0.0  ;;  %v563_v34 = vadd.f32 %v1649_v3, %v431_v25  ;;  %v238_v15 = vld [vmem:[%s1644_s25 + $0x120] sm:$0xff]  ;;  %v239_v16 = vld [vmem:[%s1644_s25 + $0x128] sm:$0xff] }
  0x15   : > { %v658_v32 = vmax.f32 %v530_v23, 0.0  ;;  %v659_v33 = vmax.f32 %v531_v24, 0.0  ;;  %v722_v38 = vpack.c.bf16 %v595_v27, %v594_v26  ;;  %v368_v47 = vmul.f32 %v1636_v2, %v236_v36  ;;  %v270_v17 = vld [vmem:[%s1644_s25 + $0x220] sm:$0xff]  ;;  %v271_v18 = vld [vmem:[%s1644_s25 + $0x228] sm:$0xff] }
  0x16   : > { %v690_v39 = vmax.f32 %v562_v29, 0.0  ;;  %v738_v42 = vpack.c.bf16 %v627_v31, %v626_v28  ;;  %v691_v44 = vmax.f32 %v563_v34, 0.0  ;;  %v369_v48 = vmul.f32 %v1636_v2, %v237_v37  ;;  %v302_v23 = vld [vmem:[%s1644_s25 + $0x320] sm:$0xff]  ;;  %v303_v24 = vld [vmem:[%s1644_s25 + $0x328] sm:$0xff] }
  0x17   : > { %v754_v43 = vpack.c.bf16 %v659_v33, %v658_v32  ;;  %1506 = vmatmul.msk.bf16.vlgmr.msra.gmra.mxu0 %vm787_vm1, %v722_v38  ;;  %v400_v52 = vmul.f32 %v1636_v2, %v268_v40  ;;  %v401_v53 = vmul.f32 %v1636_v2, %v269_v41  ;;  %v432_v54 = vmul.f32 %v1636_v2, %v300_v49  ;;  %v208_v49 = vld [vmem:[%s1644_s25 + $0x30] sm:$0xff] }
  0x18   : > { %1522 = vmatmul.msk.bf16.vlgmr.msra.gmra.mxu1 %vm787_vm1, %v738_v42  ;;  %v770_v51 = vpack.c.bf16 %v691_v44, %v690_v39  ;;  %v433_v55 = vmul.f32 %v1636_v2, %v301_v50  ;;  %v468_v56 = vadd.f32 %v1649_v3, %v336_v45  ;;  %v469_v57 = vadd.f32 %v1649_v3, %v337_v46  ;;  %v209_v50 = vld [vmem:[%s1644_s25 + $0x38] sm:$0xff] }
  0x19   : > { %1538 = vmatmul.msk.bf16.vlgmr.msra.gmra.mxu2 %vm787_vm1, %v754_v43  ;;  %v500_v58 = vadd.f32 %v1649_v3, %v368_v47  ;;  %v501_v59 = vadd.f32 %v1649_v3, %v369_v48  ;;  %v532_v60 = vadd.f32 %v1649_v3, %v400_v52  ;;  %v533_v61 = vadd.f32 %v1649_v3, %v401_v53  ;;  %v241_v52 = vld [vmem:[%s1644_s25 + $0x138] sm:$0xff]  ;;  %v272_v53 = vld [vmem:[%s1644_s25 + $0x230] sm:$0xff] }
  0x1a   : > { %1554 = vmatmul.msk.bf16.vlgmr.msra.gmra.mxu3 %vm787_vm1, %v770_v51  ;;  %v564_v62 = vadd.f32 %v1649_v3, %v432_v54  ;;  %v565_v63 = vadd.f32 %v1649_v3, %v433_v55  ;;  %v596_v0 = vmax.f32 %v468_v56, 0.0  ;;  %v597_v1 = vmax.f32 %v469_v57, 0.0  ;;  %v240_v51 = vld [vmem:[%s1644_s25 + $0x130] sm:$0xff]  ;;  %v273_v54 = vld [vmem:[%s1644_s25 + $0x238] sm:$0xff] }
  0x1b   : > { %v628_v4 = vmax.f32 %v500_v58, 0.0  ;;  %v629_v5 = vmax.f32 %v501_v59, 0.0  ;;  %v660_v6 = vmax.f32 %v532_v60, 0.0  ;;  %v661_v7 = vmax.f32 %v533_v61, 0.0  ;;  %v304_v59 = vld [vmem:[%s1644_s25 + $0x330] sm:$0xff]  ;;  %v305_v60 = vld [vmem:[%s1644_s25 + $0x338] sm:$0xff] }
  0x1c   : > { %v692_v8 = vmax.f32 %v564_v62, 0.0  ;;  %v693_v9 = vmax.f32 %v565_v63, 0.0  ;;  %v723_v10 = vpack.c.bf16 %v597_v1, %v596_v0  ;;  %v338_v20 = vmul.f32 %v1636_v2, %v206_v13 }
  0x1d   : > { %v739_v11 = vpack.c.bf16 %v629_v5, %v628_v4  ;;  %v755_v12 = vpack.c.bf16 %v661_v7, %v660_v6  ;;  %v339_v21 = vmul.f32 %v1636_v2, %v207_v14  ;;  %v370_v22 = vmul.f32 %v1636_v2, %v238_v15 }
  0x1e   : > { %v771_v19 = vpack.c.bf16 %v693_v9, %v692_v8  ;;  %v371_v25 = vmul.f32 %v1636_v2, %v239_v16  ;;  %v402_v26 = vmul.f32 %v1636_v2, %v270_v17  ;;  %v403_v27 = vmul.f32 %v1636_v2, %v271_v18 }
  0x1f   : > { %v434_v28 = vmul.f32 %v1636_v2, %v302_v23  ;;  %v435_v29 = vmul.f32 %v1636_v2, %v303_v24  ;;  %v470_v30 = vadd.f32 %v1649_v3, %v338_v20  ;;  %v471_v31 = vadd.f32 %v1649_v3, %v339_v21  ;;  %v210_v23 = vld [vmem:[%s1644_s25 + $0x40] sm:$0xff]  ;;  %v211_v24 = vld [vmem:[%s1644_s25 + $0x48] sm:$0xff] }
  0x20   : > { %v502_v32 = vadd.f32 %v1649_v3, %v370_v22  ;;  %v503_v33 = vadd.f32 %v1649_v3, %v371_v25  ;;  %v534_v34 = vadd.f32 %v1649_v3, %v402_v26  ;;  %v535_v35 = vadd.f32 %v1649_v3, %v403_v27  ;;  %v242_v25 = vld [vmem:[%s1644_s25 + $0x140] sm:$0xff]  ;;  %v243_v26 = vld [vmem:[%s1644_s25 + $0x148] sm:$0xff] }
  0x21   : > { %v566_v36 = vadd.f32 %v1649_v3, %v434_v28  ;;  %v567_v37 = vadd.f32 %v1649_v3, %v435_v29  ;;  %v598_v38 = vmax.f32 %v470_v30, 0.0  ;;  %v599_v39 = vmax.f32 %v471_v31, 0.0  ;;  %v274_v27 = vld [vmem:[%s1644_s25 + $0x240] sm:$0xff]  ;;  %v275_v28 = vld [vmem:[%s1644_s25 + $0x248] sm:$0xff] }
  0x22   : > { %v630_v40 = vmax.f32 %v502_v32, 0.0  ;;  %v631_v41 = vmax.f32 %v503_v33, 0.0  ;;  %v662_v42 = vmax.f32 %v534_v34, 0.0  ;;  %v663_v43 = vmax.f32 %v535_v35, 0.0  ;;  %v306_v33 = vld [vmem:[%s1644_s25 + $0x340] sm:$0xff]  ;;  %v307_v34 = vld [vmem:[%s1644_s25 + $0x348] sm:$0xff] }
  0x23   : > { %v694_v44 = vmax.f32 %v566_v36, 0.0  ;;  %v695_v45 = vmax.f32 %v567_v37, 0.0  ;;  %v724_v46 = vpack.c.bf16 %v599_v39, %v598_v38  ;;  %v340_v56 = vmul.f32 %v1636_v2, %v208_v49 }
  0x24   : > { %v740_v47 = vpack.c.bf16 %v631_v41, %v630_v40  ;;  %v756_v48 = vpack.c.bf16 %v663_v43, %v662_v42  ;;  %v341_v57 = vmul.f32 %v1636_v2, %v209_v50  ;;  %v372_v58 = vmul.f32 %v1636_v2, %v240_v51 }
  0x25   : > { %v772_v55 = vpack.c.bf16 %v695_v45, %v694_v44  ;;  %v373_v61 = vmul.f32 %v1636_v2, %v241_v52  ;;  %v404_v62 = vmul.f32 %v1636_v2, %v272_v53  ;;  %v405_v63 = vmul.f32 %v1636_v2, %v273_v54 }
  0x26   : > { %v436_v0 = vmul.f32 %v1636_v2, %v304_v59  ;;  %v437_v1 = vmul.f32 %v1636_v2, %v305_v60  ;;  %v472_v4 = vadd.f32 %v1649_v3, %v340_v56  ;;  %v473_v5 = vadd.f32 %v1649_v3, %v341_v57  ;;  %v212_v59 = vld [vmem:[%s1644_s25 + $0x50] sm:$0xff]  ;;  %v213_v60 = vld [vmem:[%s1644_s25 + $0x58] sm:$0xff] }
  0x27   : > { %1507 = vmatmul.msk.bf16.gmra.mxu0 %vm787_vm1, %v723_v10  ;;  %v504_v6 = vadd.f32 %v1649_v3, %v372_v58  ;;  %v505_v7 = vadd.f32 %v1649_v3, %v373_v61  ;;  %v536_v8 = vadd.f32 %v1649_v3, %v404_v62  ;;  %v537_v9 = vadd.f32 %v1649_v3, %v405_v63  ;;  %v244_v61 = vld [vmem:[%s1644_s25 + $0x150] sm:$0xff]  ;;  %v245_v62 = vld [vmem:[%s1644_s25 + $0x158] sm:$0xff] }
  0x28   : > { %1523 = vmatmul.msk.bf16.gmra.mxu1 %vm787_vm1, %v739_v11  ;;  %v568_v10 = vadd.f32 %v1649_v3, %v436_v0  ;;  %v569_v11 = vadd.f32 %v1649_v3, %v437_v1  ;;  %v601_v13 = vmax.f32 %v473_v5, 0.0  ;;  %v342_v30 = vmul.f32 %v1636_v2, %v210_v23  ;;  %v276_v63 = vld [vmem:[%s1644_s25 + $0x250] sm:$0xff]  ;;  %v277_v0 = vld [vmem:[%s1644_s25 + $0x258] sm:$0xff] }
  0x29   : > { %1539 = vmatmul.msk.bf16.gmra.mxu2 %vm787_vm1, %v755_v12  ;;  %v600_v12 = vmax.f32 %v472_v4, 0.0  ;;  %v632_v14 = vmax.f32 %v504_v6, 0.0  ;;  %v633_v15 = vmax.f32 %v505_v7, 0.0  ;;  %v664_v16 = vmax.f32 %v536_v8, 0.0  ;;  %v308_v7 = vld [vmem:[%s1644_s25 + $0x350] sm:$0xff]  ;;  %v309_v8 = vld [vmem:[%s1644_s25 + $0x358] sm:$0xff] }
  0x2a   : > { %1555 = vmatmul.msk.bf16.gmra.mxu3 %vm787_vm1, %v771_v19  ;;  %v665_v17 = vmax.f32 %v537_v9, 0.0  ;;  %v696_v18 = vmax.f32 %v568_v10, 0.0  ;;  %v697_v19 = vmax.f32 %v569_v11, 0.0  ;;  %v343_v31 = vmul.f32 %v1636_v2, %v211_v24 }
  0x2b   : > { %v725_v20 = vpack.c.bf16 %v601_v13, %v600_v12  ;;  %v741_v21 = vpack.c.bf16 %v633_v15, %v632_v14  ;;  %v374_v32 = vmul.f32 %v1636_v2, %v242_v25  ;;  %v375_v35 = vmul.f32 %v1636_v2, %v243_v26 }
  0x2c   : > { %v757_v22 = vpack.c.bf16 %v665_v17, %v664_v16  ;;  %v773_v29 = vpack.c.bf16 %v697_v19, %v696_v18  ;;  %v406_v36 = vmul.f32 %v1636_v2, %v274_v27  ;;  %v407_v37 = vmul.f32 %v1636_v2, %v275_v28 }
  0x2d   : > { %v438_v38 = vmul.f32 %v1636_v2, %v306_v33  ;;  %v439_v39 = vmul.f32 %v1636_v2, %v307_v34  ;;  %v474_v40 = vadd.f32 %v1649_v3, %v342_v30  ;;  %v475_v41 = vadd.f32 %v1649_v3, %v343_v31  ;;  %v214_v33 = vld [vmem:[%s1644_s25 + $0x60] sm:$0xff]  ;;  %v215_v34 = vld [vmem:[%s1644_s25 + $0x68] sm:$0xff] }
  0x2e   : > { %v506_v42 = vadd.f32 %v1649_v3, %v374_v32  ;;  %v507_v43 = vadd.f32 %v1649_v3, %v375_v35  ;;  %v538_v44 = vadd.f32 %v1649_v3, %v406_v36  ;;  %v539_v45 = vadd.f32 %v1649_v3, %v407_v37  ;;  %v246_v35 = vld [vmem:[%s1644_s25 + $0x160] sm:$0xff]  ;;  %v247_v36 = vld [vmem:[%s1644_s25 + $0x168] sm:$0xff] }
  0x2f   : > { %v603_v49 = vmax.f32 %v475_v41, 0.0  ;;  %v344_v4 = vmul.f32 %v1636_v2, %v212_v59  ;;  %v345_v5 = vmul.f32 %v1636_v2, %v213_v60  ;;  %v376_v6 = vmul.f32 %v1636_v2, %v244_v61  ;;  %v278_v37 = vld [vmem:[%s1644_s25 + $0x260] sm:$0xff] }
  0x30   : > { %v634_v50 = vmax.f32 %v506_v42, 0.0  ;;  %v635_v51 = vmax.f32 %v507_v43, 0.0  ;;  %v666_v52 = vmax.f32 %v538_v44, 0.0  ;;  %v667_v53 = vmax.f32 %v539_v45, 0.0  ;;  %v310_v43 = vld [vmem:[%s1644_s25 + $0x360] sm:$0xff]  ;;  %v311_v44 = vld [vmem:[%s1644_s25 + $0x368] sm:$0xff] }
  0x31   : > { %v377_v9 = vmul.f32 %v1636_v2, %v245_v62  ;;  %v408_v10 = vmul.f32 %v1636_v2, %v276_v63  ;;  %v409_v11 = vmul.f32 %v1636_v2, %v277_v0  ;;  %v440_v12 = vmul.f32 %v1636_v2, %v308_v7  ;;  %v216_v7 = vld [vmem:[%s1644_s25 + $0x70] sm:$0xff] }
  0x32   : > { %v742_v57 = vpack.c.bf16 %v635_v51, %v634_v50  ;;  %v758_v58 = vpack.c.bf16 %v667_v53, %v666_v52  ;;  %v441_v13 = vmul.f32 %v1636_v2, %v309_v8  ;;  %v476_v14 = vadd.f32 %v1649_v3, %v344_v4  ;;  %v217_v8 = vld [vmem:[%s1644_s25 + $0x78] sm:$0xff] }
  0x33   : > { %v477_v15 = vadd.f32 %v1649_v3, %v345_v5  ;;  %v508_v16 = vadd.f32 %v1649_v3, %v376_v6  ;;  %v509_v17 = vadd.f32 %v1649_v3, %v377_v9  ;;  %v540_v18 = vadd.f32 %v1649_v3, %v408_v10  ;;  %v248_v9 = vld [vmem:[%s1644_s25 + $0x170] sm:$0xff]  ;;  %v249_v10 = vld [vmem:[%s1644_s25 + $0x178] sm:$0xff] }
  0x34   : > { %v541_v19 = vadd.f32 %v1649_v3, %v409_v11  ;;  %v347_v41 = vmul.f32 %v1636_v2, %v215_v34  ;;  %v378_v42 = vmul.f32 %v1636_v2, %v246_v35  ;;  %v379_v45 = vmul.f32 %v1636_v2, %v247_v36  ;;  %v280_v11 = vld [vmem:[%s1644_s25 + $0x270] sm:$0xff] }
  0x35   : > { %v605_v23 = vmax.f32 %v477_v15, 0.0  ;;  %v636_v24 = vmax.f32 %v508_v16, 0.0  ;;  %v637_v25 = vmax.f32 %v509_v17, 0.0  ;;  %v668_v26 = vmax.f32 %v540_v18, 0.0  ;;  %v312_v17 = vld [vmem:[%s1644_s25 + $0x370] sm:$0xff]  ;;  %v313_v18 = vld [vmem:[%s1644_s25 + $0x378] sm:$0xff] }
  0x36   : > { %v669_v27 = vmax.f32 %v541_v19, 0.0  ;;  %v479_v51 = vadd.f32 %v1649_v3, %v347_v41  ;;  %v510_v52 = vadd.f32 %v1649_v3, %v378_v42  ;;  %v511_v53 = vadd.f32 %v1649_v3, %v379_v45  ;;  %v250_v45 = vld [vmem:[%s1644_s25 + $0x180] sm:$0xff] }
  0x37   : > { %1508 = vmatmul.msk.bf16.gmra.mxu0 %vm787_vm1, %v724_v46  ;;  %v570_v46 = vadd.f32 %v1649_v3, %v438_v38  ;;  %v743_v31 = vpack.c.bf16 %v637_v25, %v636_v24  ;;  %v279_v38 = vld [vmem:[%s1644_s25 + $0x268] sm:$0xff]  ;;  %v349_v15 = vmul.f32 %v1636_v2, %v217_v8  ;;  %v380_v16 = vmul.f32 %v1636_v2, %v248_v9 }
  0x38   : > { %1524 = vmatmul.msk.bf16.gmra.mxu1 %vm787_vm1, %v740_v47  ;;  %v571_v47 = vadd.f32 %v1649_v3, %v439_v39  ;;  %v759_v32 = vpack.c.bf16 %v669_v27, %v668_v26  ;;  %v607_v59 = vmax.f32 %v479_v51, 0.0  ;;  %v638_v60 = vmax.f32 %v510_v52, 0.0 }
  0x39   : > { %1540 = vmatmul.msk.bf16.gmra.mxu2 %vm787_vm1, %v756_v48  ;;  %v602_v48 = vmax.f32 %v474_v40, 0.0  ;;  %v698_v54 = vmax.f32 %v570_v46, 0.0  ;;  %v346_v40 = vmul.f32 %v1636_v2, %v214_v33  ;;  %v410_v46 = vmul.f32 %v1636_v2, %v278_v37 }
  0x3a   : > { %1556 = vmatmul.msk.bf16.gmra.mxu3 %vm787_vm1, %v772_v55  ;;  %v699_v55 = vmax.f32 %v571_v47, 0.0  ;;  %v411_v47 = vmul.f32 %v1636_v2, %v279_v38  ;;  %v639_v61 = vmax.f32 %v511_v53, 0.0  ;;  %v381_v19 = vmul.f32 %v1636_v2, %v249_v10  ;;  %v314_v53 = vld [vmem:[%s1644_s25 + $0x380] sm:$0xff] }
  0x3b   : > { %v726_v56 = vpack.c.bf16 %v603_v49, %v602_v48  ;;  %v442_v48 = vmul.f32 %v1636_v2, %v310_v43  ;;  %v443_v49 = vmul.f32 %v1636_v2, %v311_v44  ;;  %v478_v50 = vadd.f32 %v1649_v3, %v346_v40  ;;  %v218_v43 = vld [vmem:[%s1644_s25 + $0x80] sm:$0xff]  ;;  %v219_v44 = vld [vmem:[%s1644_s25 + $0x88] sm:$0xff] }
  0x3c   : > { %v774_v1 = vpack.c.bf16 %v699_v55, %v698_v54  ;;  %v542_v54 = vadd.f32 %v1649_v3, %v410_v46  ;;  %v543_v55 = vadd.f32 %v1649_v3, %v411_v47  ;;  %v744_v5 = vpack.c.bf16 %v639_v61, %v638_v60  ;;  %v251_v46 = vld [vmem:[%s1644_s25 + $0x188] sm:$0xff]  ;;  %v282_v47 = vld [vmem:[%s1644_s25 + $0x280] sm:$0xff] }
  0x3d   : > { %v481_v25 = vadd.f32 %v1649_v3, %v349_v15  ;;  %v512_v26 = vadd.f32 %v1649_v3, %v380_v16  ;;  %v513_v27 = vadd.f32 %v1649_v3, %v381_v19  ;;  %v351_v51 = vmul.f32 %v1636_v2, %v219_v44  ;;  %v221_v19 = vld [vmem:[%s1644_s25 + $0x98] sm:$0xff] }
  0x3e   : > { %v670_v62 = vmax.f32 %v542_v54, 0.0  ;;  %v671_v63 = vmax.f32 %v543_v55, 0.0  ;;  %v382_v52 = vmul.f32 %v1636_v2, %v250_v45  ;;  %v315_v54 = vld [vmem:[%s1644_s25 + $0x388] sm:$0xff]  ;;  %v383_v55 = vmul.f32 %v1636_v2, %v251_v46 }
  0x3f   : > { %v609_v33 = vmax.f32 %v481_v25, 0.0  ;;  %v640_v34 = vmax.f32 %v512_v26, 0.0  ;;  %v641_v35 = vmax.f32 %v513_v27, 0.0  ;;  %v483_v61 = vadd.f32 %v1649_v3, %v351_v51 }
  0x40   : > { %v760_v6 = vpack.c.bf16 %v671_v63, %v670_v62  ;;  %v514_v62 = vadd.f32 %v1649_v3, %v382_v52  ;;  %v515_v63 = vadd.f32 %v1649_v3, %v383_v55  ;;  %v353_v27 = vmul.f32 %v1636_v2, %v221_v19 }
  0x41   : > { %v745_v41 = vpack.c.bf16 %v641_v35, %v640_v34 }
  0x42   : > { %v642_v8 = vmax.f32 %v514_v62, 0.0  ;;  %v643_v9 = vmax.f32 %v515_v63, 0.0  ;;  %v223_v62 = vld [vmem:[%s1644_s25 + $0xa8] sm:$0xff]  ;;  %v254_v63 = vld [vmem:[%s1644_s25 + $0x1a0] sm:$0xff] }
  0x44   : > { %v746_v16 = vpack.c.bf16 %v643_v9, %v642_v8  ;;  %v355_v9 = vmul.f32 %v1636_v2, %v223_v62 }
  0x47   : > { %1509 = vmatmul.msk.bf16.gmra.mxu0 %vm787_vm1, %v725_v20  ;;  %v572_v20 = vadd.f32 %v1649_v3, %v440_v12  ;;  %v281_v12 = vld [vmem:[%s1644_s25 + $0x278] sm:$0xff] }
  0x48   : > { %1525 = vmatmul.msk.bf16.gmra.mxu1 %vm787_vm1, %v741_v21  ;;  %v573_v21 = vadd.f32 %v1649_v3, %v441_v13 }
  0x49   : > { %1541 = vmatmul.msk.bf16.gmra.mxu2 %vm787_vm1, %v757_v22  ;;  %v604_v22 = vmax.f32 %v476_v14, 0.0  ;;  %v700_v28 = vmax.f32 %v572_v20, 0.0  ;;  %v348_v14 = vmul.f32 %v1636_v2, %v216_v7  ;;  %v412_v20 = vmul.f32 %v1636_v2, %v280_v11 }
  0x4a   : > { %1557 = vmatmul.msk.bf16.gmra.mxu3 %vm787_vm1, %v773_v29  ;;  %v701_v29 = vmax.f32 %v573_v21, 0.0  ;;  %v413_v21 = vmul.f32 %v1636_v2, %v281_v12  ;;  %v611_v7 = vmax.f32 %v483_v61, 0.0  ;;  %v222_v61 = vld [vmem:[%s1644_s25 + $0xa0] sm:$0xff] }
  0x4b   : > { %v727_v30 = vpack.c.bf16 %v605_v23, %v604_v22  ;;  %v444_v22 = vmul.f32 %v1636_v2, %v312_v17  ;;  %v445_v23 = vmul.f32 %v1636_v2, %v313_v18  ;;  %v480_v24 = vadd.f32 %v1649_v3, %v348_v14  ;;  %v220_v18 = vld [vmem:[%s1644_s25 + $0x90] sm:$0xff] }
  0x4c   : > { %v775_v39 = vpack.c.bf16 %v701_v29, %v700_v28  ;;  %v544_v28 = vadd.f32 %v1649_v3, %v412_v20  ;;  %v545_v29 = vadd.f32 %v1649_v3, %v413_v21  ;;  %v252_v20 = vld [vmem:[%s1644_s25 + $0x190] sm:$0xff]  ;;  %v352_v26 = vmul.f32 %v1636_v2, %v220_v18 }
  0x4d   : > { %v354_v8 = vmul.f32 %v1636_v2, %v222_v61 }
  0x4e   : > { %v672_v36 = vmax.f32 %v544_v28, 0.0  ;;  %v673_v37 = vmax.f32 %v545_v29, 0.0  ;;  %v384_v28 = vmul.f32 %v1636_v2, %v252_v20  ;;  %v316_v29 = vld [vmem:[%s1644_s25 + $0x390] sm:$0xff]  ;;  %v487_v20 = vadd.f32 %v1649_v3, %v355_v9 }
  0x4f   : > { %v448_v34 = vmul.f32 %v1636_v2, %v316_v29  ;;  %v486_v19 = vadd.f32 %v1649_v3, %v354_v8 }
  0x50   : > { %v761_v42 = vpack.c.bf16 %v673_v37, %v672_v36  ;;  %v484_v37 = vadd.f32 %v1649_v3, %v352_v26 }
  0x51   : > { %v580_v46 = vadd.f32 %v1649_v3, %v448_v34 }
  0x57   : > { %1510 = vmatmul.msk.bf16.gmra.mxu0 %vm787_vm1, %v726_v56  ;;  %v574_v56 = vadd.f32 %v1649_v3, %v442_v48  ;;  %v283_v48 = vld [vmem:[%s1644_s25 + $0x288] sm:$0xff] }
  0x58   : > { %1526 = vmatmul.msk.bf16.gmra.mxu1 %vm787_vm1, %v742_v57  ;;  %v575_v57 = vadd.f32 %v1649_v3, %v443_v49 }
  0x59   : > { %1542 = vmatmul.msk.bf16.gmra.mxu2 %vm787_vm1, %v758_v58  ;;  %v606_v58 = vmax.f32 %v478_v50, 0.0  ;;  %v702_v0 = vmax.f32 %v574_v56, 0.0  ;;  %v350_v50 = vmul.f32 %v1636_v2, %v218_v43  ;;  %v414_v56 = vmul.f32 %v1636_v2, %v282_v47 }
  0x5a   : > { %1558 = vmatmul.msk.bf16.gmra.mxu3 %vm787_vm1, %v774_v1  ;;  %v703_v1 = vmax.f32 %v575_v57, 0.0  ;;  %v415_v57 = vmul.f32 %v1636_v2, %v283_v48  ;;  %v612_v48 = vmax.f32 %v484_v37, 0.0 }
  0x5b   : > { %v728_v4 = vpack.c.bf16 %v607_v59, %v606_v58  ;;  %v446_v58 = vmul.f32 %v1636_v2, %v314_v53  ;;  %v447_v59 = vmul.f32 %v1636_v2, %v315_v54  ;;  %v482_v60 = vadd.f32 %v1649_v3, %v350_v50 }
  0x5c   : > { %v776_v13 = vpack.c.bf16 %v703_v1, %v702_v0  ;;  %v546_v0 = vadd.f32 %v1649_v3, %v414_v56  ;;  %v547_v1 = vadd.f32 %v1649_v3, %v415_v57  ;;  %v708_v54 = vmax.f32 %v580_v46, 0.0 }
  0x5e   : > { %v674_v10 = vmax.f32 %v546_v0, 0.0  ;;  %v675_v11 = vmax.f32 %v547_v1, 0.0 }
  0x60   : > { %v762_v17 = vpack.c.bf16 %v675_v11, %v674_v10  ;;  %v386_v10 = vmul.f32 %v1636_v2, %v254_v63  ;;  %v318_v11 = vld [vmem:[%s1644_s25 + $0x3a0] sm:$0xff] }
  0x67   : > { %1511 = vmatmul.msk.bf16.gmra.mxu0 %vm787_vm1, %v727_v30  ;;  %v576_v30 = vadd.f32 %v1649_v3, %v444_v22  ;;  %v253_v22 = vld [vmem:[%s1644_s25 + $0x198] sm:$0xff] }
  0x68   : > { %1527 = vmatmul.msk.bf16.gmra.mxu1 %vm787_vm1, %v743_v31  ;;  %v577_v31 = vadd.f32 %v1649_v3, %v445_v23  ;;  %v284_v23 = vld [vmem:[%s1644_s25 + $0x290] sm:$0xff] }
  0x69   : > { %1543 = vmatmul.msk.bf16.gmra.mxu2 %vm787_vm1, %v759_v32  ;;  %v608_v32 = vmax.f32 %v480_v24, 0.0  ;;  %v704_v38 = vmax.f32 %v576_v30, 0.0  ;;  %v285_v24 = vld [vmem:[%s1644_s25 + $0x298] sm:$0xff] }
  0x6a   : > { %1559 = vmatmul.msk.bf16.gmra.mxu3 %vm787_vm1, %v775_v39  ;;  %v705_v39 = vmax.f32 %v577_v31, 0.0  ;;  %v317_v30 = vld [vmem:[%s1644_s25 + $0x398] sm:$0xff]  ;;  %v385_v31 = vmul.f32 %v1636_v2, %v253_v22  ;;  %v518_v22 = vadd.f32 %v1649_v3, %v386_v10 }
  0x6b   : > { %v729_v40 = vpack.c.bf16 %v609_v33, %v608_v32  ;;  %v416_v32 = vmul.f32 %v1636_v2, %v284_v23  ;;  %v417_v33 = vmul.f32 %v1636_v2, %v285_v24  ;;  %v449_v35 = vmul.f32 %v1636_v2, %v317_v30 }
  0x6c   : > { %v777_v49 = vpack.c.bf16 %v705_v39, %v704_v38  ;;  %v485_v38 = vadd.f32 %v1649_v3, %v353_v27  ;;  %v614_v30 = vmax.f32 %v486_v19, 0.0 }
  0x6d   : > { %v549_v43 = vadd.f32 %v1649_v3, %v417_v33  ;;  %v581_v47 = vadd.f32 %v1649_v3, %v449_v35 }
  0x6f   : > { %v677_v53 = vmax.f32 %v549_v43, 0.0  ;;  %v709_v55 = vmax.f32 %v581_v47, 0.0  ;;  %v224_v43 = vld [vmem:[%s1644_s25 + $0xb0] sm:$0xff] }
  0x77   : > { %1512 = vmatmul.msk.bf16.gmra.mxu0 %vm787_vm1, %v728_v4  ;;  %v578_v4 = vadd.f32 %v1649_v3, %v446_v58 }
  0x78   : > { %1528 = vmatmul.msk.bf16.gmra.mxu1 %vm787_vm1, %v744_v5  ;;  %v579_v5 = vadd.f32 %v1649_v3, %v447_v59 }
  0x79   : > { %1544 = vmatmul.msk.bf16.gmra.mxu2 %vm787_vm1, %v760_v6  ;;  %v610_v6 = vmax.f32 %v482_v60, 0.0  ;;  %v706_v12 = vmax.f32 %v578_v4, 0.0  ;;  %v255_v4 = vld [vmem:[%s1644_s25 + $0x1a8] sm:$0xff] }
  0x7a   : > { %1560 = vmatmul.msk.bf16.gmra.mxu3 %vm787_vm1, %v776_v13  ;;  %v707_v13 = vmax.f32 %v579_v5, 0.0  ;;  %v286_v5 = vld [vmem:[%s1644_s25 + $0x2a0] sm:$0xff] }
  0x7b   : > { %v730_v14 = vpack.c.bf16 %v611_v7, %v610_v6  ;;  %v287_v6 = vld [vmem:[%s1644_s25 + $0x2a8] sm:$0xff]  ;;  %v779_v7 = vpack.c.bf16 %v709_v55, %v708_v54  ;;  %v320_v55 = vld [vmem:[%s1644_s25 + $0x3b0] sm:$0xff] }
  0x7c   : > { %v778_v25 = vpack.c.bf16 %v707_v13, %v706_v12  ;;  %v319_v12 = vld [vmem:[%s1644_s25 + $0x3a8] sm:$0xff]  ;;  %v387_v13 = vmul.f32 %v1636_v2, %v255_v4 }
  0x7e   : > { %v519_v23 = vadd.f32 %v1649_v3, %v387_v13 }
  0x80   : > { %v647_v33 = vmax.f32 %v519_v23, 0.0  ;;  %v226_v23 = vld [vmem:[%s1644_s25 + $0xc0] sm:$0xff] }
  0x87   : > { %1513 = vmatmul.msk.bf16.gmra.mxu0 %vm787_vm1, %v729_v40  ;;  %v516_v40 = vadd.f32 %v1649_v3, %v384_v28 }
  0x88   : > { %1529 = vmatmul.msk.bf16.gmra.mxu1 %vm787_vm1, %v745_v41  ;;  %v517_v41 = vadd.f32 %v1649_v3, %v385_v31  ;;  %v615_v31 = vmax.f32 %v487_v20, 0.0 }
  0x89   : > { %1545 = vmatmul.msk.bf16.gmra.mxu2 %vm787_vm1, %v761_v42  ;;  %v548_v42 = vadd.f32 %v1649_v3, %v416_v32  ;;  %v644_v50 = vmax.f32 %v516_v40, 0.0  ;;  %v646_v32 = vmax.f32 %v518_v22, 0.0 }
  0x8a   : > { %1561 = vmatmul.msk.bf16.gmra.mxu3 %vm787_vm1, %v777_v49  ;;  %v613_v49 = vmax.f32 %v485_v38, 0.0  ;;  %v645_v51 = vmax.f32 %v517_v41, 0.0 }
  0x8b   : > { %v676_v52 = vmax.f32 %v548_v42, 0.0  ;;  %v748_v41 = vpack.c.bf16 %v647_v33, %v646_v32  ;;  %v2026_v32 = vld [vmem:[%s2248_s1] ss:$0 sm:$0xff] }
  0x8c   : > { %v731_v57 = vpack.c.bf16 %v613_v49, %v612_v48  ;;  %v747_v59 = vpack.c.bf16 %v645_v51, %v644_v50  ;;  %v257_v48 = vld [vmem:[%s1644_s25 + $0x1b8] sm:$0xff]  ;;  %v288_v49 = vld [vmem:[%s1644_s25 + $0x2b0] sm:$0xff]  ;;  %v358_v33 = vmul.f32 %v2026_v32, %v226_v23 }
  0x8d   : > { %v763_v60 = vpack.c.bf16 %v677_v53, %v676_v52  ;;  %v289_v50 = vld [vmem:[%s1644_s25 + $0x2b8] sm:$0xff]  ;;  %v356_v52 = vmul.f32 %v1636_v2, %v224_v43 }
  0x8f   : > { %v488_v63 = vadd.f32 %v1649_v3, %v356_v52 }
  0x94   : > { %v993_v15 = vpop.f32.mrf.mxu0 }
  0x95   : > { %1313 = vst [vmem:[%s1904_s30] sm:$0xff] %v993_v15  ;;  %v1073_v21 = vpop.f32.mrf.mxu1  ;;  %v419_v15 = vmul.f32 %v1636_v2, %v287_v6 }
  0x96   : > { %1345 = vst [vmem:[%s1904_s30 + $0x100] sm:$0xff] %v1073_v21 }
  0x97   : > { %1514 = vmatmul.msk.bf16.gmra.mxu0 %vm787_vm1, %v730_v14  ;;  %v418_v14 = vmul.f32 %v1636_v2, %v286_v5 }
  0x98   : > { %1530 = vmatmul.msk.bf16.gmra.mxu1 %vm787_vm1, %v746_v16  ;;  %v450_v16 = vmul.f32 %v1636_v2, %v318_v11  ;;  %v616_v11 = vmax.f32 %v488_v63, 0.0 }
  0x99   : > { %1546 = vmatmul.msk.bf16.gmra.mxu2 %vm787_vm1, %v762_v17  ;;  %v451_v17 = vmul.f32 %v1636_v2, %v319_v12  ;;  %v550_v24 = vadd.f32 %v1649_v3, %v418_v14 }
  0x9a   : > { %1562 = vmatmul.msk.bf16.gmra.mxu3 %vm787_vm1, %v778_v25  ;;  %v551_v25 = vadd.f32 %v1649_v3, %v419_v15  ;;  %v582_v28 = vadd.f32 %v1649_v3, %v450_v16 }
  0x9b   : > { %v583_v29 = vadd.f32 %v1649_v3, %v451_v17  ;;  %v678_v34 = vmax.f32 %v550_v24, 0.0  ;;  %v227_v24 = vld [vmem:[%s1644_s25 + $0xc8] sm:$0xff] }
  0x9c   : > { %v1153_v36 = vpop.f32.mrf.mxu2  ;;  %v995_v39 = vpop.f32.mrf.mxu0  ;;  %v679_v35 = vmax.f32 %v551_v25, 0.0  ;;  %v258_v25 = vld [vmem:[%s1644_s25 + $0x1c0] sm:$0xff] }
  0x9d   : > { %1377 = vst [vmem:[%s1904_s30 + $0x200] sm:$0xff] %v1153_v36  ;;  %v1233_v44 = vpop.f32.mrf.mxu3  ;;  %v1075_v45 = vpop.f32.mrf.mxu1  ;;  %v710_v36 = vmax.f32 %v582_v28, 0.0  ;;  %v711_v37 = vmax.f32 %v583_v29, 0.0  ;;  %v259_v28 = vld [vmem:[%s1644_s25 + $0x1c8] sm:$0xff]  ;;  %v290_v29 = vld [vmem:[%s1644_s25 + $0x2c0] sm:$0xff] }
  0x9e   : > { %1314 = vst [vmem:[%s1904_s30 + $0x8] sm:$0xff] %v995_v39  ;;  %v732_v39 = vpack.c.bf16 %v615_v31, %v614_v30  ;;  %v764_v42 = vpack.c.bf16 %v679_v35, %v678_v34  ;;  %v291_v30 = vld [vmem:[%s1644_s25 + $0x2c8] sm:$0xff]  ;;  %v359_v34 = vmul.f32 %v2026_v32, %v227_v24  ;;  %v390_v35 = vmul.f32 %v2026_v32, %v258_v25 }
  0x9f   : > { %1409 = vst [vmem:[%s1904_s30 + $0x300] sm:$0xff] %v1233_v44  ;;  %v225_v44 = vld [vmem:[%s1644_s25 + $0xb8] sm:$0xff]  ;;  %v780_v51 = vpack.c.bf16 %v711_v37, %v710_v36  ;;  %v322_v36 = vld [vmem:[%s1644_s25 + $0x3c0] sm:$0xff]  ;;  %v323_v37 = vld [vmem:[%s1644_s25 + $0x3c8] sm:$0xff] }
  0xa0   : > { %1346 = vst [vmem:[%s1904_s30 + $0x108] sm:$0xff] %v1075_v45  ;;  %v256_v45 = vld [vmem:[%s1644_s25 + $0x1b0] sm:$0xff]  ;;  %v357_v53 = vmul.f32 %v1636_v2, %v225_v44  ;;  %v2044_v44 = vld [vmem:[%s2249_s2] ss:$0 sm:$0xff] }
  0xa1   : > { %v388_v54 = vmul.f32 %v1636_v2, %v256_v45  ;;  %v490_v45 = vadd.f32 %v2044_v44, %v358_v33 }
  0xa3   : > { %v520_v4 = vadd.f32 %v1649_v3, %v388_v54 }
  0xa4   : > { %v1155_v56 = vpop.f32.mrf.mxu2  ;;  %v998_v58 = vpop.f32.mrf.mxu0 }
  0xa5   : > { %1378 = vst [vmem:[%s1904_s30 + $0x208] sm:$0xff] %v1155_v56  ;;  %v1235_v0 = vpop.f32.mrf.mxu3  ;;  %v1078_v1 = vpop.f32.mrf.mxu1  ;;  %v321_v56 = vld [vmem:[%s1644_s25 + $0x3b8] sm:$0xff]  ;;  %v648_v13 = vmax.f32 %v520_v4, 0.0 }
  0xa6   : > { %1315 = vst [vmem:[%s1904_s30 + $0x10] sm:$0xff] %v998_v58  ;;  %v420_v58 = vmul.f32 %v1636_v2, %v288_v49  ;;  %v453_v61 = vmul.f32 %v1636_v2, %v321_v56  ;;  %v618_v56 = vmax.f32 %v490_v45, 0.0 }
  0xa7   : > { %1410 = vst [vmem:[%s1904_s30 + $0x308] sm:$0xff] %v1235_v0  ;;  %1515 = vmatmul.msk.bf16.gmra.mxu0 %vm787_vm1, %v731_v57  ;;  %v389_v57 = vmul.f32 %v1636_v2, %v257_v48  ;;  %v489_v0 = vadd.f32 %v1649_v3, %v357_v53  ;;  %v522_v48 = vadd.f32 %v2044_v44, %v390_v35 }
  0xa8   : > { %1347 = vst [vmem:[%s1904_s30 + $0x110] sm:$0xff] %v1078_v1  ;;  %1531 = vmatmul.msk.bf16.gmra.mxu1 %vm787_vm1, %v747_v59  ;;  %v421_v59 = vmul.f32 %v1636_v2, %v289_v50  ;;  %v552_v6 = vadd.f32 %v1649_v3, %v420_v58  ;;  %v585_v10 = vadd.f32 %v1649_v3, %v453_v61 }
  0xa9   : > { %1547 = vmatmul.msk.bf16.gmra.mxu2 %vm787_vm1, %v763_v60  ;;  %v452_v60 = vmul.f32 %v1636_v2, %v320_v55  ;;  %v521_v5 = vadd.f32 %v1649_v3, %v389_v57  ;;  %v617_v12 = vmax.f32 %v489_v0, 0.0  ;;  %v650_v58 = vmax.f32 %v522_v48, 0.0 }
  0xaa   : > { %1563 = vmatmul.msk.bf16.gmra.mxu3 %vm787_vm1, %v779_v7  ;;  %v553_v7 = vadd.f32 %v1649_v3, %v421_v59  ;;  %v680_v15 = vmax.f32 %v552_v6, 0.0 }
  0xab   : > { %v584_v9 = vadd.f32 %v1649_v3, %v452_v60  ;;  %v649_v14 = vmax.f32 %v521_v5, 0.0  ;;  %v733_v20 = vpack.c.bf16 %v617_v12, %v616_v11  ;;  %v261_v11 = vld [vmem:[%s1644_s25 + $0x1d8] sm:$0xff]  ;;  %v292_v12 = vld [vmem:[%s1644_s25 + $0x2d0] sm:$0xff] }
  0xac   : > { %v1158_v18 = vpop.f32.mrf.mxu2  ;;  %v1000_v21 = vpop.f32.mrf.mxu0  ;;  %v681_v16 = vmax.f32 %v553_v7, 0.0  ;;  %v228_v7 = vld [vmem:[%s1644_s25 + $0xd0] sm:$0xff] }
  0xad   : > { %1379 = vst [vmem:[%s1904_s30 + $0x210] sm:$0xff] %v1158_v18  ;;  %v1238_v26 = vpop.f32.mrf.mxu3  ;;  %v1080_v27 = vpop.f32.mrf.mxu1  ;;  %v712_v17 = vmax.f32 %v584_v9, 0.0  ;;  %v713_v18 = vmax.f32 %v585_v10, 0.0 }
  0xae   : > { %1316 = vst [vmem:[%s1904_s30 + $0x18] sm:$0xff] %v1000_v21  ;;  %v749_v21 = vpack.c.bf16 %v649_v14, %v648_v13  ;;  %v765_v22 = vpack.c.bf16 %v681_v16, %v680_v15  ;;  %v293_v13 = vld [vmem:[%s1644_s25 + $0x2d8] sm:$0xff]  ;;  %v360_v15 = vmul.f32 %v2026_v32, %v228_v7 }
  0xaf   : > { %1411 = vst [vmem:[%s1904_s30 + $0x310] sm:$0xff] %v1238_v26  ;;  %v781_v31 = vpack.c.bf16 %v713_v18, %v712_v17  ;;  %v324_v18 = vld [vmem:[%s1644_s25 + $0x3d0] sm:$0xff] }
  0xb0   : > { %1348 = vst [vmem:[%s1904_s30 + $0x118] sm:$0xff] %v1080_v27  ;;  %v492_v25 = vadd.f32 %v2044_v44, %v360_v15 }
  0xb4   : > { %v1160_v38 = vpop.f32.mrf.mxu2  ;;  %v1003_v40 = vpop.f32.mrf.mxu0 }
  0xb5   : > { %1380 = vst [vmem:[%s1904_s30 + $0x218] sm:$0xff] %v1160_v38  ;;  %v1240_v46 = vpop.f32.mrf.mxu3  ;;  %v1083_v47 = vpop.f32.mrf.mxu1  ;;  %v391_v38 = vmul.f32 %v2026_v32, %v259_v28 }
  0xb6   : > { %1317 = vst [vmem:[%s1904_s30 + $0x20] sm:$0xff] %v1003_v40  ;;  %v423_v40 = vmul.f32 %v2026_v32, %v291_v30 }
  0xb7   : > { %1412 = vst [vmem:[%s1904_s30 + $0x318] sm:$0xff] %v1240_v46  ;;  %1516 = vmatmul.msk.bf16.gmra.mxu0 %vm787_vm1, %v732_v39  ;;  %v422_v39 = vmul.f32 %v2026_v32, %v290_v29  ;;  %v491_v46 = vadd.f32 %v2044_v44, %v359_v34  ;;  %v523_v49 = vadd.f32 %v2044_v44, %v391_v38 }
  0xb8   : > { %1349 = vst [vmem:[%s1904_s30 + $0x120] sm:$0xff] %v1083_v47  ;;  %1532 = vmatmul.msk.bf16.gmra.mxu1 %vm787_vm1, %v748_v41  ;;  %v454_v41 = vmul.f32 %v2026_v32, %v322_v36 }
  0xb9   : > { %1548 = vmatmul.msk.bf16.gmra.mxu2 %vm787_vm1, %v764_v42  ;;  %v455_v42 = vmul.f32 %v2026_v32, %v323_v37  ;;  %v554_v50 = vadd.f32 %v2044_v44, %v422_v39  ;;  %v619_v57 = vmax.f32 %v491_v46, 0.0  ;;  %v651_v59 = vmax.f32 %v523_v49, 0.0 }
  0xba   : > { %1564 = vmatmul.msk.bf16.gmra.mxu3 %vm787_vm1, %v780_v51  ;;  %v555_v51 = vadd.f32 %v2044_v44, %v423_v40  ;;  %v586_v54 = vadd.f32 %v2044_v44, %v454_v41  ;;  %v620_v37 = vmax.f32 %v492_v25, 0.0 }
  0xbb   : > { %v587_v55 = vadd.f32 %v2044_v44, %v455_v42  ;;  %v682_v60 = vmax.f32 %v554_v50, 0.0  ;;  %v750_v5 = vpack.c.bf16 %v651_v59, %v650_v58  ;;  %v295_v58 = vld [vmem:[%s1644_s25 + $0x2e8] sm:$0xff] }
  0xbc   : > { %v1163_v62 = vpop.f32.mrf.mxu2  ;;  %v1005_v1 = vpop.f32.mrf.mxu0  ;;  %v683_v61 = vmax.f32 %v555_v51, 0.0  ;;  %v230_v51 = vld [vmem:[%s1644_s25 + $0xe0] sm:$0xff] }
  0xbd   : > { %1381 = vst [vmem:[%s1904_s30 + $0x220] sm:$0xff] %v1163_v62  ;;  %v1243_v8 = vpop.f32.mrf.mxu3  ;;  %v1085_v2 = vpop.f32.mrf.mxu1  ;;  %v714_v62 = vmax.f32 %v586_v54, 0.0  ;;  %v715_v63 = vmax.f32 %v587_v55, 0.0 }
  0xbe   : > { %1318 = vst [vmem:[%s1904_s30 + $0x28] sm:$0xff] %v1005_v1  ;;  %v734_v1 = vpack.c.bf16 %v619_v57, %v618_v56  ;;  %v766_v6 = vpack.c.bf16 %v683_v61, %v682_v60  ;;  %v263_v56 = vld [vmem:[%s1644_s25 + $0x1e8] sm:$0xff]  ;;  %v294_v57 = vld [vmem:[%s1644_s25 + $0x2e0] sm:$0xff]  ;;  %v362_v60 = vmul.f32 %v2026_v32, %v230_v51 }
  0xbf   : > { %1413 = vst [vmem:[%s1904_s30 + $0x320] sm:$0xff] %v1243_v8  ;;  %v229_v8 = vld [vmem:[%s1644_s25 + $0xd8] sm:$0xff]  ;;  %v782_v14 = vpack.c.bf16 %v715_v63, %v714_v62  ;;  %v326_v63 = vld [vmem:[%s1644_s25 + $0x3e0] sm:$0xff] }
  0xc0   : > { %1350 = vst [vmem:[%s1904_s30 + $0x128] sm:$0xff] %v1085_v2  ;;  %v260_v2 = vld [vmem:[%s1644_s25 + $0x1d0] sm:$0xff]  ;;  %v361_v16 = vmul.f32 %v2026_v32, %v229_v8 }
  0xc1   : > { %v392_v17 = vmul.f32 %v2026_v32, %v260_v2  ;;  %v494_v2 = vadd.f32 %v2044_v44, %v362_v60 }
  0xc3   : > { %v524_v28 = vadd.f32 %v2044_v44, %v392_v17 }
  0xc4   : > { %v1165_v19 = vpop.f32.mrf.mxu2  ;;  %v1008_v3 = vpop.f32.mrf.mxu0 }
  0xc5   : > { %1382 = vst [vmem:[%s1904_s30 + $0x228] sm:$0xff] %v1165_v19  ;;  %v1245_v26 = vpop.f32.mrf.mxu3  ;;  %v1088_v27 = vpop.f32.mrf.mxu1  ;;  %v325_v19 = vld [vmem:[%s1644_s25 + $0x3d8] sm:$0xff]  ;;  %v652_v39 = vmax.f32 %v524_v28, 0.0 }
  0xc6   : > { %1319 = vst [vmem:[%s1904_s30 + $0x30] sm:$0xff] %v1008_v3  ;;  %v424_v3 = vmul.f32 %v2026_v32, %v292_v12  ;;  %v457_v23 = vmul.f32 %v2026_v32, %v325_v19  ;;  %v622_v19 = vmax.f32 %v494_v2, 0.0 }
  0xc7   : > { %1414 = vst [vmem:[%s1904_s30 + $0x328] sm:$0xff] %v1245_v26  ;;  %1517 = vmatmul.msk.bf16.gmra.mxu0 %vm787_vm1, %v733_v20  ;;  %v393_v20 = vmul.f32 %v2026_v32, %v261_v11  ;;  %v493_v26 = vadd.f32 %v2044_v44, %v361_v16 }
  0xc8   : > { %1351 = vst [vmem:[%s1904_s30 + $0x130] sm:$0xff] %v1088_v27  ;;  %1533 = vmatmul.msk.bf16.gmra.mxu1 %vm787_vm1, %v749_v21  ;;  %v425_v21 = vmul.f32 %v2026_v32, %v293_v13  ;;  %v556_v30 = vadd.f32 %v2044_v44, %v424_v3  ;;  %v589_v36 = vadd.f32 %v2044_v44, %v457_v23 }
  0xc9   : > { %1549 = vmatmul.msk.bf16.gmra.mxu2 %vm787_vm1, %v765_v22  ;;  %v456_v22 = vmul.f32 %v2026_v32, %v324_v18  ;;  %v525_v29 = vadd.f32 %v2044_v44, %v393_v20  ;;  %v621_v38 = vmax.f32 %v493_v26, 0.0 }
  0xca   : > { %1565 = vmatmul.msk.bf16.gmra.mxu3 %vm787_vm1, %v781_v31  ;;  %v557_v31 = vadd.f32 %v2044_v44, %v425_v21  ;;  %v684_v41 = vmax.f32 %v556_v30, 0.0  ;;  %v717_v45 = vmax.f32 %v589_v36, 0.0 }
  0xcb   : > { %v588_v35 = vadd.f32 %v2044_v44, %v456_v22  ;;  %v653_v40 = vmax.f32 %v525_v29, 0.0 }
  0xcc   : > { %v1168_v43 = vpop.f32.mrf.mxu2  ;;  %v1010_v47 = vpop.f32.mrf.mxu0  ;;  %v685_v42 = vmax.f32 %v557_v31, 0.0  ;;  %v232_v31 = vld [vmem:[%s1644_s25 + $0xf0] sm:$0xff] }
  0xcd   : > { %1383 = vst [vmem:[%s1904_s30 + $0x230] sm:$0xff] %v1168_v43  ;;  %v1248_v52 = vpop.f32.mrf.mxu3  ;;  %v1090_v53 = vpop.f32.mrf.mxu1  ;;  %v716_v43 = vmax.f32 %v588_v35, 0.0  ;;  %v751_v49 = vpack.c.bf16 %v653_v40, %v652_v39  ;;  %v297_v39 = vld [vmem:[%s1644_s25 + $0x2f8] sm:$0xff] }
  0xce   : > { %1320 = vst [vmem:[%s1904_s30 + $0x38] sm:$0xff] %v1010_v47  ;;  %v735_v47 = vpack.c.bf16 %v621_v38, %v620_v37  ;;  %v767_v50 = vpack.c.bf16 %v685_v42, %v684_v41  ;;  %v265_v37 = vld [vmem:[%s1644_s25 + $0x1f8] sm:$0xff]  ;;  %v296_v38 = vld [vmem:[%s1644_s25 + $0x2f0] sm:$0xff]  ;;  %v364_v41 = vmul.f32 %v2026_v32, %v232_v31 }
  0xcf   : > { %1415 = vst [vmem:[%s1904_s30 + $0x330] sm:$0xff] %v1248_v52  ;;  %v231_v52 = vld [vmem:[%s1644_s25 + $0xe8] sm:$0xff]  ;;  %v783_v59 = vpack.c.bf16 %v717_v45, %v716_v43  ;;  %v328_v45 = vld [vmem:[%s1644_s25 + $0x3f0] sm:$0xff] }
  0xd0   : > { %1352 = vst [vmem:[%s1904_s30 + $0x138] sm:$0xff] %v1090_v53  ;;  %v262_v53 = vld [vmem:[%s1644_s25 + $0x1e0] sm:$0xff]  ;;  %v363_v61 = vmul.f32 %v2026_v32, %v231_v52 }
  0xd1   : > { %v394_v62 = vmul.f32 %v2026_v32, %v262_v53  ;;  %v496_v53 = vadd.f32 %v2044_v44, %v364_v41 }
  0xd3   : > { %v526_v11 = vadd.f32 %v2044_v44, %v394_v62 }
  0xd4   : > { %v1170_v0 = vpop.f32.mrf.mxu2  ;;  %v1013_v4 = vpop.f32.mrf.mxu0 }
  0xd5   : > { %1384 = vst [vmem:[%s1904_s30 + $0x238] sm:$0xff] %v1170_v0  ;;  %v1250_v9 = vpop.f32.mrf.mxu3  ;;  %v1093_v10 = vpop.f32.mrf.mxu1  ;;  %v327_v0 = vld [vmem:[%s1644_s25 + $0x3e8] sm:$0xff]  ;;  %v654_v3 = vmax.f32 %v526_v11, 0.0 }
  0xd6   : > { %1321 = vst [vmem:[%s1904_s30 + $0x40] sm:$0xff] %v1013_v4  ;;  %v426_v4 = vmul.f32 %v2026_v32, %v294_v57  ;;  %v459_v7 = vmul.f32 %v2026_v32, %v327_v0 }
  0xd7   : > { %1416 = vst [vmem:[%s1904_s30 + $0x338] sm:$0xff] %v1250_v9  ;;  %1518 = vmatmul.msk.bf16.gmra.mxu0 %vm787_vm1, %v734_v1  ;;  %v395_v1 = vmul.f32 %v2026_v32, %v263_v56  ;;  %v495_v9 = vadd.f32 %v2044_v44, %v363_v61 }
  0xd8   : > { %1353 = vst [vmem:[%s1904_s30 + $0x140] sm:$0xff] %v1093_v10  ;;  %1534 = vmatmul.msk.bf16.gmra.mxu1 %vm787_vm1, %v750_v5  ;;  %v427_v5 = vmul.f32 %v2026_v32, %v295_v58  ;;  %v558_v13 = vadd.f32 %v2044_v44, %v426_v4  ;;  %v591_v18 = vadd.f32 %v2044_v44, %v459_v7 }
  0xd9   : > { %1550 = vmatmul.msk.bf16.gmra.mxu2 %vm787_vm1, %v766_v6  ;;  %v458_v6 = vmul.f32 %v2026_v32, %v326_v63  ;;  %v527_v12 = vadd.f32 %v2044_v44, %v395_v1  ;;  %v623_v20 = vmax.f32 %v495_v9, 0.0  ;;  %v624_v63 = vmax.f32 %v496_v53, 0.0 }
  0xda   : > { %1566 = vmatmul.msk.bf16.gmra.mxu3 %vm787_vm1, %v782_v14  ;;  %v559_v14 = vadd.f32 %v2044_v44, %v427_v5  ;;  %v686_v22 = vmax.f32 %v558_v13, 0.0  ;;  %v719_v25 = vmax.f32 %v591_v18, 0.0 }
  0xdb   : > { %v590_v17 = vadd.f32 %v2044_v44, %v458_v6  ;;  %v655_v21 = vmax.f32 %v527_v12, 0.0 }
  0xdc   : > { %v1173_v24 = vpop.f32.mrf.mxu2  ;;  %v1015_v27 = vpop.f32.mrf.mxu0  ;;  %v687_v23 = vmax.f32 %v559_v14, 0.0 }
  0xdd   : > { %1385 = vst [vmem:[%s1904_s30 + $0x240] sm:$0xff] %v1173_v24  ;;  %v1253_v33 = vpop.f32.mrf.mxu3  ;;  %v1095_v34 = vpop.f32.mrf.mxu1  ;;  %v718_v24 = vmax.f32 %v590_v17, 0.0  ;;  %v752_v29 = vpack.c.bf16 %v655_v21, %v654_v3 }
  0xde   : > { %1322 = vst [vmem:[%s1904_s30 + $0x48] sm:$0xff] %v1015_v27  ;;  %v736_v27 = vpack.c.bf16 %v623_v20, %v622_v19  ;;  %v768_v30 = vpack.c.bf16 %v687_v23, %v686_v22 }
  0xdf   : > { %1417 = vst [vmem:[%s1904_s30 + $0x340] sm:$0xff] %v1253_v33  ;;  %v233_v33 = vld [vmem:[%s1644_s25 + $0xf8] sm:$0xff]  ;;  %v784_v40 = vpack.c.bf16 %v719_v25, %v718_v24 }
  0xe0   : > { %1354 = vst [vmem:[%s1904_s30 + $0x148] sm:$0xff] %v1095_v34  ;;  %v264_v34 = vld [vmem:[%s1644_s25 + $0x1f0] sm:$0xff]  ;;  %v365_v42 = vmul.f32 %v2026_v32, %v233_v33 }
  0xe1   : > { %v396_v43 = vmul.f32 %v2026_v32, %v264_v34 }
  0xe3   : > { %v528_v56 = vadd.f32 %v2044_v44, %v396_v43 }
  0xe4   : > { %v1175_v46 = vpop.f32.mrf.mxu2  ;;  %v1018_v48 = vpop.f32.mrf.mxu0 }
  0xe5   : > { %1386 = vst [vmem:[%s1904_s30 + $0x248] sm:$0xff] %v1175_v46  ;;  %v1255_v54 = vpop.f32.mrf.mxu3  ;;  %v1098_v55 = vpop.f32.mrf.mxu1  ;;  %v329_v46 = vld [vmem:[%s1644_s25 + $0x3f8] sm:$0xff]  ;;  %v656_v1 = vmax.f32 %v528_v56, 0.0 }
  0xe6   : > { %1323 = vst [vmem:[%s1904_s30 + $0x50] sm:$0xff] %v1018_v48  ;;  %v428_v48 = vmul.f32 %v2026_v32, %v296_v38  ;;  %v461_v51 = vmul.f32 %v2026_v32, %v329_v46 }
  0xe7   : > { %1418 = vst [vmem:[%s1904_s30 + $0x348] sm:$0xff] %v1255_v54  ;;  %1519 = vmatmul.msk.bf16.gmra.mxu0 %vm787_vm1, %v735_v47  ;;  %v397_v47 = vmul.f32 %v2026_v32, %v265_v37  ;;  %v497_v54 = vadd.f32 %v2044_v44, %v365_v42 }
  0xe8   : > { %1355 = vst [vmem:[%s1904_s30 + $0x150] sm:$0xff] %v1098_v55  ;;  %1535 = vmatmul.msk.bf16.gmra.mxu1 %vm787_vm1, %v751_v49  ;;  %v429_v49 = vmul.f32 %v2026_v32, %v297_v39  ;;  %v560_v58 = vadd.f32 %v2044_v44, %v428_v48  ;;  %v593_v62 = vadd.f32 %v2044_v44, %v461_v51 }
  0xe9   : > { %1551 = vmatmul.msk.bf16.gmra.mxu2 %vm787_vm1, %v767_v50  ;;  %v460_v50 = vmul.f32 %v2026_v32, %v328_v45  ;;  %v529_v57 = vadd.f32 %v2044_v44, %v397_v47  ;;  %v625_v0 = vmax.f32 %v497_v54, 0.0 }
  0xea   : > { %1567 = vmatmul.msk.bf16.gmra.mxu3 %vm787_vm1, %v783_v59  ;;  %v561_v59 = vadd.f32 %v2044_v44, %v429_v49  ;;  %v688_v5 = vmax.f32 %v560_v58, 0.0 }
  0xeb   : > { %v592_v61 = vadd.f32 %v2044_v44, %v460_v50  ;;  %v657_v4 = vmax.f32 %v529_v57, 0.0  ;;  %v737_v9 = vpack.c.bf16 %v625_v0, %v624_v63 }
  0xec   : > { %v1178_v8 = vpop.f32.mrf.mxu2  ;;  %v1020_v10 = vpop.f32.mrf.mxu0  ;;  %v689_v6 = vmax.f32 %v561_v59, 0.0 }
  0xed   : > { %1387 = vst [vmem:[%s1904_s30 + $0x250] sm:$0xff] %v1178_v8  ;;  %v1258_v15 = vpop.f32.mrf.mxu3  ;;  %v1100_v16 = vpop.f32.mrf.mxu1  ;;  %v720_v7 = vmax.f32 %v592_v61, 0.0  ;;  %v721_v8 = vmax.f32 %v593_v62, 0.0  ;;  %v753_v11 = vpack.c.bf16 %v657_v4, %v656_v1 }
  0xee   : > { %1324 = vst [vmem:[%s1904_s30 + $0x58] sm:$0xff] %v1020_v10  ;;  %v769_v44 = vpack.c.bf16 %v689_v6, %v688_v5 }
  0xef   : > { %1419 = vst [vmem:[%s1904_s30 + $0x350] sm:$0xff] %v1258_v15  ;;  %v785_v14 = vpack.c.bf16 %v721_v8, %v720_v7 }
  0xf0   : > { %1356 = vst [vmem:[%s1904_s30 + $0x158] sm:$0xff] %v1100_v16 }
  0xf4   : > { %v1180_v26 = vpop.f32.mrf.mxu2  ;;  %v1023_v28 = vpop.f32.mrf.mxu0 }
  0xf5   : > { %1388 = vst [vmem:[%s1904_s30 + $0x258] sm:$0xff] %v1180_v26  ;;  %v1260_v35 = vpop.f32.mrf.mxu3  ;;  %v1103_v36 = vpop.f32.mrf.mxu1 }
  0xf6   : > { %1325 = vst [vmem:[%s1904_s30 + $0x60] sm:$0xff] %v1023_v28 }
  0xf7   : > { %1420 = vst [vmem:[%s1904_s30 + $0x358] sm:$0xff] %v1260_v35  ;;  %1520 = vmatmul.msk.bf16.gmra.mxu0 %vm787_vm1, %v736_v27 }
  0xf8   : > { %1357 = vst [vmem:[%s1904_s30 + $0x160] sm:$0xff] %v1103_v36  ;;  %1536 = vmatmul.msk.bf16.gmra.mxu1 %vm787_vm1, %v752_v29 }
  0xf9   : > { %1552 = vmatmul.msk.bf16.gmra.mxu2 %vm787_vm1, %v768_v30 }
  0xfa   : > { %1568 = vmatmul.msk.bf16.gmra.mxu3 %vm787_vm1, %v784_v40 }
  0xfc   : > { %v1183_v52 = vpop.f32.mrf.mxu2  ;;  %v1025_v55 = vpop.f32.mrf.mxu0 }
  0xfd   : > { %1389 = vst [vmem:[%s1904_s30 + $0x260] sm:$0xff] %v1183_v52  ;;  %v1263_v60 = vpop.f32.mrf.mxu3  ;;  %v1105_v32 = vpop.f32.mrf.mxu1 }
  0xfe   : > { %1326 = vst [vmem:[%s1904_s30 + $0x68] sm:$0xff] %v1025_v55 }
  0xff   : > { %1421 = vst [vmem:[%s1904_s30 + $0x360] sm:$0xff] %v1263_v60 }
 0x100   : > { %1358 = vst [vmem:[%s1904_s30 + $0x168] sm:$0xff] %v1105_v32 }
 0x104   : > { %v1185_v2 = vpop.f32.mrf.mxu2  ;;  %v1028_v10 = vpop.f32.mrf.mxu0 }
 0x105   : > { %1390 = vst [vmem:[%s1904_s30 + $0x268] sm:$0xff] %v1185_v2  ;;  %v1265_v12 = vpop.f32.mrf.mxu3  ;;  %v1108_v13 = vpop.f32.mrf.mxu1 }
 0x106   : > { %1327 = vst [vmem:[%s1904_s30 + $0x70] sm:$0xff] %v1028_v10 }
 0x107   : > { %1422 = vst [vmem:[%s1904_s30 + $0x368] sm:$0xff] %v1265_v12  ;;  %1521 = vmatmul.msk.bf16.gmra.mxu0 %vm787_vm1, %v737_v9 }
 0x108   : > { %1359 = vst [vmem:[%s1904_s30 + $0x170] sm:$0xff] %v1108_v13  ;;  %1537 = vmatmul.msk.bf16.gmra.mxu1 %vm787_vm1, %v753_v11 }
 0x109   : > { %1553 = vmatmul.msk.bf16.gmra.mxu2 %vm787_vm1, %v769_v44 }
 0x10a   : > { %1569 = vmatmul.msk.bf16.gmra.mxu3 %vm787_vm1, %v785_v14 }
 0x10c   : > { %v1188_v15 = vpop.f32.mrf.mxu2  ;;  %v1030_v16 = vpop.f32.mrf.mxu0 }
 0x10d   : > { %1391 = vst [vmem:[%s1904_s30 + $0x270] sm:$0xff] %v1188_v15  ;;  %v1268_v17 = vpop.f32.mrf.mxu3  ;;  %v1110_v18 = vpop.f32.mrf.mxu1 }
 0x10e   : > { %1328 = vst [vmem:[%s1904_s30 + $0x78] sm:$0xff] %v1030_v16 }
 0x10f   : > { %1423 = vst [vmem:[%s1904_s30 + $0x370] sm:$0xff] %v1268_v17 }
 0x110   : > { %1360 = vst [vmem:[%s1904_s30 + $0x178] sm:$0xff] %v1110_v18 }
 0x114   : > { %v1190_v19 = vpop.f32.mrf.mxu2  ;;  %v1033_v20 = vpop.f32.mrf.mxu0 }
 0x115   : > { %1392 = vst [vmem:[%s1904_s30 + $0x278] sm:$0xff] %v1190_v19  ;;  %v1270_v3 = vpop.f32.mrf.mxu3  ;;  %v1113_v21 = vpop.f32.mrf.mxu1 }
 0x116   : > { %1329 = vst [vmem:[%s1904_s30 + $0x80] sm:$0xff] %v1033_v20 }
 0x117   : > { %1424 = vst [vmem:[%s1904_s30 + $0x378] sm:$0xff] %v1270_v3 }
 0x118   : > { %1361 = vst [vmem:[%s1904_s30 + $0x180] sm:$0xff] %v1113_v21 }
 0x11c   : > { %v1193_v22 = vpop.f32.mrf.mxu2  ;;  %v1035_v23 = vpop.f32.mrf.mxu0 }
 0x11d   : > { %1393 = vst [vmem:[%s1904_s30 + $0x280] sm:$0xff] %v1193_v22  ;;  %v1273_v24 = vpop.f32.mrf.mxu3  ;;  %v1115_v25 = vpop.f32.mrf.mxu1 }
 0x11e   : > { %1330 = vst [vmem:[%s1904_s30 + $0x88] sm:$0xff] %v1035_v23 }
 0x11f   : > { %1425 = vst [vmem:[%s1904_s30 + $0x380] sm:$0xff] %v1273_v24 }
 0x120   : > { %1362 = vst [vmem:[%s1904_s30 + $0x188] sm:$0xff] %v1115_v25 }
 0x124   : > { %v1195_v26 = vpop.f32.mrf.mxu2  ;;  %v1038_v27 = vpop.f32.mrf.mxu0 }
 0x125   : > { %1394 = vst [vmem:[%s1904_s30 + $0x288] sm:$0xff] %v1195_v26  ;;  %v1275_v28 = vpop.f32.mrf.mxu3  ;;  %v1118_v29 = vpop.f32.mrf.mxu1 }
 0x126   : > { %1331 = vst [vmem:[%s1904_s30 + $0x90] sm:$0xff] %v1038_v27 }
 0x127   : > { %1426 = vst [vmem:[%s1904_s30 + $0x388] sm:$0xff] %v1275_v28 }
 0x128   : > { %1363 = vst [vmem:[%s1904_s30 + $0x190] sm:$0xff] %v1118_v29 }
 0x12c   : > { %v1198_v30 = vpop.f32.mrf.mxu2  ;;  %v1040_v31 = vpop.f32.mrf.mxu0 }
 0x12d   : > { %1395 = vst [vmem:[%s1904_s30 + $0x290] sm:$0xff] %v1198_v30  ;;  %v1278_v33 = vpop.f32.mrf.mxu3  ;;  %v1120_v34 = vpop.f32.mrf.mxu1 }
 0x12e   : > { %1332 = vst [vmem:[%s1904_s30 + $0x98] sm:$0xff] %v1040_v31 }
 0x12f   : > { %1427 = vst [vmem:[%s1904_s30 + $0x390] sm:$0xff] %v1278_v33 }
 0x130   : > { %1364 = vst [vmem:[%s1904_s30 + $0x198] sm:$0xff] %v1120_v34 }
 0x134   : > { %v1200_v35 = vpop.f32.mrf.mxu2  ;;  %v1043_v36 = vpop.f32.mrf.mxu0 }
 0x135   : > { %1396 = vst [vmem:[%s1904_s30 + $0x298] sm:$0xff] %v1200_v35  ;;  %v1280_v37 = vpop.f32.mrf.mxu3  ;;  %v1123_v38 = vpop.f32.mrf.mxu1 }
 0x136   : > { %1333 = vst [vmem:[%s1904_s30 + $0xa0] sm:$0xff] %v1043_v36 }
 0x137   : > { %1428 = vst [vmem:[%s1904_s30 + $0x398] sm:$0xff] %v1280_v37 }
 0x138   : > { %1365 = vst [vmem:[%s1904_s30 + $0x1a0] sm:$0xff] %v1123_v38 }
 0x13c   : > { %v1203_v39 = vpop.f32.mrf.mxu2  ;;  %v1045_v40 = vpop.f32.mrf.mxu0 }
 0x13d   : > { %1397 = vst [vmem:[%s1904_s30 + $0x2a0] sm:$0xff] %v1203_v39  ;;  %v1283_v41 = vpop.f32.mrf.mxu3  ;;  %v1125_v42 = vpop.f32.mrf.mxu1 }
 0x13e   : > { %1334 = vst [vmem:[%s1904_s30 + $0xa8] sm:$0xff] %v1045_v40 }
 0x13f   : > { %1429 = vst [vmem:[%s1904_s30 + $0x3a0] sm:$0xff] %v1283_v41 }
 0x140   : > { %1366 = vst [vmem:[%s1904_s30 + $0x1a8] sm:$0xff] %v1125_v42 }
 0x144   : > { %v1205_v43 = vpop.f32.mrf.mxu2  ;;  %v1048_v45 = vpop.f32.mrf.mxu0 }
 0x145   : > { %1398 = vst [vmem:[%s1904_s30 + $0x2a8] sm:$0xff] %v1205_v43  ;;  %v1285_v46 = vpop.f32.mrf.mxu3  ;;  %v1128_v47 = vpop.f32.mrf.mxu1 }
 0x146   : > { %1335 = vst [vmem:[%s1904_s30 + $0xb0] sm:$0xff] %v1048_v45 }
 0x147   : > { %1430 = vst [vmem:[%s1904_s30 + $0x3a8] sm:$0xff] %v1285_v46 }
 0x148   : > { %1367 = vst [vmem:[%s1904_s30 + $0x1b0] sm:$0xff] %v1128_v47 }
 0x14c   : > { %v1208_v48 = vpop.f32.mrf.mxu2  ;;  %v1050_v49 = vpop.f32.mrf.mxu0 }
 0x14d   : > { %1399 = vst [vmem:[%s1904_s30 + $0x2b0] sm:$0xff] %v1208_v48  ;;  %v1288_v50 = vpop.f32.mrf.mxu3  ;;  %v1130_v51 = vpop.f32.mrf.mxu1 }
 0x14e   : > { %1336 = vst [vmem:[%s1904_s30 + $0xb8] sm:$0xff] %v1050_v49 }
 0x14f   : > { %1431 = vst [vmem:[%s1904_s30 + $0x3b0] sm:$0xff] %v1288_v50 }
 0x150   : > { %1368 = vst [vmem:[%s1904_s30 + $0x1b8] sm:$0xff] %v1130_v51 }
 0x154   : > { %v1210_v52 = vpop.f32.mrf.mxu2  ;;  %v1053_v53 = vpop.f32.mrf.mxu0 }
 0x155   : > { %1400 = vst [vmem:[%s1904_s30 + $0x2b8] sm:$0xff] %v1210_v52  ;;  %v1290_v54 = vpop.f32.mrf.mxu3  ;;  %v1133_v55 = vpop.f32.mrf.mxu1 }
 0x156   : > { %1337 = vst [vmem:[%s1904_s30 + $0xc0] sm:$0xff] %v1053_v53 }
 0x157   : > { %1432 = vst [vmem:[%s1904_s30 + $0x3b8] sm:$0xff] %v1290_v54 }
 0x158   : > { %1369 = vst [vmem:[%s1904_s30 + $0x1c0] sm:$0xff] %v1133_v55 }
 0x15c   : > { %v1213_v56 = vpop.f32.mrf.mxu2  ;;  %v1055_v57 = vpop.f32.mrf.mxu0 }
 0x15d   : > { %1401 = vst [vmem:[%s1904_s30 + $0x2c0] sm:$0xff] %v1213_v56  ;;  %v1293_v58 = vpop.f32.mrf.mxu3  ;;  %v1135_v59 = vpop.f32.mrf.mxu1 }
 0x15e   : > { %1338 = vst [vmem:[%s1904_s30 + $0xc8] sm:$0xff] %v1055_v57 }
 0x15f   : > { %1433 = vst [vmem:[%s1904_s30 + $0x3c0] sm:$0xff] %v1293_v58 }
 0x160   : > { %1370 = vst [vmem:[%s1904_s30 + $0x1c8] sm:$0xff] %v1135_v59 }
 0x164   : > { %v1215_v60 = vpop.f32.mrf.mxu2  ;;  %v1058_v32 = vpop.f32.mrf.mxu0 }
 0x165   : > { %1402 = vst [vmem:[%s1904_s30 + $0x2c8] sm:$0xff] %v1215_v60  ;;  %v1295_v61 = vpop.f32.mrf.mxu3  ;;  %v1138_v62 = vpop.f32.mrf.mxu1 }
 0x166   : > { %1339 = vst [vmem:[%s1904_s30 + $0xd0] sm:$0xff] %v1058_v32 }
 0x167   : > { %1434 = vst [vmem:[%s1904_s30 + $0x3c8] sm:$0xff] %v1295_v61 }
 0x168   : > { %1371 = vst [vmem:[%s1904_s30 + $0x1d0] sm:$0xff] %v1138_v62 }
 0x16c   : > { %v1218_v63 = vpop.f32.mrf.mxu2  ;;  %v1060_v0 = vpop.f32.mrf.mxu0 }
 0x16d   : > { %1403 = vst [vmem:[%s1904_s30 + $0x2d0] sm:$0xff] %v1218_v63  ;;  %v1298_v1 = vpop.f32.mrf.mxu3  ;;  %v1140_v4 = vpop.f32.mrf.mxu1 }
 0x16e   : > { %1340 = vst [vmem:[%s1904_s30 + $0xd8] sm:$0xff] %v1060_v0 }
 0x16f   : > { %1435 = vst [vmem:[%s1904_s30 + $0x3d0] sm:$0xff] %v1298_v1 }
 0x170   : > { %1372 = vst [vmem:[%s1904_s30 + $0x1d8] sm:$0xff] %v1140_v4 }
 0x174   : > { %v1220_v5 = vpop.f32.mrf.mxu2  ;;  %v1063_v6 = vpop.f32.mrf.mxu0 }
 0x175   : > { %1404 = vst [vmem:[%s1904_s30 + $0x2d8] sm:$0xff] %v1220_v5  ;;  %v1300_v7 = vpop.f32.mrf.mxu3  ;;  %v1143_v8 = vpop.f32.mrf.mxu1 }
 0x176   : > { %1341 = vst [vmem:[%s1904_s30 + $0xe0] sm:$0xff] %v1063_v6 }
 0x177   : > { %1436 = vst [vmem:[%s1904_s30 + $0x3d8] sm:$0xff] %v1300_v7 }
 0x178   : > { %1373 = vst [vmem:[%s1904_s30 + $0x1e0] sm:$0xff] %v1143_v8 }
 0x17c   : > { %v1223_v2 = vpop.f32.mrf.mxu2  ;;  %v1065_v9 = vpop.f32.mrf.mxu0 }
 0x17d   : > { %1405 = vst [vmem:[%s1904_s30 + $0x2e0] sm:$0xff] %v1223_v2  ;;  %v1303_v10 = vpop.f32.mrf.mxu3  ;;  %v1145_v11 = vpop.f32.mrf.mxu1 }
 0x17e   : > { %1342 = vst [vmem:[%s1904_s30 + $0xe8] sm:$0xff] %v1065_v9 }
 0x17f   : > { %1437 = vst [vmem:[%s1904_s30 + $0x3e0] sm:$0xff] %v1303_v10 }
 0x180   : > { %1374 = vst [vmem:[%s1904_s30 + $0x1e8] sm:$0xff] %v1145_v11 }
 0x184   : > { %v1225_v44 = vpop.f32.mrf.mxu2  ;;  %v1068_v12 = vpop.f32.mrf.mxu0 }
 0x185   : > { %1406 = vst [vmem:[%s1904_s30 + $0x2e8] sm:$0xff] %v1225_v44  ;;  %v1305_v13 = vpop.f32.mrf.mxu3  ;;  %v1148_v14 = vpop.f32.mrf.mxu1 }
 0x186   : > { %1343 = vst [vmem:[%s1904_s30 + $0xf0] sm:$0xff] %v1068_v12 }
 0x187   : > { %1438 = vst [vmem:[%s1904_s30 + $0x3e8] sm:$0xff] %v1305_v13 }
 0x188   : > { %1375 = vst [vmem:[%s1904_s30 + $0x1f0] sm:$0xff] %v1148_v14 }
 0x18c   : > { %v1228_v15 = vpop.f32.mrf.mxu2  ;;  %v1070_v16 = vpop.f32.mrf.mxu0 }
 0x18d   : > { %1407 = vst [vmem:[%s1904_s30 + $0x2f0] sm:$0xff] %v1228_v15  ;;  %v1308_v17 = vpop.f32.mrf.mxu3  ;;  %v1150_v18 = vpop.f32.mrf.mxu1 }
 0x18e   : > { %1344 = vst [vmem:[%s1904_s30 + $0xf8] sm:$0xff] %v1070_v16 }
 0x18f   : > { %1439 = vst [vmem:[%s1904_s30 + $0x3f0] sm:$0xff] %v1308_v17 }
 0x190   : > { %1376 = vst [vmem:[%s1904_s30 + $0x1f8] sm:$0xff] %v1150_v18 }
 0x194   : > { %v1230_v19 = vpop.f32.mrf.mxu2 }
 0x195   : > { %1408 = vst [vmem:[%s1904_s30 + $0x2f8] sm:$0xff] %v1230_v19  ;;  %v1310_v20 = vpop.f32.mrf.mxu3 }
 0x196   : > { %1440 = vst [vmem:[%s1904_s30 + $0x3f8] sm:$0xff] %v1310_v20 }
 0x197 PF: > { %s14_s15 = sadd.s32 1, %s1593_s15  }
 0x198   : > { %p11_p4 = scmp.ge.s32.totalorder %s14_s15, 4  }
 0x19a   :  { %13 = sbr.rel (!%p11_p4) target bundleno = 1 (0x1), region = 66 }

// kernel: generator_forward.19
= control target key start
LH: loop header
LB: loop body
LE: loop exit
PB: predicated region body
PF: predicated region fallthrough
CT: control target
= control target key end

     0   :  { %s286_s0 = inlined_call_operand.vmem [shape: f32[48,512], index: 0, kind: input, shape index: {}]   ;;  %s287_s1 = inlined_call_operand.vmem [shape: f32[48,512], index: 1, kind: output, shape index: {}]  }
   0x1   :  { %v8_v0 = vld [vmem:[%s286_s0] sm:$0xff]  ;;  %v9_v1 = vld [vmem:[%s286_s0 + $0x8] sm:$0xff]  ;;  %v10_v2 = vld [vmem:[%s286_s0 + $0x10] sm:$0xff] }
   0x2   :  { %84 = vtanh.f32 %v8_v0  ;;  %v11_v3 = vld [vmem:[%s286_s0 + $0x18] sm:$0xff]  ;;  %v12_v4 = vld [vmem:[%s286_s0 + $0x20] sm:$0xff]  ;;  %v13_v5 = vld [vmem:[%s286_s0 + $0x28] sm:$0xff] }
   0x3   :  { %86 = vtanh.f32 %v9_v1  ;;  %v14_v6 = vld [vmem:[%s286_s0 + $0x30] sm:$0xff]  ;;  %v15_v7 = vld [vmem:[%s286_s0 + $0x38] sm:$0xff]  ;;  %v16_v8 = vld [vmem:[%s286_s0 + $0x40] sm:$0xff] }
   0x4   :  { %88 = vtanh.f32 %v10_v2  ;;  %v17_v10 = vld [vmem:[%s286_s0 + $0x48] sm:$0xff]  ;;  %v18_v12 = vld [vmem:[%s286_s0 + $0x50] sm:$0xff]  ;;  %v19_v14 = vld [vmem:[%s286_s0 + $0x58] sm:$0xff] }
   0x5   :  { %90 = vtanh.f32 %v11_v3  ;;  %v20_v16 = vld [vmem:[%s286_s0 + $0x60] sm:$0xff]  ;;  %v21_v18 = vld [vmem:[%s286_s0 + $0x68] sm:$0xff]  ;;  %v22_v20 = vld [vmem:[%s286_s0 + $0x70] sm:$0xff] }
   0x6   :  { %92 = vtanh.f32 %v12_v4  ;;  %v23_v22 = vld [vmem:[%s286_s0 + $0x78] sm:$0xff]  ;;  %v24_v24 = vld [vmem:[%s286_s0 + $0x80] sm:$0xff]  ;;  %v25_v26 = vld [vmem:[%s286_s0 + $0x88] sm:$0xff] }
   0x7   :  { %94 = vtanh.f32 %v13_v5  ;;  %v26_v28 = vld [vmem:[%s286_s0 + $0x90] sm:$0xff]  ;;  %v27_v30 = vld [vmem:[%s286_s0 + $0x98] sm:$0xff]  ;;  %v28_v32 = vld [vmem:[%s286_s0 + $0xa0] sm:$0xff] }
   0x8   :  { %v85_v9 = vpop.eup %84  ;;  %96 = vtanh.f32 %v14_v6  ;;  %v29_v34 = vld [vmem:[%s286_s0 + $0xa8] sm:$0xff]  ;;  %v30_v36 = vld [vmem:[%s286_s0 + $0xb0] sm:$0xff]  ;;  %v31_v38 = vld [vmem:[%s286_s0 + $0xb8] sm:$0xff] }
   0x9   :  { %v87_v11 = vpop.eup %86  ;;  %56 = vst [vmem:[%s287_s1] sm:$0xff] %v85_v9  ;;  %98 = vtanh.f32 %v15_v7 }
   0xa   :  { %v89_v13 = vpop.eup %88  ;;  %57 = vst [vmem:[%s287_s1 + $0x8] sm:$0xff] %v87_v11  ;;  %100 = vtanh.f32 %v16_v8 }
   0xb   :  { %v91_v15 = vpop.eup %90  ;;  %58 = vst [vmem:[%s287_s1 + $0x10] sm:$0xff] %v89_v13  ;;  %102 = vtanh.f32 %v17_v10 }
   0xc   :  { %v93_v17 = vpop.eup %92  ;;  %59 = vst [vmem:[%s287_s1 + $0x18] sm:$0xff] %v91_v15  ;;  %104 = vtanh.f32 %v18_v12 }
   0xd   :  { %v95_v19 = vpop.eup %94  ;;  %60 = vst [vmem:[%s287_s1 + $0x20] sm:$0xff] %v93_v17  ;;  %106 = vtanh.f32 %v19_v14 }
   0xe   :  { %v97_v21 = vpop.eup %96  ;;  %61 = vst [vmem:[%s287_s1 + $0x28] sm:$0xff] %v95_v19  ;;  %108 = vtanh.f32 %v20_v16 }
   0xf   :  { %v99_v23 = vpop.eup %98  ;;  %62 = vst [vmem:[%s287_s1 + $0x30] sm:$0xff] %v97_v21  ;;  %110 = vtanh.f32 %v21_v18 }
  0x10   :  { %v101_v25 = vpop.eup %100  ;;  %63 = vst [vmem:[%s287_s1 + $0x38] sm:$0xff] %v99_v23  ;;  %112 = vtanh.f32 %v22_v20 }
  0x11   :  { %v103_v27 = vpop.eup %102  ;;  %64 = vst [vmem:[%s287_s1 + $0x40] sm:$0xff] %v101_v25  ;;  %114 = vtanh.f32 %v23_v22 }
  0x12   :  { %v105_v29 = vpop.eup %104  ;;  %65 = vst [vmem:[%s287_s1 + $0x48] sm:$0xff] %v103_v27  ;;  %116 = vtanh.f32 %v24_v24 }
  0x13   :  { %v107_v31 = vpop.eup %106  ;;  %66 = vst [vmem:[%s287_s1 + $0x50] sm:$0xff] %v105_v29  ;;  %118 = vtanh.f32 %v25_v26 }
  0x14   :  { %v109_v33 = vpop.eup %108  ;;  %67 = vst [vmem:[%s287_s1 + $0x58] sm:$0xff] %v107_v31  ;;  %120 = vtanh.f32 %v26_v28 }
  0x15   :  { %v111_v35 = vpop.eup %110  ;;  %68 = vst [vmem:[%s287_s1 + $0x60] sm:$0xff] %v109_v33  ;;  %122 = vtanh.f32 %v27_v30 }
  0x16   :  { %v113_v37 = vpop.eup %112  ;;  %69 = vst [vmem:[%s287_s1 + $0x68] sm:$0xff] %v111_v35  ;;  %124 = vtanh.f32 %v28_v32 }
  0x17   :  { %v115_v39 = vpop.eup %114  ;;  %70 = vst [vmem:[%s287_s1 + $0x70] sm:$0xff] %v113_v37  ;;  %126 = vtanh.f32 %v29_v34 }
  0x18   :  { %v117_v40 = vpop.eup %116  ;;  %71 = vst [vmem:[%s287_s1 + $0x78] sm:$0xff] %v115_v39  ;;  %128 = vtanh.f32 %v30_v36 }
  0x19   :  { %v119_v41 = vpop.eup %118  ;;  %72 = vst [vmem:[%s287_s1 + $0x80] sm:$0xff] %v117_v40  ;;  %130 = vtanh.f32 %v31_v38 }
  0x1a   :  { %v121_v42 = vpop.eup %120  ;;  %73 = vst [vmem:[%s287_s1 + $0x88] sm:$0xff] %v119_v41 }
  0x1b   :  { %v123_v43 = vpop.eup %122  ;;  %74 = vst [vmem:[%s287_s1 + $0x90] sm:$0xff] %v121_v42 }
  0x1c   :  { %v125_v44 = vpop.eup %124  ;;  %75 = vst [vmem:[%s287_s1 + $0x98] sm:$0xff] %v123_v43 }
  0x1d   :  { %v127_v45 = vpop.eup %126  ;;  %76 = vst [vmem:[%s287_s1 + $0xa0] sm:$0xff] %v125_v44 }
  0x1e   :  { %v129_v46 = vpop.eup %128  ;;  %77 = vst [vmem:[%s287_s1 + $0xa8] sm:$0xff] %v127_v45 }
  0x1f   :  { %v131_v47 = vpop.eup %130  ;;  %78 = vst [vmem:[%s287_s1 + $0xb0] sm:$0xff] %v129_v46 }
  0x20   :  { %79 = vst [vmem:[%s287_s1 + $0xb8] sm:$0xff] %v131_v47 }

</bundles_post_ra>
